<compile_context>
chip_gen: v7x
topology: tpu7x:2x2x1
jax: 0.10.0
libtpu: 0.0.40
codegen_flags: <defaults>
</compile_context>

<pallas_src>
import functools

import numpy as np

import jax
import jax.numpy as jnp
from jax.experimental import pallas as pl
from jax.experimental.pallas import tpu as pltpu

DROPOUT_P = 0.1


def _round_up(x, m):
    return (x + m - 1) // m * m


def _ffn_kernel(*refs, train):
    # grid = (row tiles [parallel], hidden slabs [arbitrary / reduction])
    # x_ref : (tm, C)   bf16   input rows (resident across the H axis)
    # w1_ref: (C, th)   bf16   W1 slab
    # b1_ref: (1, th)   f32
    # w2_ref: (th, C)   bf16   W2 slab
    # b2_ref: (1, C)    f32
    # rnd_ref: (tm, C)  f32    uniform [0,1) randoms (train mode only)
    # o_ref : (tm, C)   f32    output rows
    # acc_ref: (tm, C)  f32    VMEM accumulator scratch
    if train:
        x_ref, w1_ref, b1_ref, w2_ref, b2_ref, rnd_ref, o_ref, acc_ref = refs
    else:
        x_ref, w1_ref, b1_ref, w2_ref, b2_ref, o_ref, acc_ref = refs
        rnd_ref = None

    k = pl.program_id(1)
    n_k = pl.num_programs(1)

    @pl.when(k == 0)
    def _init():
        acc_ref[...] = jnp.zeros_like(acc_ref)

    # Linear 1 (+bias) + ReLU for this hidden slab.  bf16 operands on the MXU,
    # f32 accumulation; bias add and ReLU stay f32 on the VPU.
    h = jnp.dot(x_ref[...], w1_ref[...],
                preferred_element_type=jnp.float32) + b1_ref[...]
    h = jnp.maximum(h, 0.0)

    # Linear 2 partial product, accumulated in f32.
    acc_ref[...] += jnp.dot(h.astype(w2_ref.dtype), w2_ref[...],
                            preferred_element_type=jnp.float32)

    @pl.when(k == n_k - 1)
    def _finalize():
        y = acc_ref[...] + b2_ref[...]
        if train:
            # Inverted dropout matching nn.Dropout(p) training semantics.
            keep = rnd_ref[...] >= jnp.float32(DROPOUT_P)
            y = jnp.where(keep, y * (1.0 / (1.0 - DROPOUT_P)), 0.0)
        o_ref[...] = y.astype(o_ref.dtype)


def feed_forward(x, w1, b1, w2, b2, *, train=False, seed=0, tm=256, th=512,
                 matmul_dtype=jnp.bfloat16):
    """Fused FFN: Dropout(W2 @ ReLU(W1 @ x + b1) + b2).

    x: (B, T, C) f32; w1: (C, H); b1: (H,); w2: (H, C); b2: (C,).
    Returns (B, T, C) in x.dtype.
    """
    B, T, C = x.shape
    H = w1.shape[1]
    assert w1.shape == (C, H) and w2.shape == (H, C)
    assert b1.shape == (H,) and b2.shape == (C,)

    M = B * T
    # Row tile: as large as possible (feeds the MXU, amortizes per-step cost),
    # clamped to the (8-aligned) number of rows we actually have.
    tm = int(min(tm, _round_up(M, 8)))
    M_pad = _round_up(M, tm)

    # Hidden slab: bounds the (tm, th) intermediate and streams W1/W2.
    th = int(min(th, H))
    if H % th != 0:
        th = H
    n_k = H // th

    x2 = x.reshape(M, C)
    if M_pad != M:
        x2 = jnp.pad(x2, ((0, M_pad - M), (0, 0)))

    # bf16 MXU operands, f32 biases.
    xm = x2.astype(matmul_dtype)
    w1m = w1.astype(matmul_dtype)
    w2m = w2.astype(matmul_dtype)
    b1r = b1.reshape(1, H).astype(jnp.float32)
    b2r = b2.reshape(1, C).astype(jnp.float32)

    in_specs = [
        pl.BlockSpec((tm, C), lambda i, k: (i, 0)),   # x rows
        pl.BlockSpec((C, th), lambda i, k: (0, k)),   # W1 slab
        pl.BlockSpec((1, th), lambda i, k: (0, k)),   # b1 slab
        pl.BlockSpec((th, C), lambda i, k: (k, 0)),   # W2 slab
        pl.BlockSpec((1, C), lambda i, k: (0, 0)),    # b2
    ]
    args = [xm, w1m, b1r, w2m, b2r]
    if train:
        rnd = jax.random.uniform(jax.random.PRNGKey(seed), (M_pad, C),
                                 dtype=jnp.float32)
        in_specs.append(pl.BlockSpec((tm, C), lambda i, k: (i, 0)))
        args.append(rnd)

    # Scoped-VMEM budget from the actual tile footprint (double-buffered
    # inputs/outputs + f32 accumulator), with headroom, capped below the
    # 64 MiB/TC physical VMEM of v7x.
    mi = np.dtype(matmul_dtype).itemsize
    oi = np.dtype(x.dtype).itemsize
    tile_bytes = (tm * C * mi       # x tile
                  + C * th * mi     # W1 slab
                  + th * 4          # b1 slab
                  + th * C * mi     # W2 slab
                  + C * 4           # b2
                  + (tm * C * 4 if train else 0)   # dropout randoms
                  + tm * C * oi)    # out tile
    needed = 2 * tile_bytes + tm * C * 4
    vmem_limit = int(min(max(needed * 2, 32 * 1024 * 1024), 64 * 1024 * 1024))

    kernel = functools.partial(_ffn_kernel, train=train)

    out = pl.pallas_call(
        kernel,
        out_shape=jax.ShapeDtypeStruct((M_pad, C), x.dtype),
        grid_spec=pltpu.PrefetchScalarGridSpec(
            num_scalar_prefetch=0,
            grid=(M_pad // tm, n_k),               # rows (parallel) x H (reduce)
            in_specs=in_specs,
            out_specs=pl.BlockSpec((tm, C), lambda i, k: (i, 0)),
            scratch_shapes=[pltpu.VMEM((tm, C), jnp.float32)],   # f32 accumulator
        ),
        compiler_params=pltpu.CompilerParams(
            dimension_semantics=("parallel", "arbitrary"),
            vmem_limit_bytes=vmem_limit),
    )(*args)

    return out[:M].reshape(B, T, C)


def _reference(x, w1, b1, w2, b2, matmul_dtype=jnp.bfloat16):
    # Emulates the kernel's precision: bf16 matmul operands, f32 accumulation,
    # f32 bias/ReLU.  (Eval mode: dropout is identity.)
    f32 = jnp.float32
    xm = x.astype(matmul_dtype).astype(f32)
    w1m = w1.astype(matmul_dtype).astype(f32)
    w2m = w2.astype(matmul_dtype).astype(f32)
    h = jnp.maximum(
        jnp.dot(xm, w1m, precision=jax.lax.Precision.HIGHEST) + b1, 0.0)
    hm = h.astype(matmul_dtype).astype(f32)
    return jnp.dot(hm, w2m, precision=jax.lax.Precision.HIGHEST) + b2


if __name__ == "__main__":
    # Small shapes consistent with the module: n_embed = 384 (the real model
    # width, a multiple of 128), short sequence.
    B, T, n_embed = 2, 128, 384
    hidden = 4 * n_embed

    key = jax.random.PRNGKey(0)
    kx, k1, k2, k3, k4 = jax.random.split(key, 5)

    x = jax.random.normal(kx, (B, T, n_embed), dtype=jnp.float32)
    # Deterministic init mimicking nn.Linear's uniform(-1/sqrt(fan_in), ...).
    lim1 = 1.0 / (n_embed ** 0.5)
    lim2 = 1.0 / (hidden ** 0.5)
    w1 = jax.random.uniform(k1, (n_embed, hidden), jnp.float32, -lim1, lim1)
    b1 = jax.random.uniform(k2, (hidden,), jnp.float32, -lim1, lim1)
    w2 = jax.random.uniform(k3, (hidden, n_embed), jnp.float32, -lim2, lim2)
    b2 = jax.random.uniform(k4, (n_embed,), jnp.float32, -lim2, lim2)

    # Eval-mode forward (dropout is identity), matching module.eval() semantics.
    y = feed_forward(x, w1, b1, w2, b2, train=False)
    jax.block_until_ready(y)

    y_ref = _reference(x, w1, b1, w2, b2)
    assert y.shape == x.shape
    assert jnp.allclose(y, y_ref, atol=2e-3, rtol=2e-3), "mismatch vs reference"

    # Train-mode forward: inverted dropout (mask streamed into the kernel).
    y_tr = feed_forward(x, w1, b1, w2, b2, train=True, seed=123)
    jax.block_until_ready(y_tr)
    keep_mask = y_tr != 0.0
    drop_rate = float(1.0 - jnp.mean(keep_mask.astype(jnp.float32)))
    assert 0.05 < drop_rate < 0.15, f"unexpected drop rate {drop_rate}"
    scaled_err = jnp.where(keep_mask, y_tr - y * (1.0 / (1.0 - DROPOUT_P)), 0.0)
    assert float(jnp.max(jnp.abs(scaled_err))) < 1e-3, "dropout scaling mismatch"

    print("KERNEL_OK")
</pallas_src>

<mosaic_0001>
module attributes {stable_mosaic.version = 11 : i64} {
  func.func @_ffn_kernel(%arg0: i32, %arg1: i32, %arg2: memref<256x384xbf16, #tpu.memory_space<vmem>>, %arg3: memref<384x512xbf16, #tpu.memory_space<vmem>>, %arg4: memref<1x512xf32, #tpu.memory_space<vmem>>, %arg5: memref<512x384xbf16, #tpu.memory_space<vmem>>, %arg6: memref<1x384xf32, #tpu.memory_space<vmem>>, %arg7: memref<256x384xf32, #tpu.memory_space<vmem>>, %arg8: memref<256x384xf32, #tpu.memory_space<vmem>>) attributes {dimension_semantics = [#tpu.dimension_semantics<parallel>, #tpu.dimension_semantics<arbitrary>], iteration_bounds = array<i64: 1, 3>, scalar_prefetch = 0 : i64, scratch_operands = 1 : i64, tpu.core_type = #tpu.core_type<tc>, window_params = [{transform_indices = @transform_0, window_bounds = array<i64: 256, 384>}, {transform_indices = @transform_1, window_bounds = array<i64: 384, 512>}, {transform_indices = @transform_2, window_bounds = array<i64: 1, 512>}, {transform_indices = @transform_3, window_bounds = array<i64: 512, 384>}, {pipeline_mode = #tpu.pipeline_mode<synchronous>, transform_indices = @transform_4, window_bounds = array<i64: 1, 384>}, {transform_indices = @transform_5, window_bounds = array<i64: 256, 384>}]} {
    %c0_i32 = arith.constant 0 : i32
    %0 = arith.cmpi eq, %arg1, %c0_i32 : i32
    %1 = arith.extui %0 : i1 to i32
    %c0_i32_0 = arith.constant 0 : i32
    %2 = arith.cmpi ne, %1, %c0_i32_0 : i32
    scf.if %2 {
      %cst_15 = arith.constant 0.000000e+00 : f32
      %20 = vector.broadcast %cst_15 : f32 to vector<256x384xf32>
      %c0_16 = arith.constant 0 : index
      %c0_17 = arith.constant 0 : index
      %21 = vector.load %arg8[%c0_16, %c0_17] : memref<256x384xf32, #tpu.memory_space<vmem>>, vector<256x384xf32>
      tpu.vector_store %arg8[%c0_16, %c0_17], %20 {strides = array<i32>} : memref<256x384xf32, #tpu.memory_space<vmem>>, vector<256x384xf32>,
    } else {
    }
    %c0 = arith.constant 0 : index
    %c0_1 = arith.constant 0 : index
    %3 = vector.load %arg2[%c0, %c0_1] : memref<256x384xbf16, #tpu.memory_space<vmem>>, vector<256x384xbf16>
    %c0_2 = arith.constant 0 : index
    %c0_3 = arith.constant 0 : index
    %4 = vector.load %arg3[%c0_2, %c0_3] : memref<384x512xbf16, #tpu.memory_space<vmem>>, vector<384x512xbf16>
    %cst = arith.constant dense<0.000000e+00> : vector<256x512xf32>
    %5 = tpu.matmul %3, %4, %cst {dimension_numbers = #tpu.dot_dimension_numbers<[1], [0], [0], [1], [0, 0, 1, 1], [], []>} : vector<256x384xbf16>, vector<384x512xbf16>, vector<256x512xf32> -> vector<256x512xf32>
    %c0_4 = arith.constant 0 : index
    %c0_5 = arith.constant 0 : index
    %6 = vector.load %arg4[%c0_4, %c0_5] : memref<1x512xf32, #tpu.memory_space<vmem>>, vector<1x512xf32>
    %7 = vector.broadcast %6 : vector<1x512xf32> to vector<256x512xf32>
    %8 = arith.addf %5, %7 : vector<256x512xf32>
    %cst_6 = arith.constant 0.000000e+00 : f32
    %9 = vector.broadcast %cst_6 : f32 to vector<256x512xf32>
    %10 = arith.maximumf %8, %9 : vector<256x512xf32>
    %c0_7 = arith.constant 0 : index
    %c0_8 = arith.constant 0 : index
    %11 = vector.load %arg8[%c0_7, %c0_8] : memref<256x384xf32, #tpu.memory_space<vmem>>, vector<256x384xf32>
    %12 = arith.truncf %10 : vector<256x512xf32> to vector<256x512xbf16>
    %c0_9 = arith.constant 0 : index
    %c0_10 = arith.constant 0 : index
    %13 = vector.load %arg5[%c0_9, %c0_10] : memref<512x384xbf16, #tpu.memory_space<vmem>>, vector<512x384xbf16>
    %cst_11 = arith.constant dense<0.000000e+00> : vector<256x384xf32>
    %14 = tpu.matmul %12, %13, %cst_11 {dimension_numbers = #tpu.dot_dimension_numbers<[1], [0], [0], [1], [0, 0, 1, 1], [], []>} : vector<256x512xbf16>, vector<512x384xbf16>, vector<256x384xf32> -> vector<256x384xf32>
    %15 = arith.addf %11, %14 : vector<256x384xf32>
    %c0_12 = arith.constant 0 : index
    %c0_13 = arith.constant 0 : index
    %16 = vector.load %arg8[%c0_12, %c0_13] : memref<256x384xf32, #tpu.memory_space<vmem>>, vector<256x384xf32>
    tpu.vector_store %arg8[%c0_12, %c0_13], %15 {strides = array<i32>} : memref<256x384xf32, #tpu.memory_space<vmem>>, vector<256x384xf32>,
    %c2_i32 = arith.constant 2 : i32
    %17 = arith.cmpi eq, %arg1, %c2_i32 : i32
    %18 = arith.extui %17 : i1 to i32
    %c0_i32_14 = arith.constant 0 : i32
    %19 = arith.cmpi ne, %18, %c0_i32_14 : i32
    scf.if %19 {
      %c0_15 = arith.constant 0 : index
      %c0_16 = arith.constant 0 : index
      %20 = vector.load %arg8[%c0_15, %c0_16] : memref<256x384xf32, #tpu.memory_space<vmem>>, vector<256x384xf32>
      %c0_17 = arith.constant 0 : index
      %c0_18 = arith.constant 0 : index
      %21 = vector.load %arg6[%c0_17, %c0_18] : memref<1x384xf32, #tpu.memory_space<vmem>>, vector<1x384xf32>
      %22 = vector.broadcast %21 : vector<1x384xf32> to vector<256x384xf32>
      %23 = arith.addf %20, %22 : vector<256x384xf32>
      %c0_19 = arith.constant 0 : index
      %c0_20 = arith.constant 0 : index
      %24 = vector.load %arg7[%c0_19, %c0_20] : memref<256x384xf32, #tpu.memory_space<vmem>>, vector<256x384xf32>
      tpu.vector_store %arg7[%c0_19, %c0_20], %23 {strides = array<i32>} : memref<256x384xf32, #tpu.memory_space<vmem>>, vector<256x384xf32>,
    } else {
    }
    return
  }
  func.func @transform_0(%arg0: i32, %arg1: i32) -> (i32, i32) {
    %c0_i32 = arith.constant 0 : i32
    %c0_i32_0 = arith.constant 0 : i32
    return %arg0, %c0_i32 : i32, i32
  }
  func.func @transform_1(%arg0: i32, %arg1: i32) -> (i32, i32) {
    %c0_i32 = arith.constant 0 : i32
    %c0_i32_0 = arith.constant 0 : i32
    return %c0_i32, %arg1 : i32, i32
  }
  func.func @transform_2(%arg0: i32, %arg1: i32) -> (i32, i32) {
    %c0_i32 = arith.constant 0 : i32
    %c0_i32_0 = arith.constant 0 : i32
    return %c0_i32, %arg1 : i32, i32
  }
  func.func @transform_3(%arg0: i32, %arg1: i32) -> (i32, i32) {
    %c0_i32 = arith.constant 0 : i32
    %c0_i32_0 = arith.constant 0 : i32
    return %arg1, %c0_i32 : i32, i32
  }
  func.func @transform_4(%arg0: i32, %arg1: i32) -> (i32, i32) {
    %c0_i32 = arith.constant 0 : i32
    %c0_i32_0 = arith.constant 0 : i32
    %c0_i32_1 = arith.constant 0 : i32
    return %c0_i32, %c0_i32_0 : i32, i32
  }
  func.func @transform_5(%arg0: i32, %arg1: i32) -> (i32, i32) {
    %c0_i32 = arith.constant 0 : i32
    %c0_i32_0 = arith.constant 0 : i32
    return %arg0, %c0_i32 : i32, i32
  }
}

</mosaic_0001>

<bundles_post_ra>
// kernel: tpu_custom_call.1
= control target key start
LH: loop header
LB: loop body
LE: loop exit
PB: predicated region body
PF: predicated region fallthrough
CT: control target
= control target key end

     0   :  { %s7069_s0 = inlined_call_operand.hbm [shape: bf16[256,384], index: 0, kind: input, shape index: {}]   ;;  %s7070_s1 = inlined_call_operand.hbm [shape: bf16[384,1536], index: 1, kind: input, shape index: {}]   ;;  %s7071_s2 = inlined_call_operand.hbm [shape: f32[1,1536], index: 2, kind: input, shape index: {}]   ;;  %s7072_s3 = inlined_call_operand.hbm [shape: bf16[1536,384], index: 3, kind: input, shape index: {}]   ;;  %s7073_s4 = inlined_call_operand.hbm [shape: f32[1,384], index: 4, kind: input, shape index: {}]   ;;  %s7074_s5 = inlined_call_operand.hbm [shape: f32[256,384], index: 5, kind: output, shape index: {}]  }
   0x1   :  { %7089 = sst [smem:[#allocation21_spill]] %s7070_s1 }
   0x2   :  { %7090 = sst [smem:[#allocation22_spill]] %s7073_s4 }
   0x3   :  { %7091 = sst [smem:[#allocation23_spill]] %s7074_s5 }
   0x4   :  { %10 = vsyncpa [#allocation4], 0 }
   0x5   :  { %11 = vsyncpa [#allocation7], 0 }
   0x6   :  { %13 = vsyncpa [#allocation7 + $0x1], 0 }
   0x7   :  { %14 = vsyncpa [#allocation10], 0 }
   0x8   :  { %16 = vsyncpa [#allocation10 + $0x1], 0 }
   0x9   :  { %17 = vsyncpa [#allocation5], 0  ;;  %s5969_s18 = smov 0   ;;  %s5971_s19 = smov 0  }
   0xa   :  { %s5973_s20 = smov 0   ;;  %s5975_s21 = smov 0  }
   0xb   :  { %s5977_s22 = smov 0   ;;  %s5979_s23 = smov 0  }
   0xc LB: > { %7092 = sst [smem:[#allocation18_spill]] %s5914_s21  ;;  %s5998_s24 = sadd.s32 4294967295, %s5922_s23   ;;  %s5922_s23 = sphi %s5979_s23, %s23_s23   ;;  %s5918_s22 = sphi %s5977_s22, %s7125_s22   ;;  %s5914_s21 = sphi %s5975_s21, %s7124_s21   ;;  %s5910_s20 = sphi %s5973_s20, %s7123_s20   ;;  %s5906_s19 = sphi %s5971_s19, %s7122_s19   ;;  %s5902_s18 = sphi %s5969_s18, %s7121_s18  }
   0xd   : > { %s68_s25 = sadd.s32 1, %s5910_s20  ;;  %p75_p0 = scmp.ne.s32.totalorder %s5910_s20, %s5906_s19 }
   0xe   : > { %p76_p1 = scmp.eq.s32.totalorder %s5922_s23, 0  ;;  %p81_p2 = scmp.ne.s32.totalorder %s5906_s19, %s5902_s18 }
   0xf   : > { %p7075_p3 = scmp.eq.s32.totalorder %s5998_s24, 0  ;;  %p4434_p5 = scmp.ge.s32.totalorder %s5922_s23, 1 }
  0x10   : > { %p77_p4 = por %p76_p1, %p75_p0  ;;  %p191_p7 = scmp.lt.s32.totalorder %s5922_s23, 4 }
  0x11   : > { %p6009_p6 = por %p7075_p3, %p81_p2  ;;  %s5924_s28 = smov [#allocation11]  }
  0x12   : > { %p6014_p8 = pnand %p4434_p5, %p191_p7  ;;  %s221_s29 = sshll.u32 %s5924_s28, 4  ;;  %s222_s29 = int_to_ptr.vmem [resolvable:$true] %s221_s29 }
  0x13   : > { %s7093_s26 = scalar_select %p6009_p6, 1, 0 }
  0x14   : > { %s7094_s27 = scalar_select %p6014_p8, 1, 0 }
  0x15   : > { %p5264_p9 = pneg %p6014_p8  ;;  %p5283_p10 = scmp.lt.s32.totalorder %s5922_s23, 3 }
  0x16   : > { %s7079_s30 = sand.u32 1, %s5922_s23   ;;  %s7097_s4 = sld [smem:[#allocation22_spill]] }
  0x17   : > { %p6024_p11 = pnand %p5264_p9, %p7075_p3  ;;  %p6028_p12 = pnand %p5283_p10, %p77_p4 }
  0x19   : > { %s7095_s6 = scalar_select %p6024_p11, 1, 0 }
  0x1a   : > { %s7096_s7 = scalar_select %p6028_p12, 1, 0 }
  0x1b   : > { %p7080_p0 = pneg %p6024_p11 }
  0x1c   : > { %s5684_s10 = scalar_lea.hbm %s7097_s4, 48 }
  0x1d   : > { %p5685_p13 = scmp.ne.s32.totalorder %s7097_s4, %s5684_s10  ;;  %p5691_p4 = scmp.lt.u32.totalorder %s5684_s10, %s7097_s4 }
  0x1f   : > { %p5687_p1 = pnand %p7080_p0, %p5685_p13 }
  0x21   : > { %p5688_p2 = pneg %p5687_p1 }
  0x23   : > { %p5693_p5 = pnand %p5691_p4, %p5688_p2 }
  0x25   : > { %5696 = shalt.err (!%p5693_p5)
}
  0x26   : > { %s5697_s15 = scalar_lea.vmem %s222_s29, 48  ;;  %s5704_s16 = scalar_lea.vmem %s222_s29, 64 }
  0x27   : > { %p5698_p7 = scmp.ne.s32.totalorder %s222_s29, %s5697_s15  ;;  %p5705_p3 = scmp.lt.s32.totalorder %s222_s29, %s222_s29 }
  0x28   : > { %p5706_p6 = scmp.lt.s32.totalorder %s5704_s16, %s5697_s15 }
  0x29   : > { %p5700_p9 = pnand %p5698_p7, %p7080_p0 }
  0x2a   : > { %p5707_p8 = por %p5706_p6, %p5705_p3 }
  0x2b   : > { %p5701_p10 = pneg %p5700_p9 }
  0x2d   : > { %p5708_p12 = pnand %p5707_p8, %p5701_p10 }
  0x2f   : > { %5711 = shalt.err (!%p5708_p12)
}
  0x30   : > { %5270 = dma.hbm_to_vmem [thread:$0]  (!%p6024_p11), %s7097_s4, 48, %s222_s29, [#allocation10]  }
  0x31   : > { %s32_s28 = sadd.s32 1, %s5918_s22  ;;  %s7083_s8 = sand.u32 1, %s5910_s20  }
  0x32   : > { %p33_p3 = scmp.ge.s32.totalorder %s32_s28, 3  ;;  %s6058_s9 = smul.u32 768, %s7083_s8 }
  0x33   : > { %s4696_s10 = sshll.u32 %s5918_s22, 8  ;;  %s7099_s1 = sld [smem:[#allocation21_spill]] }
  0x34   : > { %s7127_s28 = smov (%p33_p3, %s32_s28), 0  ;;  %s236_s14 = scalar_lea.vmem [#allocation6], %s6058_s9 }
  0x35   : > { %7098 = sst [smem:[#allocation19_spill]] %s7127_s28  ;;  %s65_s29 = ssub.s32 %s5918_s22, %s7127_s28 }
  0x36   : > { %s243_s15 = sshll.u32 %s236_s14, 4  ;;  %p66_p6 = scmp.eq.s32.totalorder %s65_s29, 0  ;;  %s6071_s15 = int_to_ptr.vmem [resolvable:$true] %s243_s15 }
  0x37   : > { %s6080_s17 = scalar_lea.sflag [#allocation7], %s7079_s30  ;;  %p7101_p12 = scmp.ne.s32.totalorder %s7096_s7, 0 }
  0x38   : > { %s6076_s16 = scalar_select %p66_p6, %s5910_s20, %s68_s25  }
  0x39   : > { %s6066_s13 = scalar_lea.hbm %s7099_s1, %s4696_s10  ;;  %p6086_p13 = pneg %p7101_p12 }
  0x3a   : > { %7100 = sst [smem:[#allocation20_spill]] %s6076_s16  ;;  %s5712_s18 = scalar_lea.hbm %s6066_s13, 12288 }
  0x3b   : > { %p5713_p8 = scmp.ne.s32.totalorder %s6066_s13, %s5712_s18  ;;  %s5717_s29 = scalar_lea.hbm %s7099_s1, 36864 }
  0x3c   : > { %s7102_s10 = scalar_select %p6086_p13, 1, 0 }
  0x3d   : > { %p5715_p1 = pnand %p6086_p13, %p5713_p8  ;;  %p5718_p4 = scmp.lt.u32.totalorder %s6066_s13, %s7099_s1 }
  0x3e   : > { %p5719_p5 = scmp.lt.u32.totalorder %s5717_s29, %s5712_s18  ;;  %p5721_p9 = scmp.lt.u32.totalorder %s5712_s18, %s6066_s13 }
  0x3f   : > { %p5716_p2 = pneg %p5715_p1 }
  0x40   : > { %p5720_p7 = por %p5719_p5, %p5718_p4 }
  0x42   : > { %p5722_p10 = por %p5721_p9, %p5720_p7 }
  0x44   : > { %p5723_p3 = pnand %p5722_p10, %p5716_p2 }
  0x46   : > { %5726 = shalt.err (!%p5723_p3)
}
  0x47   : > { %s5727_s30 = scalar_lea.vmem %s6071_s15, 12288  ;;  %s5925_s11 = smov [#allocation6]  }
  0x48   : > { %p5728_p6 = scmp.ne.s32.totalorder %s6071_s15, %s5727_s30  ;;  %s5732_s12 = sshll.u32 %s5925_s11, 4  ;;  %s5733_s12 = int_to_ptr.vmem [resolvable:$false] %s5732_s12 }
  0x49   : > { %s5734_s25 = scalar_lea.vmem %s5733_s12, 24576  ;;  %p5735_p0 = scmp.lt.s32.totalorder %s6071_s15, %s5733_s12 }
  0x4a   : > { %p5730_p8 = pnand %p5728_p6, %p6086_p13  ;;  %p5736_p11 = scmp.lt.s32.totalorder %s5734_s25, %s5727_s30 }
  0x4c   : > { %p5731_p1 = pneg %p5730_p8  ;;  %p5737_p4 = por %p5736_p11, %p5735_p0 }
  0x4e   : > { %p5738_p5 = pnand %p5737_p4, %p5731_p1 }
  0x50   : > { %5741 = shalt.err (!%p5738_p5)
}
  0x51   : > { %s5926_s18 = smov 768   ;;  %s5927_s29 = smov 256  }
  0x52   : > { %s5928_s14 = smov 16   ;;  %s5929_s8 = smov [#allocation3]  }
  0x53   : > { %5274 = dma.hbm_to_vmem [thread:$0]  (!%p7101_p12), %s6066_s13, 12288, %s6071_s15, %s6080_s17, %s5926_s18, %s5927_s29, %s5928_s14  }
  0x54   : > { %s207_s11 = sshll.u32 %s5929_s8, 4  ;;  %s7103_s1 = sand.u32 1, %s5910_s20   ;;  %s208_s11 = int_to_ptr.vmem [resolvable:$true] %s207_s11 }
  0x55   : > { %s4440_s12 = sshll.u32 %s7103_s1, 2  ;;  %s5742_s4 = scalar_lea.hbm %s7069_s0, 6144 }
  0x56   : > { %p5743_p11 = scmp.ne.s32.totalorder %s7069_s0, %s5742_s4  ;;  %p7104_p0 = scmp.ne.s32.totalorder %s7095_s6, 0 }
  0x57   : > { %p5749_p10 = scmp.lt.u32.totalorder %s5742_s4, %s7069_s0 }
  0x58   : > { %p7105_p2 = pneg %p7104_p0 }
  0x5a   : > { %p5745_p7 = pnand %p5743_p11, %p7105_p2 }
  0x5c   : > { %p5746_p9 = pneg %p5745_p7 }
  0x5e   : > { %p5751_p3 = pnand %p5749_p10, %p5746_p9 }
  0x60   : > { %5754 = shalt.err (!%p5751_p3)
}
  0x61   : > { %s5755_s8 = scalar_lea.vmem %s208_s11, 6144  ;;  %p7106_p8 = pmov %p7105_p2 }
  0x62   : > { %p5756_p6 = scmp.ne.s32.totalorder %s208_s11, %s5755_s8  ;;  %p5763_p5 = scmp.lt.s32.totalorder %s208_s11, %s208_s11 }
  0x63   : > { %p5764_p12 = scmp.lt.s32.totalorder %s5755_s8, %s5755_s8 }
  0x64   : > { %p5758_p1 = pnand %p5756_p6, %p7106_p8 }
  0x65   : > { %p5765_p13 = por %p5764_p12, %p5763_p5 }
  0x66   : > { %p5759_p4 = pneg %p5758_p1 }
  0x68   : > { %p5766_p2 = pnand %p5765_p13, %p5759_p4 }
  0x6a   : > { %5769 = shalt.err (!%p5766_p2)
}
  0x6b   : > { %s5930_s1 = smov 192   ;;  %s5931_s5 = smov 12  }
  0x6c   : > { %5267 = dma.hbm_to_vmem [thread:$0]  (!%p7104_p0), %s7069_s0, 6144, %s208_s11, [#allocation4], %s5930_s1, %s5930_s1, %s5931_s5  }
  0x6d   : > { %s4697_s28 = sshll.u32 %s5918_s22, 6  ;;  %s257_s18 = scalar_lea.vmem [#allocation8], %s4440_s12 }
  0x6e   : > { %s6139_s16 = scalar_lea.hbm %s7071_s2, %s4697_s28  ;;  %s265_s29 = sshll.u32 %s257_s18, 4  ;;  %s266_s29 = int_to_ptr.vmem [resolvable:$true] %s265_s29 }
  0x6f   : > { %s5770_s6 = scalar_lea.hbm %s6139_s16, 64  ;;  %p7107_p13 = scmp.ne.s32.totalorder %s7102_s10, 0 }
  0x70   : > { %p5771_p12 = scmp.ne.s32.totalorder %s6139_s16, %s5770_s6  ;;  %s5775_s30 = scalar_lea.hbm %s7071_s2, 192 }
  0x71   : > { %p5776_p0 = scmp.lt.u32.totalorder %s6139_s16, %s7071_s2  ;;  %p5777_p9 = scmp.lt.u32.totalorder %s5775_s30, %s5770_s6 }
  0x72   : > { %p5773_p11 = pnand %p5771_p12, %p7107_p13  ;;  %p5779_p3 = scmp.lt.u32.totalorder %s5770_s6, %s6139_s16 }
  0x73   : > { %p5778_p10 = por %p5777_p9, %p5776_p0 }
  0x74   : > { %p5774_p7 = pneg %p5773_p11 }
  0x75   : > { %p5780_p6 = por %p5779_p3, %p5778_p10 }
  0x77   : > { %p5781_p8 = pnand %p5780_p6, %p5774_p7 }
  0x79   : > { %5784 = shalt.err (!%p5781_p8)
}
  0x7a   : > { %s5785_s12 = scalar_lea.vmem %s266_s29, 64  ;;  %s5932_s4 = smov [#allocation8]  }
  0x7b   : > { %p5786_p1 = scmp.ne.s32.totalorder %s266_s29, %s5785_s12  ;;  %s5790_s21 = sshll.u32 %s5932_s4, 4  ;;  %s5791_s21 = int_to_ptr.vmem [resolvable:$false] %s5790_s21 }
  0x7c   : > { %s5792_s28 = scalar_lea.vmem %s5791_s21, 128  ;;  %p5793_p2 = scmp.lt.s32.totalorder %s266_s29, %s5791_s21 }
  0x7d   : > { %p5788_p4 = pnand %p5786_p1, %p7107_p13  ;;  %p5794_p12 = scmp.lt.s32.totalorder %s5792_s28, %s5785_s12 }
  0x7f   : > { %p5789_p5 = pneg %p5788_p4  ;;  %p5795_p11 = por %p5794_p12, %p5793_p2 }
  0x81   : > { %p5796_p0 = pnand %p5795_p11, %p5789_p5 }
  0x83   : > { %5799 = shalt.err (!%p5796_p0)
}
  0x84   : > { %p7108_p9 = scmp.ne.s32.totalorder %s7096_s7, 0  ;;  %s5244_s13 = smul.u32 12288, %s5918_s22 }
  0x85   : > { %s276_s15 = scalar_lea.vmem [#allocation9], %s6058_s9  ;;  %s7109_s30 = sand.u32 1, %s5922_s23  }
  0x86   : > { %5277 = dma.hbm_to_vmem [thread:$0]  (!%p7108_p9), %s6139_s16, 64, %s266_s29, %s6080_s17  }
  0x87   : > { %s284_s18 = sshll.u32 %s276_s15, 4  ;;  %s6164_s11 = scalar_lea.hbm %s7072_s3, %s5244_s13  ;;  %s6166_s18 = int_to_ptr.vmem [resolvable:$true] %s284_s18 }
  0x88   : > { %s6170_s25 = scalar_lea.sflag [#allocation10], %s7109_s30  ;;  %s5800_s8 = scalar_lea.hbm %s6164_s11, 12288 }
  0x89   : > { %p5801_p7 = scmp.ne.s32.totalorder %s6164_s11, %s5800_s8  ;;  %s5805_s16 = scalar_lea.hbm %s7072_s3, 36864 }
  0x8a   : > { %p5806_p6 = scmp.lt.u32.totalorder %s6164_s11, %s7072_s3  ;;  %p5807_p8 = scmp.lt.u32.totalorder %s5805_s16, %s5800_s8 }
  0x8b   : > { %p5803_p10 = pnand %p5801_p7, %p7107_p13  ;;  %p5809_p4 = scmp.lt.u32.totalorder %s5800_s8, %s6164_s11 }
  0x8c   : > { %p5808_p1 = por %p5807_p8, %p5806_p6 }
  0x8d   : > { %p5804_p3 = pneg %p5803_p10 }
  0x8e   : > { %p5810_p5 = por %p5809_p4, %p5808_p1 }
  0x90   : > { %p5811_p2 = pnand %p5810_p5, %p5804_p3 }
  0x92   : > { %5814 = shalt.err (!%p5811_p2)
}
  0x93   : > { %s5815_s4 = scalar_lea.vmem %s6166_s18, 12288  ;;  %s5933_s21 = smov [#allocation9]  }
  0x94   : > { %p5816_p12 = scmp.ne.s32.totalorder %s6166_s18, %s5815_s4  ;;  %s5820_s28 = sshll.u32 %s5933_s21, 4  ;;  %s5821_s28 = int_to_ptr.vmem [resolvable:$false] %s5820_s28 }
  0x95   : > { %s5822_s13 = scalar_lea.vmem %s5821_s28, 24576  ;;  %p5823_p7 = scmp.lt.s32.totalorder %s6166_s18, %s5821_s28 }
  0x96   : > { %p5818_p11 = pnand %p5816_p12, %p7107_p13  ;;  %p5824_p10 = scmp.lt.s32.totalorder %s5822_s13, %s5815_s4 }
  0x98   : > { %p5819_p0 = pneg %p5818_p11  ;;  %p5825_p6 = por %p5824_p10, %p5823_p7 }
  0x9a   : > { %p5826_p8 = pnand %p5825_p6, %p5819_p0 }
  0x9c   : > { %5829 = shalt.err (!%p5826_p8)
}
  0x9d   : > { %5280 = dma.hbm_to_vmem [thread:$0]  (!%p7108_p9), %s6164_s11, 12288, %s6166_s18, %s6170_s25, %s5930_s1, %s5930_s1, %s5931_s5  }
  0x9e   : > { %p7110_p13 = scmp.ne.s32.totalorder %s7094_s27, 0 }
  0x9f   : > { %p7111_p3 = scmp.eq.s32.totalorder (!%p7110_p13), %s5998_s24, 0 }
  0xa0   : > { %296 = sbr.rel (%p7110_p13) target bundleno = 1195 (0x4ab), region = 40 }
  0xa7   : > { %5881 = dma.done.wait (%p7111_p3), [#allocation4], 6144   ;;  %p7112_p1 = pmov %p7111_p3 }
  0xa8   : > { %s302_s7 = sand.u32 1, %s5998_s24   ;;  %s304_s10 = sand.u32 1, %s5906_s19  }
  0xa9   : > { %5883 = vsyncadd (%p7112_p1), [#allocation4], 4294961152  ;;  %s5245_s15 = smul.u32 768, %s304_s10  ;;  %s303_s6 = scalar_lea.sflag [#allocation7], %s302_s7 }
  0xaa   : > { %p7113_p4 = scmp.ne.s32.totalorder %s7093_s26, 0 }
  0xab   : > { %s6205_s14 = scalar_lea.vmem [#allocation6], %s5245_s15 }
  0xac   : > { %5885 = dma.done.wait (%p7113_p4), %s303_s6, 12352  }
  0xad   : > { %5887 = vsyncadd (%p7113_p4), %s303_s6, 4294954944  ;;  %s6211_s27 = sshll.u32 %s304_s10, 2  ;;  %s321_s5 = scalar_lea.sflag [#allocation10], %s302_s7 }
  0xae   : > { %s315_s1 = scalar_lea.vmem [#allocation8], %s6211_s27  ;;  %s6214_s18 = scalar_lea.vmem [#allocation9], %s5245_s15 }
  0xaf   : > { %5889 = dma.done.wait (%p7113_p4), %s321_s5, 12288  }
  0xb0   : > { %5891 = vsyncadd (%p7113_p4), %s321_s5, 4294955008  ;;  %p7114_p9 = pmov %p7112_p1 }
  0xb1   : > { %p7115_p5 = pmov %p7112_p1 }
  0xb2   : > { %5893 = dma.done.wait (%p7114_p9), [#allocation10], 48  }
  0xb3   : > { %5895 = vsyncadd (%p7115_p5), [#allocation10], 4294967248  ;;  %s7116_s11 = sld [smem:[#allocation18_spill]] }
  0xb9   : > { %p4450_p2 = scmp.ne.s32.totalorder %s7116_s11, 0 }
  0xba   : > { %v5934_v0 = vmov (!%p4450_p2), 0.0  }
  0xbb   : > { %369 = sbr.rel (%p4450_p2) target bundleno = 235 (0xeb), region = 64  ;;  %370 = vst [vmem:[#allocation2] sm:$0xff] (!%p4450_p2), %v5934_v0  ;;  %371 = vst [vmem:[#allocation2 + $0x8] sm:$0xff] (!%p4450_p2), %v5934_v0 }
  0xbc   : > { %372 = vst [vmem:[#allocation2 + $0x10] sm:$0xff] (!%p4450_p2), %v5934_v0  ;;  %373 = vst [vmem:[#allocation2 + $0x18] sm:$0xff] (!%p4450_p2), %v5934_v0 }
  0xbd   : > { %374 = vst [vmem:[#allocation2 + $0x20] sm:$0xff] (!%p4450_p2), %v5934_v0  ;;  %375 = vst [vmem:[#allocation2 + $0x28] sm:$0xff] (!%p4450_p2), %v5934_v0 }
  0xbe   : > { %376 = vst [vmem:[#allocation2 + $0x30] sm:$0xff] (!%p4450_p2), %v5934_v0  ;;  %377 = vst [vmem:[#allocation2 + $0x38] sm:$0xff] (!%p4450_p2), %v5934_v0 }
  0xbf   : > { %378 = vst [vmem:[#allocation2 + $0x40] sm:$0xff] (!%p4450_p2), %v5934_v0  ;;  %379 = vst [vmem:[#allocation2 + $0x48] sm:$0xff] (!%p4450_p2), %v5934_v0 }
  0xc0   : > { %380 = vst [vmem:[#allocation2 + $0x50] sm:$0xff] (!%p4450_p2), %v5934_v0  ;;  %381 = vst [vmem:[#allocation2 + $0x58] sm:$0xff] (!%p4450_p2), %v5934_v0 }
  0xc1   : > { %382 = vst [vmem:[#allocation2 + $0x60] sm:$0xff] (!%p4450_p2), %v5934_v0  ;;  %383 = vst [vmem:[#allocation2 + $0x68] sm:$0xff] (!%p4450_p2), %v5934_v0 }
  0xc2   : > { %384 = vst [vmem:[#allocation2 + $0x70] sm:$0xff] %v5934_v0  ;;  %385 = vst [vmem:[#allocation2 + $0x78] sm:$0xff] %v5934_v0 }
  0xc3   : > { %386 = vst [vmem:[#allocation2 + $0x80] sm:$0xff] %v5934_v0  ;;  %387 = vst [vmem:[#allocation2 + $0x88] sm:$0xff] %v5934_v0 }
  0xc4   : > { %388 = vst [vmem:[#allocation2 + $0x90] sm:$0xff] %v5934_v0  ;;  %389 = vst [vmem:[#allocation2 + $0x98] sm:$0xff] %v5934_v0 }
  0xc5   : > { %390 = vst [vmem:[#allocation2 + $0xa0] sm:$0xff] %v5934_v0  ;;  %391 = vst [vmem:[#allocation2 + $0xa8] sm:$0xff] %v5934_v0 }
  0xc6   : > { %392 = vst [vmem:[#allocation2 + $0xb0] sm:$0xff] %v5934_v0  ;;  %393 = vst [vmem:[#allocation2 + $0xb8] sm:$0xff] %v5934_v0 }
  0xc7   : > { %394 = vst [vmem:[#allocation2 + $0xc0] sm:$0xff] %v5934_v0  ;;  %395 = vst [vmem:[#allocation2 + $0xc8] sm:$0xff] %v5934_v0 }
  0xc8   : > { %396 = vst [vmem:[#allocation2 + $0xd0] sm:$0xff] %v5934_v0  ;;  %397 = vst [vmem:[#allocation2 + $0xd8] sm:$0xff] %v5934_v0 }
  0xc9   : > { %398 = vst [vmem:[#allocation2 + $0xe0] sm:$0xff] %v5934_v0  ;;  %399 = vst [vmem:[#allocation2 + $0xe8] sm:$0xff] %v5934_v0 }
  0xca   : > { %400 = vst [vmem:[#allocation2 + $0xf0] sm:$0xff] %v5934_v0  ;;  %401 = vst [vmem:[#allocation2 + $0xf8] sm:$0xff] %v5934_v0 }
  0xcb   : > { %402 = vst [vmem:[#allocation2 + $0x100] sm:$0xff] %v5934_v0  ;;  %403 = vst [vmem:[#allocation2 + $0x108] sm:$0xff] %v5934_v0 }
  0xcc   : > { %404 = vst [vmem:[#allocation2 + $0x110] sm:$0xff] %v5934_v0  ;;  %405 = vst [vmem:[#allocation2 + $0x118] sm:$0xff] %v5934_v0 }
  0xcd   : > { %406 = vst [vmem:[#allocation2 + $0x120] sm:$0xff] %v5934_v0  ;;  %407 = vst [vmem:[#allocation2 + $0x128] sm:$0xff] %v5934_v0 }
  0xce   : > { %408 = vst [vmem:[#allocation2 + $0x130] sm:$0xff] %v5934_v0  ;;  %409 = vst [vmem:[#allocation2 + $0x138] sm:$0xff] %v5934_v0 }
  0xcf   : > { %410 = vst [vmem:[#allocation2 + $0x140] sm:$0xff] %v5934_v0  ;;  %411 = vst [vmem:[#allocation2 + $0x148] sm:$0xff] %v5934_v0 }
  0xd0   : > { %412 = vst [vmem:[#allocation2 + $0x150] sm:$0xff] %v5934_v0  ;;  %413 = vst [vmem:[#allocation2 + $0x158] sm:$0xff] %v5934_v0 }
  0xd1   : > { %414 = vst [vmem:[#allocation2 + $0x160] sm:$0xff] %v5934_v0  ;;  %415 = vst [vmem:[#allocation2 + $0x168] sm:$0xff] %v5934_v0 }
  0xd2   : > { %416 = vst [vmem:[#allocation2 + $0x170] sm:$0xff] %v5934_v0  ;;  %417 = vst [vmem:[#allocation2 + $0x178] sm:$0xff] %v5934_v0 }
  0xd3   : > { %418 = vst [vmem:[#allocation2 + $0x180] sm:$0xff] %v5934_v0  ;;  %419 = vst [vmem:[#allocation2 + $0x188] sm:$0xff] %v5934_v0 }
  0xd4   : > { %420 = vst [vmem:[#allocation2 + $0x190] sm:$0xff] %v5934_v0  ;;  %421 = vst [vmem:[#allocation2 + $0x198] sm:$0xff] %v5934_v0 }
  0xd5   : > { %422 = vst [vmem:[#allocation2 + $0x1a0] sm:$0xff] %v5934_v0  ;;  %423 = vst [vmem:[#allocation2 + $0x1a8] sm:$0xff] %v5934_v0 }
  0xd6   : > { %424 = vst [vmem:[#allocation2 + $0x1b0] sm:$0xff] %v5934_v0  ;;  %425 = vst [vmem:[#allocation2 + $0x1b8] sm:$0xff] %v5934_v0 }
  0xd7   : > { %426 = vst [vmem:[#allocation2 + $0x1c0] sm:$0xff] %v5934_v0  ;;  %427 = vst [vmem:[#allocation2 + $0x1c8] sm:$0xff] %v5934_v0 }
  0xd8   : > { %428 = vst [vmem:[#allocation2 + $0x1d0] sm:$0xff] %v5934_v0  ;;  %429 = vst [vmem:[#allocation2 + $0x1d8] sm:$0xff] %v5934_v0 }
  0xd9   : > { %430 = vst [vmem:[#allocation2 + $0x1e0] sm:$0xff] %v5934_v0  ;;  %431 = vst [vmem:[#allocation2 + $0x1e8] sm:$0xff] %v5934_v0 }
  0xda   : > { %432 = vst [vmem:[#allocation2 + $0x1f0] sm:$0xff] %v5934_v0  ;;  %433 = vst [vmem:[#allocation2 + $0x1f8] sm:$0xff] %v5934_v0 }
  0xdb   : > { %434 = vst [vmem:[#allocation2 + $0x200] sm:$0xff] %v5934_v0  ;;  %435 = vst [vmem:[#allocation2 + $0x208] sm:$0xff] %v5934_v0 }
  0xdc   : > { %436 = vst [vmem:[#allocation2 + $0x210] sm:$0xff] %v5934_v0  ;;  %437 = vst [vmem:[#allocation2 + $0x218] sm:$0xff] %v5934_v0 }
  0xdd   : > { %438 = vst [vmem:[#allocation2 + $0x220] sm:$0xff] %v5934_v0  ;;  %439 = vst [vmem:[#allocation2 + $0x228] sm:$0xff] %v5934_v0 }
  0xde   : > { %440 = vst [vmem:[#allocation2 + $0x230] sm:$0xff] %v5934_v0  ;;  %441 = vst [vmem:[#allocation2 + $0x238] sm:$0xff] %v5934_v0 }
  0xdf   : > { %442 = vst [vmem:[#allocation2 + $0x240] sm:$0xff] %v5934_v0  ;;  %443 = vst [vmem:[#allocation2 + $0x248] sm:$0xff] %v5934_v0 }
  0xe0   : > { %444 = vst [vmem:[#allocation2 + $0x250] sm:$0xff] %v5934_v0  ;;  %445 = vst [vmem:[#allocation2 + $0x258] sm:$0xff] %v5934_v0 }
  0xe1   : > { %446 = vst [vmem:[#allocation2 + $0x260] sm:$0xff] %v5934_v0  ;;  %447 = vst [vmem:[#allocation2 + $0x268] sm:$0xff] %v5934_v0 }
  0xe2   : > { %448 = vst [vmem:[#allocation2 + $0x270] sm:$0xff] %v5934_v0  ;;  %449 = vst [vmem:[#allocation2 + $0x278] sm:$0xff] %v5934_v0 }
  0xe3   : > { %450 = vst [vmem:[#allocation2 + $0x280] sm:$0xff] %v5934_v0  ;;  %451 = vst [vmem:[#allocation2 + $0x288] sm:$0xff] %v5934_v0 }
  0xe4   : > { %452 = vst [vmem:[#allocation2 + $0x290] sm:$0xff] %v5934_v0  ;;  %453 = vst [vmem:[#allocation2 + $0x298] sm:$0xff] %v5934_v0 }
  0xe5   : > { %454 = vst [vmem:[#allocation2 + $0x2a0] sm:$0xff] %v5934_v0  ;;  %455 = vst [vmem:[#allocation2 + $0x2a8] sm:$0xff] %v5934_v0 }
  0xe6   : > { %456 = vst [vmem:[#allocation2 + $0x2b0] sm:$0xff] %v5934_v0  ;;  %457 = vst [vmem:[#allocation2 + $0x2b8] sm:$0xff] %v5934_v0 }
  0xe7   : > { %458 = vst [vmem:[#allocation2 + $0x2c0] sm:$0xff] %v5934_v0  ;;  %459 = vst [vmem:[#allocation2 + $0x2c8] sm:$0xff] %v5934_v0 }
  0xe8   : > { %460 = vst [vmem:[#allocation2 + $0x2d0] sm:$0xff] %v5934_v0  ;;  %461 = vst [vmem:[#allocation2 + $0x2d8] sm:$0xff] %v5934_v0 }
  0xe9   : > { %462 = vst [vmem:[#allocation2 + $0x2e0] sm:$0xff] %v5934_v0  ;;  %463 = vst [vmem:[#allocation2 + $0x2e8] sm:$0xff] %v5934_v0 }
  0xea   : > { %464 = vst [vmem:[#allocation2 + $0x2f0] sm:$0xff] %v5934_v0  ;;  %465 = vst [vmem:[#allocation2 + $0x2f8] sm:$0xff] %v5934_v0 }
  0xeb PF: > { %v5348_v1 = vld [vmem:[%s6205_s14 + $0x4] ss:$16 sps:$4 sm:$0xff]   ;;  %v5350_v2 = vld [vmem:[%s6205_s14 + $0xc] ss:$16 sps:$4 sm:$0xff]   ;;  %v5352_v3 = vld [vmem:[%s6205_s14] ss:$16 sps:$4 sm:$0xff]  }
  0xec   : > { %1384 = vmatprep.subr.bf16.mxu0 %v5348_v1  ;;  %v5353_v4 = vld [vmem:[%s6205_s14 + $0x8] ss:$16 sps:$4 sm:$0xff]   ;;  %1770 = vmatprep.subr.bf16.mxu1 %v5350_v2  ;;  %v5354_v5 = vld [vmem:[%s6205_s14 + $0x24] ss:$16 sps:$4 sm:$0xff]   ;;  %v5356_v6 = vld [vmem:[%s6205_s14 + $0x2c] ss:$16 sps:$4 sm:$0xff]  }
  0xed   : > { %1385 = vmatpush1.bf16.msra.mxu0 %v5352_v3  ;;  %1771 = vmatpush1.bf16.msra.mxu1 %v5353_v4  ;;  %v5358_v7 = vld [vmem:[%s6205_s14 + $0x20] ss:$16 sps:$4 sm:$0xff]   ;;  %v5359_v8 = vld [vmem:[%s6205_s14 + $0x28] ss:$16 sps:$4 sm:$0xff]   ;;  %v5360_v9 = vld [vmem:[%s6205_s14 + $0x44] ss:$16 sps:$4 sm:$0xff]  }
  0xee   : > { %1386 = vmatprep.subr.bf16.mxu0 %v5354_v5  ;;  %1772 = vmatprep.subr.bf16.mxu1 %v5356_v6  ;;  %v5362_v10 = vld [vmem:[%s6205_s14 + $0x4c] ss:$16 sps:$4 sm:$0xff]   ;;  %v5364_v11 = vld [vmem:[%s6205_s14 + $0x40] ss:$16 sps:$4 sm:$0xff]   ;;  %v5365_v12 = vld [vmem:[%s6205_s14 + $0x48] ss:$16 sps:$4 sm:$0xff]  }
  0xef   : > { %v5366_v13 = vld [vmem:[%s6205_s14 + $0x64] ss:$16 sps:$4 sm:$0xff]   ;;  %v5368_v14 = vld [vmem:[%s6205_s14 + $0x6c] ss:$16 sps:$4 sm:$0xff]   ;;  %v5370_v15 = vld [vmem:[%s6205_s14 + $0x60] ss:$16 sps:$4 sm:$0xff]  }
  0xf0   : > { %v5371_v16 = vld [vmem:[%s6205_s14 + $0x68] ss:$16 sps:$4 sm:$0xff]   ;;  %v5372_v17 = vld [vmem:[%s6205_s14 + $0x84] ss:$16 sps:$4 sm:$0xff]   ;;  %v5374_v18 = vld [vmem:[%s6205_s14 + $0x8c] ss:$16 sps:$4 sm:$0xff]  }
  0xf1   : > { %1387 = vmatpush1.bf16.msra.mxu0 %v5358_v7  ;;  %1773 = vmatpush1.bf16.msra.mxu1 %v5359_v8  ;;  %v5376_v19 = vld [vmem:[%s6205_s14 + $0x80] ss:$16 sps:$4 sm:$0xff]   ;;  %v5377_v20 = vld [vmem:[%s6205_s14 + $0x88] ss:$16 sps:$4 sm:$0xff]   ;;  %v5378_v21 = vld [vmem:[%s6205_s14 + $0xa4] ss:$16 sps:$4 sm:$0xff]  }
  0xf2   : > { %1388 = vmatprep.subr.bf16.mxu0 %v5360_v9  ;;  %1774 = vmatprep.subr.bf16.mxu1 %v5362_v10  ;;  %v5380_v22 = vld [vmem:[%s6205_s14 + $0xac] ss:$16 sps:$4 sm:$0xff]   ;;  %v5382_v23 = vld [vmem:[%s6205_s14 + $0xa0] ss:$16 sps:$4 sm:$0xff]   ;;  %v5383_v24 = vld [vmem:[%s6205_s14 + $0xa8] ss:$16 sps:$4 sm:$0xff]  }
  0xf3   : > { %v5384_v25 = vld [vmem:[%s6205_s14 + $0xc4] ss:$16 sps:$4 sm:$0xff]   ;;  %v5386_v26 = vld [vmem:[%s6205_s14 + $0xcc] ss:$16 sps:$4 sm:$0xff]   ;;  %v5388_v27 = vld [vmem:[%s6205_s14 + $0xc0] ss:$16 sps:$4 sm:$0xff]  }
  0xf4   : > { %v5389_v28 = vld [vmem:[%s6205_s14 + $0xc8] ss:$16 sps:$4 sm:$0xff]   ;;  %v5390_v29 = vld [vmem:[%s6205_s14 + $0xe4] ss:$16 sps:$4 sm:$0xff]   ;;  %v5392_v30 = vld [vmem:[%s6205_s14 + $0xec] ss:$16 sps:$4 sm:$0xff]  }
  0xf5   : > { %1389 = vmatpush1.bf16.msra.mxu0 %v5364_v11  ;;  %1775 = vmatpush1.bf16.msra.mxu1 %v5365_v12  ;;  %v5394_v31 = vld [vmem:[%s6205_s14 + $0xe0] ss:$16 sps:$4 sm:$0xff]   ;;  %v5395_v32 = vld [vmem:[%s6205_s14 + $0xe8] ss:$16 sps:$4 sm:$0xff]   ;;  %v5396_v33 = vld [vmem:[%s6205_s14 + $0x104] ss:$16 sps:$4 sm:$0xff]  }
  0xf6   : > { %1390 = vmatprep.subr.bf16.mxu0 %v5366_v13  ;;  %1776 = vmatprep.subr.bf16.mxu1 %v5368_v14  ;;  %v5398_v34 = vld [vmem:[%s6205_s14 + $0x10c] ss:$16 sps:$4 sm:$0xff]   ;;  %v5400_v35 = vld [vmem:[%s6205_s14 + $0x100] ss:$16 sps:$4 sm:$0xff]   ;;  %v5401_v36 = vld [vmem:[%s6205_s14 + $0x108] ss:$16 sps:$4 sm:$0xff]  }
  0xf7   : > { %v5402_v37 = vld [vmem:[%s6205_s14 + $0x124] ss:$16 sps:$4 sm:$0xff]   ;;  %v5404_v38 = vld [vmem:[%s6205_s14 + $0x12c] ss:$16 sps:$4 sm:$0xff]   ;;  %v5406_v39 = vld [vmem:[%s6205_s14 + $0x120] ss:$16 sps:$4 sm:$0xff]  }
  0xf8   : > { %v5407_v40 = vld [vmem:[%s6205_s14 + $0x128] ss:$16 sps:$4 sm:$0xff]   ;;  %v5408_v41 = vld [vmem:[%s6205_s14 + $0x144] ss:$16 sps:$4 sm:$0xff]   ;;  %v5410_v42 = vld [vmem:[%s6205_s14 + $0x14c] ss:$16 sps:$4 sm:$0xff]  }
  0xf9   : > { %1391 = vmatpush1.bf16.msra.mxu0 %v5370_v15  ;;  %1777 = vmatpush1.bf16.msra.mxu1 %v5371_v16  ;;  %v5412_v43 = vld [vmem:[%s6205_s14 + $0x140] ss:$16 sps:$4 sm:$0xff]   ;;  %v5413_v44 = vld [vmem:[%s6205_s14 + $0x148] ss:$16 sps:$4 sm:$0xff]   ;;  %v5414_v45 = vld [vmem:[%s6205_s14 + $0x164] ss:$16 sps:$4 sm:$0xff]  }
  0xfa   : > { %1392 = vmatprep.subr.bf16.mxu0 %v5372_v17  ;;  %1778 = vmatprep.subr.bf16.mxu1 %v5374_v18  ;;  %v5416_v46 = vld [vmem:[%s6205_s14 + $0x16c] ss:$16 sps:$4 sm:$0xff]   ;;  %v5418_v47 = vld [vmem:[%s6205_s14 + $0x160] ss:$16 sps:$4 sm:$0xff]   ;;  %v5419_v48 = vld [vmem:[%s6205_s14 + $0x168] ss:$16 sps:$4 sm:$0xff]  }
  0xfb   : > { %v5446_v49 = vld [vmem:[#allocation3 + $0x4] ss:$12 sps:$4 sm:$0xff]   ;;  %v5422_v51 = vld [vmem:[%s6205_s14 + $0x18c] ss:$16 sps:$4 sm:$0xff]   ;;  %v5425_v53 = vld [vmem:[%s6205_s14 + $0x188] ss:$16 sps:$4 sm:$0xff]  }
  0xfc   : > { %v5420_v50 = vld [vmem:[%s6205_s14 + $0x184] ss:$16 sps:$4 sm:$0xff]   ;;  %1416 = vmatprep.mubr.bf16.mxu0 %v5446_v49  ;;  %1802 = vmatprep.mubr.bf16.mxu1 %v5446_v49  ;;  %v5424_v52 = vld [vmem:[%s6205_s14 + $0x180] ss:$16 sps:$4 sm:$0xff]   ;;  %v5428_v55 = vld [vmem:[%s6205_s14 + $0x1ac] ss:$16 sps:$4 sm:$0xff]  }
  0xfd   : > { %1393 = vmatpush1.bf16.msra.mxu0 %v5376_v19  ;;  %1779 = vmatpush1.bf16.msra.mxu1 %v5377_v20  ;;  %v5426_v54 = vld [vmem:[%s6205_s14 + $0x1a4] ss:$16 sps:$4 sm:$0xff]   ;;  %v5430_v56 = vld [vmem:[%s6205_s14 + $0x1a0] ss:$16 sps:$4 sm:$0xff]   ;;  %v5431_v57 = vld [vmem:[%s6205_s14 + $0x1a8] ss:$16 sps:$4 sm:$0xff]  }
  0xfe   : > { %1394 = vmatprep.subr.bf16.mxu0 %v5378_v21  ;;  %1780 = vmatprep.subr.bf16.mxu1 %v5380_v22  ;;  %v5432_v58 = vld [vmem:[%s6205_s14 + $0x1c4] ss:$16 sps:$4 sm:$0xff]   ;;  %v5434_v59 = vld [vmem:[%s6205_s14 + $0x1cc] ss:$16 sps:$4 sm:$0xff]   ;;  %v5436_v60 = vld [vmem:[%s6205_s14 + $0x1c0] ss:$16 sps:$4 sm:$0xff]  }
  0xff   : > { %v5437_v61 = vld [vmem:[%s6205_s14 + $0x1c8] ss:$16 sps:$4 sm:$0xff]   ;;  %v5438_v62 = vld [vmem:[%s6205_s14 + $0x1e4] ss:$16 sps:$4 sm:$0xff]   ;;  %v5440_v63 = vld [vmem:[%s6205_s14 + $0x1ec] ss:$16 sps:$4 sm:$0xff]  }
 0x100   : > { %v5442_v0 = vld [vmem:[%s6205_s14 + $0x1e0] ss:$16 sps:$4 sm:$0xff]   ;;  %v5443_v1 = vld [vmem:[%s6205_s14 + $0x1e8] ss:$16 sps:$4 sm:$0xff]   ;;  %v5449_v2 = vld [vmem:[%s6205_s14 + $0x204] ss:$16 sps:$4 sm:$0xff]  }
 0x101   : > { %1395 = vmatpush1.bf16.msra.mxu0 %v5382_v23  ;;  %1781 = vmatpush1.bf16.msra.mxu1 %v5383_v24  ;;  %v5444_v3 = vld [vmem:[#allocation3] ss:$12 sps:$4 sm:$0xff]   ;;  %v5450_v5 = vld [vmem:[#allocation3 + $0x1c] ss:$12 sps:$4 sm:$0xff]   ;;  %v5458_v6 = vld [vmem:[%s6205_s14 + $0x224] ss:$16 sps:$4 sm:$0xff]  }
 0x102   : > { %1396 = vmatprep.subr.bf16.mxu0 %v5384_v25  ;;  %1782 = vmatprep.subr.bf16.mxu1 %v5386_v26  ;;  %v5447_v4 = vld [vmem:[%s6205_s14 + $0x200] ss:$16 sps:$4 sm:$0xff]   ;;  %v5498_v7 = vld [vmem:[%s6205_s14 + $0x208] ss:$16 sps:$4 sm:$0xff]   ;;  %v5500_v8 = vld [vmem:[%s6205_s14 + $0x20c] ss:$16 sps:$4 sm:$0xff]  }
 0x103   : > { %v5456_v9 = vld [vmem:[%s6205_s14 + $0x220] ss:$16 sps:$4 sm:$0xff]   ;;  %v5467_v10 = vld [vmem:[%s6205_s14 + $0x244] ss:$16 sps:$4 sm:$0xff]   ;;  %v5509_v13 = vld [vmem:[%s6205_s14 + $0x22c] ss:$16 sps:$4 sm:$0xff]  }
 0x104   : > { %v5452_v11 = vld [vmem:[#allocation3 + $0x18] ss:$12 sps:$4 sm:$0xff]   ;;  %v5453_v12 = vld [vmem:[#allocation3 + $0x34] ss:$12 sps:$4 sm:$0xff]   ;;  %v5515_v17 = vld [vmem:[%s6205_s14 + $0x24c] ss:$16 sps:$4 sm:$0xff]  }
 0x105   : > { %1397 = vmatpush1.bf16.msra.mxu0 %v5388_v27  ;;  %1783 = vmatpush1.bf16.msra.mxu1 %v5389_v28  ;;  %v5465_v14 = vld [vmem:[%s6205_s14 + $0x240] ss:$16 sps:$4 sm:$0xff]   ;;  %v5507_v15 = vld [vmem:[%s6205_s14 + $0x228] ss:$16 sps:$4 sm:$0xff]   ;;  %v5476_v16 = vld [vmem:[%s6205_s14 + $0x264] ss:$16 sps:$4 sm:$0xff]  }
 0x106   : > { %1398 = vmatprep.subr.bf16.mxu0 %v5390_v29  ;;  %1784 = vmatprep.subr.bf16.mxu1 %v5392_v30  ;;  %v5474_v18 = vld [vmem:[%s6205_s14 + $0x260] ss:$16 sps:$4 sm:$0xff]   ;;  %v5513_v19 = vld [vmem:[%s6205_s14 + $0x248] ss:$16 sps:$4 sm:$0xff]   ;;  %v5485_v20 = vld [vmem:[%s6205_s14 + $0x284] ss:$16 sps:$4 sm:$0xff]  }
 0x107   : > { %v5518_v21 = vld [vmem:[%s6205_s14 + $0x26c] ss:$16 sps:$4 sm:$0xff]   ;;  %v5483_v24 = vld [vmem:[%s6205_s14 + $0x280] ss:$16 sps:$4 sm:$0xff]   ;;  %v5516_v25 = vld [vmem:[%s6205_s14 + $0x268] ss:$16 sps:$4 sm:$0xff]  }
 0x108   : > { %v5455_v22 = vld [vmem:[#allocation3 + $0x30] ss:$12 sps:$4 sm:$0xff]   ;;  %v5459_v23 = vld [vmem:[#allocation3 + $0x4c] ss:$12 sps:$4 sm:$0xff]   ;;  %v5494_v26 = vld [vmem:[%s6205_s14 + $0x2a4] ss:$16 sps:$4 sm:$0xff]  }
 0x109   : > { %1399 = vmatpush1.bf16.msra.mxu0 %v5394_v31  ;;  %1785 = vmatpush1.bf16.msra.mxu1 %v5395_v32  ;;  %v5527_v27 = vld [vmem:[%s6205_s14 + $0x28c] ss:$16 sps:$4 sm:$0xff]   ;;  %v5492_v28 = vld [vmem:[%s6205_s14 + $0x2a0] ss:$16 sps:$4 sm:$0xff]   ;;  %v5506_v29 = vld [vmem:[%s6205_s14 + $0x2c4] ss:$16 sps:$4 sm:$0xff]  }
 0x10a   : > { %1400 = vmatprep.subr.bf16.mxu0 %v5396_v33  ;;  %1786 = vmatprep.subr.bf16.mxu1 %v5398_v34  ;;  %v5461_v30 = vld [vmem:[#allocation3 + $0x48] ss:$12 sps:$4 sm:$0xff]   ;;  %v5462_v32 = vld [vmem:[#allocation3 + $0x64] ss:$12 sps:$4 sm:$0xff]   ;;  %v5530_v33 = vld [vmem:[%s6205_s14 + $0x2ac] ss:$16 sps:$4 sm:$0xff]  }
 0x10b   : > { %v5525_v31 = vld [vmem:[%s6205_s14 + $0x288] ss:$16 sps:$4 sm:$0xff]   ;;  %v5504_v34 = vld [vmem:[%s6205_s14 + $0x2c0] ss:$16 sps:$4 sm:$0xff]   ;;  %s7117_s26 = sld [smem:[#allocation18_spill]] }
 0x10c   : > { %v5480_v49 = vld [vmem:[#allocation3 + $0xc4] ss:$12 sps:$4 sm:$0xff]  }
 0x10d   : > { %1401 = vmatpush1.bf16.msra.mxu0 %v5400_v35  ;;  %1787 = vmatpush1.bf16.msra.mxu1 %v5401_v36  ;;  %v5524_v35 = vld [vmem:[%s6205_s14 + $0x2e4] ss:$16 sps:$4 sm:$0xff]   ;;  %v5528_v36 = vld [vmem:[%s6205_s14 + $0x2a8] ss:$16 sps:$4 sm:$0xff]  }
 0x10e   : > { %1402 = vmatprep.subr.bf16.mxu0 %v5402_v37  ;;  %1788 = vmatprep.subr.bf16.mxu1 %v5404_v38  ;;  %v5536_v37 = vld [vmem:[%s6205_s14 + $0x2cc] ss:$16 sps:$4 sm:$0xff]   ;;  %v5522_v38 = vld [vmem:[%s6205_s14 + $0x2e0] ss:$16 sps:$4 sm:$0xff]  }
 0x111   : > { %1403 = vmatpush1.bf16.msra.mxu0 %v5406_v39  ;;  %1789 = vmatpush1.bf16.msra.mxu1 %v5407_v40  ;;  %v5534_v39 = vld [vmem:[%s6205_s14 + $0x2c8] ss:$16 sps:$4 sm:$0xff]   ;;  %v5539_v40 = vld [vmem:[%s6205_s14 + $0x2ec] ss:$16 sps:$4 sm:$0xff]   ;;  %p4691_p12 = scmp.ne.s32.totalorder %s7117_s26, 2 }
 0x112   : > { %1404 = vmatprep.subr.bf16.mxu0 %v5408_v41  ;;  %1790 = vmatprep.subr.bf16.mxu1 %v5410_v42  ;;  %v5464_v41 = vld [vmem:[#allocation3 + $0x60] ss:$12 sps:$4 sm:$0xff]   ;;  %v5468_v42 = vld [vmem:[#allocation3 + $0x7c] ss:$12 sps:$4 sm:$0xff]  }
 0x115   : > { %1405 = vmatpush1.bf16.msra.mxu0 %v5412_v43  ;;  %1791 = vmatpush1.bf16.msra.mxu1 %v5413_v44  ;;  %v5537_v43 = vld [vmem:[%s6205_s14 + $0x2e8] ss:$16 sps:$4 sm:$0xff]  }
 0x116   : > { %1406 = vmatprep.subr.bf16.mxu0 %v5414_v45  ;;  %1792 = vmatprep.subr.bf16.mxu1 %v5416_v46  ;;  %v5470_v44 = vld [vmem:[#allocation3 + $0x78] ss:$12 sps:$4 sm:$0xff]   ;;  %v5471_v45 = vld [vmem:[#allocation3 + $0x94] ss:$12 sps:$4 sm:$0xff]   ;;  %v5473_v46 = vld [vmem:[#allocation3 + $0x90] ss:$12 sps:$4 sm:$0xff]  }
 0x119   : > { %1407 = vmatpush1.bf16.msra.mxu0 %v5418_v47  ;;  %1793 = vmatpush1.bf16.msra.mxu1 %v5419_v48  ;;  %v5477_v47 = vld [vmem:[#allocation3 + $0xac] ss:$12 sps:$4 sm:$0xff]   ;;  %v5479_v48 = vld [vmem:[#allocation3 + $0xa8] ss:$12 sps:$4 sm:$0xff]  }
 0x11a   : > { %1408 = vmatprep.subr.bf16.mxu0 %v5420_v50  ;;  %1794 = vmatprep.subr.bf16.mxu1 %v5422_v51  ;;  %v5482_v50 = vld [vmem:[#allocation3 + $0xc0] ss:$12 sps:$4 sm:$0xff]   ;;  %v5486_v51 = vld [vmem:[#allocation3 + $0xdc] ss:$12 sps:$4 sm:$0xff]  }
 0x11d   : > { %1409 = vmatpush1.bf16.msra.mxu0 %v5424_v52  ;;  %1795 = vmatpush1.bf16.msra.mxu1 %v5425_v53  ;;  %v5488_v52 = vld [vmem:[#allocation3 + $0xd8] ss:$12 sps:$4 sm:$0xff]   ;;  %v5489_v53 = vld [vmem:[#allocation3 + $0xf4] ss:$12 sps:$4 sm:$0xff]  }
 0x11e   : > { %1410 = vmatprep.subr.bf16.mxu0 %v5426_v54  ;;  %1796 = vmatprep.subr.bf16.mxu1 %v5428_v55  ;;  %v5491_v54 = vld [vmem:[#allocation3 + $0xf0] ss:$12 sps:$4 sm:$0xff]   ;;  %v5495_v55 = vld [vmem:[#allocation3 + $0x10c] ss:$12 sps:$4 sm:$0xff]  }
 0x121   : > { %1411 = vmatpush1.bf16.msra.mxu0 %v5430_v56  ;;  %1797 = vmatpush1.bf16.msra.mxu1 %v5431_v57  ;;  %v5497_v56 = vld [vmem:[#allocation3 + $0x108] ss:$12 sps:$4 sm:$0xff]   ;;  %v5501_v57 = vld [vmem:[#allocation3 + $0x124] ss:$12 sps:$4 sm:$0xff]  }
 0x122   : > { %1412 = vmatprep.subr.bf16.mxu0 %v5432_v58  ;;  %1798 = vmatprep.subr.bf16.mxu1 %v5434_v59  ;;  %v5552_v58 = vld [vmem:[%s6214_s18 + $0xc8] ss:$12 sps:$4 sm:$0xff]   ;;  %v5503_v59 = vld [vmem:[#allocation3 + $0x120] ss:$12 sps:$4 sm:$0xff]  }
 0x125   : > { %1413 = vmatpush1.bf16.msra.mxu0 %v5436_v60  ;;  %1799 = vmatpush1.bf16.msra.mxu1 %v5437_v61  ;;  %v5510_v60 = vld [vmem:[#allocation3 + $0x13c] ss:$12 sps:$4 sm:$0xff]   ;;  %v5557_v61 = vld [vmem:[%s6214_s18 + $0x4] ss:$12 sps:$4 sm:$0xff]  }
 0x126   : > { %1414 = vmatprep.subr.bf16.mxu0 %v5438_v62  ;;  %1800 = vmatprep.subr.bf16.mxu1 %v5440_v63  ;;  %v5512_v62 = vld [vmem:[#allocation3 + $0x138] ss:$12 sps:$4 sm:$0xff]   ;;  %v5519_v63 = vld [vmem:[#allocation3 + $0x154] ss:$12 sps:$4 sm:$0xff]  }
 0x129   : > { %1415 = vmatpush1.bf16.msra.mxu0 %v5442_v0  ;;  %1801 = vmatpush1.bf16.msra.mxu1 %v5443_v1  ;;  %v5521_v0 = vld [vmem:[#allocation3 + $0x150] ss:$12 sps:$4 sm:$0xff]   ;;  %v5531_v1 = vld [vmem:[#allocation3 + $0x16c] ss:$12 sps:$4 sm:$0xff]  }
 0x12a   : > { %1577 = vmatprep.subr.bf16.mxu0 %v5449_v2  ;;  %1963 = vmatprep.subr.bf16.mxu1 %v5500_v8  ;;  %v5533_v2 = vld [vmem:[#allocation3 + $0x168] ss:$12 sps:$4 sm:$0xff]  }
 0x12b   : > { %v5562_v8 = vld [vmem:[%s6214_s18 + $0xe0] ss:$12 sps:$4 sm:$0xff]  }
 0x12c   : > { %1417 = vmatmul.mubr.bf16.vlgmr.msra.gmra.mrb[0].mxu0 %v5444_v3  ;;  %1803 = vmatmul.mubr.bf16.vlgmr.msra.gmra.mrb[0].mxu1 %v5444_v3  ;;  %v5935_v3 = vmov 0  }
 0x12d   : > { %1578 = vmatpush1.bf16.msra.mxu0 %v5447_v4  ;;  %1426 = vmatprep.mubr.bf16.mxu0 %v5450_v5  ;;  %v5540_v4 = vld [vmem:[#allocation3 + $0x8] ss:$12 sps:$4 sm:$0xff]  }
 0x12e   : > { %1812 = vmatprep.mubr.bf16.mxu1 %v5450_v5  ;;  %1579 = vmatprep.subr.bf16.mxu0 %v5458_v6  ;;  %v5553_v5 = vld [vmem:[%s6214_s18 + $0x8] ss:$12 sps:$4 sm:$0xff]   ;;  %v5555_v6 = vld [vmem:[%s6214_s18] ss:$12 sps:$4 sm:$0xff]  }
 0x12f   : > { %1964 = vmatpush1.bf16.msra.mxu1 %v5498_v7  ;;  %v5561_v7 = vld [vmem:[%s6214_s18 + $0x1c] ss:$12 sps:$4 sm:$0xff]  }
 0x130   : > { %1965 = vmatprep.subr.bf16.mxu1 %v5509_v13  ;;  %v5541_v13 = vld [vmem:[#allocation3 + $0x20] ss:$12 sps:$4 sm:$0xff]  }
 0x131   : > { %1580 = vmatpush1.bf16.msra.mxu0 %v5456_v9  ;;  %v5559_v9 = vld [vmem:[%s6214_s18 + $0x18] ss:$12 sps:$4 sm:$0xff]  }
 0x132   : > { %1581 = vmatprep.subr.bf16.mxu0 %v5467_v10  ;;  %v5563_v10 = vld [vmem:[%s6214_s18 + $0x20] ss:$12 sps:$4 sm:$0xff]  }
 0x133   : > { %1966 = vmatpush1.bf16.msra.mxu1 %v5507_v15  ;;  %v5573_v15 = vld [vmem:[%s6214_s18 + $0x38] ss:$12 sps:$4 sm:$0xff]  }
 0x134   : > { %1427 = vmatmul.mubr.bf16.gmra.mrb[4].mxu0 %v5452_v11  ;;  %1813 = vmatmul.mubr.bf16.gmra.mrb[4].mxu1 %v5452_v11  ;;  %v5567_v11 = vld [vmem:[%s6214_s18 + $0x34] ss:$12 sps:$4 sm:$0xff]  }
 0x135   : > { %1436 = vmatprep.mubr.bf16.mxu0 %v5453_v12  ;;  %1822 = vmatprep.mubr.bf16.mxu1 %v5453_v12  ;;  %v5572_v12 = vld [vmem:[%s6214_s18 + $0xf8] ss:$12 sps:$4 sm:$0xff]  }
 0x136   : > { %1582 = vmatpush1.bf16.msra.mxu0 %v5465_v14  ;;  %1967 = vmatprep.subr.bf16.mxu1 %v5515_v17  ;;  %v5565_v14 = vld [vmem:[%s6214_s18 + $0x30] ss:$12 sps:$4 sm:$0xff]  }
 0x137   : > { %1583 = vmatprep.subr.bf16.mxu0 %v5476_v16  ;;  %1968 = vmatpush1.bf16.msra.mxu1 %v5513_v19  ;;  %v5571_v16 = vld [vmem:[%s6214_s18 + $0x4c] ss:$12 sps:$4 sm:$0xff]   ;;  %v5580_v17 = vld [vmem:[%s6214_s18 + $0x110] ss:$12 sps:$4 sm:$0xff]  }
 0x138   : > { %1969 = vmatprep.subr.bf16.mxu1 %v5518_v21  ;;  %v5581_v19 = vld [vmem:[%s6214_s18 + $0x50] ss:$12 sps:$4 sm:$0xff]   ;;  %v5588_v21 = vld [vmem:[%s6214_s18 + $0x128] ss:$12 sps:$4 sm:$0xff]  }
 0x13a   : > { %1584 = vmatpush1.bf16.msra.mxu0 %v5474_v18  ;;  %v5569_v18 = vld [vmem:[%s6214_s18 + $0x48] ss:$12 sps:$4 sm:$0xff]  }
 0x13b   : > { %1585 = vmatprep.subr.bf16.mxu0 %v5485_v20  ;;  %1970 = vmatpush1.bf16.msra.mxu1 %v5516_v25  ;;  %v5576_v20 = vld [vmem:[%s6214_s18 + $0x64] ss:$12 sps:$4 sm:$0xff]   ;;  %v5579_v25 = vld [vmem:[%s6214_s18 + $0x7c] ss:$12 sps:$4 sm:$0xff]  }
 0x13c   : > { %1437 = vmatmul.mubr.bf16.gmra.mrb[8].mxu0 %v5455_v22  ;;  %1823 = vmatmul.mubr.bf16.gmra.mrb[8].mxu1 %v5455_v22  ;;  %v5542_v22 = vld [vmem:[#allocation3 + $0x38] ss:$12 sps:$4 sm:$0xff]  }
 0x13d   : > { %1446 = vmatprep.mubr.bf16.mxu0 %v5459_v23  ;;  %1832 = vmatprep.mubr.bf16.mxu1 %v5459_v23  ;;  %v5574_v23 = vld [vmem:[%s6214_s18 + $0x60] ss:$12 sps:$4 sm:$0xff]  }
 0x13e   : > { %1586 = vmatpush1.bf16.msra.mxu0 %v5483_v24  ;;  %1971 = vmatprep.subr.bf16.mxu1 %v5527_v27  ;;  %v5589_v24 = vld [vmem:[%s6214_s18 + $0x68] ss:$12 sps:$4 sm:$0xff]   ;;  %v5577_v27 = vld [vmem:[%s6214_s18 + $0x78] ss:$12 sps:$4 sm:$0xff]  }
 0x13f   : > { %1587 = vmatprep.subr.bf16.mxu0 %v5494_v26  ;;  %1972 = vmatpush1.bf16.msra.mxu1 %v5525_v31  ;;  %v5596_v26 = vld [vmem:[%s6214_s18 + $0x140] ss:$12 sps:$4 sm:$0xff]   ;;  %v5543_v31 = vld [vmem:[#allocation3 + $0x50] ss:$12 sps:$4 sm:$0xff]  }
 0x140   : > { %1973 = vmatprep.subr.bf16.mxu1 %v5530_v33  ;;  %v5605_v33 = vld [vmem:[%s6214_s18 + $0x98] ss:$12 sps:$4 sm:$0xff]  }
 0x142   : > { %1588 = vmatpush1.bf16.msra.mxu0 %v5492_v28  ;;  %v5597_v28 = vld [vmem:[%s6214_s18 + $0x80] ss:$12 sps:$4 sm:$0xff]  }
 0x143   : > { %1589 = vmatprep.subr.bf16.mxu0 %v5506_v29  ;;  %1974 = vmatpush1.bf16.msra.mxu1 %v5528_v36  ;;  %v5584_v29 = vld [vmem:[%s6214_s18 + $0x94] ss:$12 sps:$4 sm:$0xff]  }
 0x144   : > { %1447 = vmatmul.mubr.bf16.gmra.mrb[12].mxu0 %v5461_v30  ;;  %1833 = vmatmul.mubr.bf16.gmra.mrb[12].mxu1 %v5461_v30  ;;  %v5604_v30 = vld [vmem:[%s6214_s18 + $0x158] ss:$12 sps:$4 sm:$0xff]   ;;  %v5585_v36 = vld [vmem:[%s6214_s18 + $0xa8] ss:$12 sps:$4 sm:$0xff]  }
 0x145   : > { %1456 = vmatprep.mubr.bf16.mxu0 %v5462_v32  ;;  %1842 = vmatprep.mubr.bf16.mxu1 %v5462_v32  ;;  %v5582_v32 = vld [vmem:[%s6214_s18 + $0x90] ss:$12 sps:$4 sm:$0xff]  }
 0x146   : > { %1590 = vmatpush1.bf16.msra.mxu0 %v5504_v34  ;;  %1975 = vmatprep.subr.bf16.mxu1 %v5536_v37  ;;  %v5587_v34 = vld [vmem:[%s6214_s18 + $0xac] ss:$12 sps:$4 sm:$0xff]   ;;  %v5613_v37 = vld [vmem:[%s6214_s18 + $0xb0] ss:$12 sps:$4 sm:$0xff]  }
 0x147   : > { %1591 = vmatprep.subr.bf16.mxu0 %v5524_v35  ;;  %1976 = vmatpush1.bf16.msra.mxu1 %v5534_v39  ;;  %v5612_v35 = vld [vmem:[%s6214_s18 + $0x170] ss:$12 sps:$4 sm:$0xff]   ;;  %v5544_v39 = vld [vmem:[#allocation3 + $0x68] ss:$12 sps:$4 sm:$0xff]  }
 0x148   : > { %1977 = vmatprep.subr.bf16.mxu1 %v5539_v40  ;;  %v5590_v40 = vld [vmem:[%s6214_s18 + $0xc0] ss:$12 sps:$4 sm:$0xff]  }
 0x14a   : > { %1592 = vmatpush1.bf16.msra.mxu0 %v5522_v38  ;;  %v5592_v38 = vld [vmem:[%s6214_s18 + $0xc4] ss:$12 sps:$4 sm:$0xff]  }
 0x14b   : > { %1978 = vmatpush1.bf16.msra.mxu1 %v5537_v43  ;;  %3084 = vmatprep.subr.bf16.mxu0 %v5557_v61  ;;  %v5600_v43 = vld [vmem:[%s6214_s18 + $0xf4] ss:$12 sps:$4 sm:$0xff]  }
 0x14c   : > { %1457 = vmatmul.mubr.bf16.gmra.mrb[16].mxu0 %v5464_v41  ;;  %1843 = vmatmul.mubr.bf16.gmra.mrb[16].mxu1 %v5464_v41  ;;  %v5595_v41 = vld [vmem:[%s6214_s18 + $0xdc] ss:$12 sps:$4 sm:$0xff]  }
 0x14d   : > { %1466 = vmatprep.mubr.bf16.mxu0 %v5468_v42  ;;  %1852 = vmatprep.mubr.bf16.mxu1 %v5468_v42  ;;  %v5593_v42 = vld [vmem:[%s6214_s18 + $0xd8] ss:$12 sps:$4 sm:$0xff]   ;;  %v5617_v61 = vld [vmem:[%s6214_s18 + $0x168] ss:$12 sps:$4 sm:$0xff]  }
 0x14e   : > { %4698 = vmatprep.subr.bf16.mxu1 %v5552_v58  ;;  %v5550_v58 = vld [vmem:[#allocation3 + $0xf8] ss:$12 sps:$4 sm:$0xff]  }
 0x154   : > { %1467 = vmatmul.mubr.bf16.gmra.mrb[20].mxu0 %v5470_v44  ;;  %1853 = vmatmul.mubr.bf16.gmra.mrb[20].mxu1 %v5470_v44  ;;  %v5545_v44 = vld [vmem:[#allocation3 + $0x80] ss:$12 sps:$4 sm:$0xff]  }
 0x155   : > { %1476 = vmatprep.mubr.bf16.mxu0 %v5471_v45  ;;  %1862 = vmatprep.mubr.bf16.mxu1 %v5471_v45  ;;  %v5598_v45 = vld [vmem:[%s6214_s18 + $0xf0] ss:$12 sps:$4 sm:$0xff]  }
 0x15c   : > { %1477 = vmatmul.mubr.bf16.gmra.mrb[24].mxu0 %v5473_v46  ;;  %1863 = vmatmul.mubr.bf16.gmra.mrb[24].mxu1 %v5473_v46  ;;  %v5603_v46 = vld [vmem:[%s6214_s18 + $0x10c] ss:$12 sps:$4 sm:$0xff]  }
 0x15d   : > { %1486 = vmatprep.mubr.bf16.mxu0 %v5477_v47  ;;  %1872 = vmatprep.mubr.bf16.mxu1 %v5477_v47  ;;  %v5601_v47 = vld [vmem:[%s6214_s18 + $0x108] ss:$12 sps:$4 sm:$0xff]  }
 0x164   : > { %1487 = vmatmul.mubr.bf16.gmra.mrb[28].mxu0 %v5479_v48  ;;  %1873 = vmatmul.mubr.bf16.gmra.mrb[28].mxu1 %v5479_v48  ;;  %v5608_v48 = vld [vmem:[%s6214_s18 + $0x124] ss:$12 sps:$4 sm:$0xff]  }
 0x165   : > { %1496 = vmatprep.mubr.bf16.mxu0 %v5480_v49  ;;  %1882 = vmatprep.mubr.bf16.mxu1 %v5480_v49  ;;  %v5546_v49 = vld [vmem:[#allocation3 + $0x98] ss:$12 sps:$4 sm:$0xff]  }
 0x16c   : > { %1497 = vmatmul.mubr.bf16.gmra.mrb[32].mxu0 %v5482_v50  ;;  %1883 = vmatmul.mubr.bf16.gmra.mrb[32].mxu1 %v5482_v50  ;;  %v5606_v50 = vld [vmem:[%s6214_s18 + $0x120] ss:$12 sps:$4 sm:$0xff]  }
 0x16d   : > { %1506 = vmatprep.mubr.bf16.mxu0 %v5486_v51  ;;  %1892 = vmatprep.mubr.bf16.mxu1 %v5486_v51  ;;  %v5611_v51 = vld [vmem:[%s6214_s18 + $0x13c] ss:$12 sps:$4 sm:$0xff]  }
 0x174   : > { %1507 = vmatmul.mubr.bf16.gmra.mrb[36].mxu0 %v5488_v52  ;;  %1893 = vmatmul.mubr.bf16.gmra.mrb[36].mxu1 %v5488_v52  ;;  %v5609_v52 = vld [vmem:[%s6214_s18 + $0x138] ss:$12 sps:$4 sm:$0xff]  }
 0x175   : > { %1516 = vmatprep.mubr.bf16.mxu0 %v5489_v53  ;;  %1902 = vmatprep.mubr.bf16.mxu1 %v5489_v53  ;;  %v5616_v53 = vld [vmem:[%s6214_s18 + $0x154] ss:$12 sps:$4 sm:$0xff]  }
 0x17c   : > { %1517 = vmatmul.mubr.bf16.gmra.mrb[40].mxu0 %v5491_v54  ;;  %1903 = vmatmul.mubr.bf16.gmra.mrb[40].mxu1 %v5491_v54  ;;  %v5547_v54 = vld [vmem:[#allocation3 + $0xb0] ss:$12 sps:$4 sm:$0xff]  }
 0x17d   : > { %1526 = vmatprep.mubr.bf16.mxu0 %v5495_v55  ;;  %1912 = vmatprep.mubr.bf16.mxu1 %v5495_v55  ;;  %v5614_v55 = vld [vmem:[%s6214_s18 + $0x150] ss:$12 sps:$4 sm:$0xff]  }
 0x184   : > { %1527 = vmatmul.mubr.bf16.gmra.mrb[44].mxu0 %v5497_v56  ;;  %1913 = vmatmul.mubr.bf16.gmra.mrb[44].mxu1 %v5497_v56  ;;  %v5548_v56 = vld [vmem:[#allocation3 + $0xc8] ss:$12 sps:$4 sm:$0xff]  }
 0x185   : > { %1536 = vmatprep.mubr.bf16.mxu0 %v5501_v57  ;;  %1922 = vmatprep.mubr.bf16.mxu1 %v5501_v57  ;;  %v5549_v57 = vld [vmem:[#allocation3 + $0xe0] ss:$12 sps:$4 sm:$0xff]  }
 0x18c   : > { %1537 = vmatmul.mubr.bf16.gmra.mrb[48].mxu0 %v5503_v59  ;;  %1923 = vmatmul.mubr.bf16.gmra.mrb[48].mxu1 %v5503_v59  ;;  %v5551_v59 = vld [vmem:[#allocation3 + $0x110] ss:$12 sps:$4 sm:$0xff]  }
 0x18d   : > { %1546 = vmatprep.mubr.bf16.mxu0 %v5510_v60  ;;  %1932 = vmatprep.mubr.bf16.mxu1 %v5510_v60  ;;  %v5619_v60 = vld [vmem:[%s6214_s18 + $0x16c] ss:$12 sps:$4 sm:$0xff]  }
 0x194   : > { %1547 = vmatmul.mubr.bf16.gmra.mrb[52].mxu0 %v5512_v62  ;;  %1933 = vmatmul.mubr.bf16.gmra.mrb[52].mxu1 %v5512_v62  ;;  %v5554_v62 = vld [vmem:[#allocation3 + $0x128] ss:$12 sps:$4 sm:$0xff]  }
 0x195   : > { %1556 = vmatprep.mubr.bf16.mxu0 %v5519_v63  ;;  %1942 = vmatprep.mubr.bf16.mxu1 %v5519_v63  ;;  %v5620_v63 = vld [vmem:[%s6214_s18 + $0x248] ss:$12 sps:$4 sm:$0xff]  }
 0x19c   : > { %1557 = vmatmul.mubr.bf16.gmra.mrb[56].mxu0 %v5521_v0  ;;  %1943 = vmatmul.mubr.bf16.gmra.mrb[56].mxu1 %v5521_v0  ;;  %v5558_v0 = vld [vmem:[#allocation3 + $0x140] ss:$12 sps:$4 sm:$0xff]  }
 0x19d   : > { %1566 = vmatprep.mubr.bf16.mxu0 %v5531_v1  ;;  %1952 = vmatprep.mubr.bf16.mxu1 %v5531_v1  ;;  %v5624_v1 = vld [vmem:[%s6214_s18 + $0x184] ss:$12 sps:$4 sm:$0xff]  }
 0x1a4   : > { %1567 = vmatmul.mubr.bf16.gmra.mrb[60].mxu0 %v5533_v2  ;;  %1953 = vmatmul.mubr.bf16.gmra.mrb[60].mxu1 %v5533_v2  ;;  %v5564_v2 = vld [vmem:[#allocation3 + $0x158] ss:$12 sps:$4 sm:$0xff]  }
 0x1a5   : > { %1609 = vmatprep.mubr.bf16.mxu0 %v5935_v3  ;;  %1995 = vmatprep.mubr.bf16.mxu1 %v5935_v3 }
 0x1ac   : > { %1610 = vmatmul.mubr.bf16.vlgmr.msra.gmra.mrb[0].mxu0 %v5540_v4  ;;  %1996 = vmatmul.mubr.bf16.vlgmr.msra.gmra.mrb[0].mxu1 %v5540_v4  ;;  %v5568_v4 = vld [vmem:[#allocation3 + $0x170] ss:$12 sps:$4 sm:$0xff]  }
 0x1ad   : > { %1619 = vmatprep.mubr.bf16.mxu0 %v5935_v3  ;;  %2005 = vmatprep.mubr.bf16.mxu1 %v5935_v3 }
 0x1ae   : > { %4699 = vmatpush3.bf16.msra.mxu1 %v5553_v5  ;;  %3085 = vmatpush1.bf16.msra.mxu0 %v5555_v6  ;;  %v628_v5 = vlaneseq }
 0x1af   : > { %3086 = vmatprep.subr.bf16.mxu0 %v5561_v7  ;;  %4700 = vmatprep.subr.bf16.mxu1 %v5562_v8 }
 0x1b0   : > { %v6499_v6 = vshrl.u32 %v628_v5, 7 }
 0x1b2   : > { %3087 = vmatpush1.bf16.msra.mxu0 %v5559_v9  ;;  %4701 = vmatpush3.bf16.msra.mxu1 %v5563_v10  ;;  %v630_v7 = vsub.s32 0, %v6499_v6  ;;  %v638_v8 = vsub.s32 2, %v6499_v6  ;;  %v626_v9 = vld [vmem:[%s315_s1] sm:$0xf]  ;;  %v634_v10 = vsub.s32 1, %v6499_v6 }
 0x1b3   : > { %3088 = vmatprep.subr.bf16.mxu0 %v5567_v11  ;;  %4702 = vmatprep.subr.bf16.mxu1 %v5572_v12  ;;  %v642_v11 = vsub.s32 3, %v6499_v6 }
 0x1b4   : > { %1620 = vmatmul.mubr.bf16.gmra.mrb[4].mxu0 %v5541_v13  ;;  %2006 = vmatmul.mubr.bf16.gmra.mrb[4].mxu1 %v5541_v13  ;;  %v6509_v12 = vrot.slane %v626_v9, %v630_v7  ;;  %v6517_v13 = vrot.slane %v626_v9, %v634_v10 }
 0x1b5   : > { %1629 = vmatprep.mubr.bf16.mxu0 %v5935_v3  ;;  %2015 = vmatprep.mubr.bf16.mxu1 %v5935_v3 }
 0x1b6   : > { %3089 = vmatpush1.bf16.msra.mxu0 %v5565_v14  ;;  %4703 = vmatpush3.bf16.msra.mxu1 %v5573_v15  ;;  %v6519_v14 = vrot.slane %v626_v9, %v642_v11  ;;  %v5636_v11 = vld [vmem:[%s6214_s18 + $0x278] ss:$12 sps:$4 sm:$0xff]  }
 0x1b7   : > { %3090 = vmatprep.subr.bf16.mxu0 %v5571_v16  ;;  %4704 = vmatprep.subr.bf16.mxu1 %v5580_v17 }
 0x1ba   : > { %3091 = vmatpush1.bf16.msra.mxu0 %v5569_v18  ;;  %4705 = vmatpush3.bf16.msra.mxu1 %v5581_v19 }
 0x1bb   : > { %3092 = vmatprep.subr.bf16.mxu0 %v5576_v20  ;;  %4706 = vmatprep.subr.bf16.mxu1 %v5588_v21 }
 0x1bc   : > { %1630 = vmatmul.mubr.bf16.gmra.mrb[8].mxu0 %v5542_v22  ;;  %2016 = vmatmul.mubr.bf16.gmra.mrb[8].mxu1 %v5542_v22 }
 0x1bd   : > { %1639 = vmatprep.mubr.bf16.mxu0 %v5935_v3  ;;  %2025 = vmatprep.mubr.bf16.mxu1 %v5935_v3 }
 0x1be   : > { %3093 = vmatpush1.bf16.msra.mxu0 %v5574_v23  ;;  %4707 = vmatpush3.bf16.msra.mxu1 %v5589_v24 }
 0x1bf   : > { %3094 = vmatprep.subr.bf16.mxu0 %v5579_v25  ;;  %4708 = vmatprep.subr.bf16.mxu1 %v5596_v26 }
 0x1c2   : > { %3095 = vmatpush1.bf16.msra.mxu0 %v5577_v27  ;;  %4709 = vmatpush3.bf16.msra.mxu1 %v5597_v28 }
 0x1c3   : > { %3096 = vmatprep.subr.bf16.mxu0 %v5584_v29  ;;  %4710 = vmatprep.subr.bf16.mxu1 %v5604_v30 }
 0x1c4   : > { %1640 = vmatmul.mubr.bf16.gmra.mrb[12].mxu0 %v5543_v31  ;;  %2026 = vmatmul.mubr.bf16.gmra.mrb[12].mxu1 %v5543_v31 }
 0x1c5   : > { %1649 = vmatprep.mubr.bf16.mxu0 %v5935_v3  ;;  %2035 = vmatprep.mubr.bf16.mxu1 %v5935_v3 }
 0x1c6   : > { %3097 = vmatpush1.bf16.msra.mxu0 %v5582_v32  ;;  %4711 = vmatpush3.bf16.msra.mxu1 %v5605_v33 }
 0x1c7   : > { %3098 = vmatprep.subr.bf16.mxu0 %v5587_v34  ;;  %4712 = vmatprep.subr.bf16.mxu1 %v5612_v35 }
 0x1ca   : > { %3099 = vmatpush1.bf16.msra.mxu0 %v5585_v36  ;;  %4713 = vmatpush3.bf16.msra.mxu1 %v5613_v37 }
 0x1cb   : > { %3100 = vmatprep.subr.bf16.mxu0 %v5592_v38  ;;  %4810 = vmatprep.subr.bf16.mxu1 %v5620_v63  ;;  %v5625_v63 = vld [vmem:[%s6214_s18 + $0x198] ss:$12 sps:$4 sm:$0xff]  }
 0x1cc   : > { %1650 = vmatmul.mubr.bf16.gmra.mrb[16].mxu0 %v5544_v39  ;;  %2036 = vmatmul.mubr.bf16.gmra.mrb[16].mxu1 %v5544_v39 }
 0x1cd   : > { %1659 = vmatprep.mubr.bf16.mxu0 %v5935_v3  ;;  %2045 = vmatprep.mubr.bf16.mxu1 %v5935_v3 }
 0x1ce   : > { %3101 = vmatpush1.bf16.msra.mxu0 %v5590_v40 }
 0x1cf   : > { %3102 = vmatprep.subr.bf16.mxu0 %v5595_v41 }
 0x1d2   : > { %3103 = vmatpush1.bf16.msra.mxu0 %v5593_v42 }
 0x1d3   : > { %3104 = vmatprep.subr.bf16.mxu0 %v5600_v43 }
 0x1d4   : > { %1660 = vmatmul.mubr.bf16.gmra.mrb[20].mxu0 %v5545_v44  ;;  %2046 = vmatmul.mubr.bf16.gmra.mrb[20].mxu1 %v5545_v44 }
 0x1d5   : > { %1669 = vmatprep.mubr.bf16.mxu0 %v5935_v3  ;;  %2055 = vmatprep.mubr.bf16.mxu1 %v5935_v3 }
 0x1d6   : > { %3105 = vmatpush1.bf16.msra.mxu0 %v5598_v45  ;;  %v5621_v45 = vld [vmem:[%s6214_s18 + $0x188] ss:$12 sps:$4 sm:$0xff]  }
 0x1d7   : > { %3106 = vmatprep.subr.bf16.mxu0 %v5603_v46  ;;  %v5622_v46 = vld [vmem:[%s6214_s18 + $0x180] ss:$12 sps:$4 sm:$0xff]  }
 0x1da   : > { %3107 = vmatpush1.bf16.msra.mxu0 %v5601_v47 }
 0x1db   : > { %3108 = vmatprep.subr.bf16.mxu0 %v5608_v48 }
 0x1dc   : > { %1670 = vmatmul.mubr.bf16.gmra.mrb[24].mxu0 %v5546_v49  ;;  %2056 = vmatmul.mubr.bf16.gmra.mrb[24].mxu1 %v5546_v49 }
 0x1dd   : > { %1679 = vmatprep.mubr.bf16.mxu0 %v5935_v3  ;;  %2065 = vmatprep.mubr.bf16.mxu1 %v5935_v3 }
 0x1de   : > { %3109 = vmatpush1.bf16.msra.mxu0 %v5606_v50 }
 0x1df   : > { %3110 = vmatprep.subr.bf16.mxu0 %v5611_v51  ;;  %v5627_v51 = vld [vmem:[%s6214_s18 + $0x19c] ss:$12 sps:$4 sm:$0xff]  }
 0x1e2   : > { %3111 = vmatpush1.bf16.msra.mxu0 %v5609_v52  ;;  %v5628_v52 = vld [vmem:[%s6214_s18 + $0x260] ss:$12 sps:$4 sm:$0xff]  }
 0x1e3   : > { %3112 = vmatprep.subr.bf16.mxu0 %v5616_v53 }
 0x1e4   : > { %1680 = vmatmul.mubr.bf16.gmra.mrb[28].mxu0 %v5547_v54  ;;  %2066 = vmatmul.mubr.bf16.gmra.mrb[28].mxu1 %v5547_v54 }
 0x1e5   : > { %1689 = vmatprep.mubr.bf16.mxu0 %v5935_v3  ;;  %2075 = vmatprep.mubr.bf16.mxu1 %v5935_v3 }
 0x1e6   : > { %3113 = vmatpush1.bf16.msra.mxu0 %v5614_v55 }
 0x1e7   : > { %3114 = vmatprep.subr.bf16.mxu0 %v5619_v60 }
 0x1ea   : > { %3115 = vmatpush1.bf16.msra.mxu0 %v5617_v61 }
 0x1eb   : > { %3277 = vmatprep.subr.bf16.mxu0 %v5624_v1  ;;  %v5632_v1 = vld [vmem:[%s6214_s18 + $0x1b4] ss:$12 sps:$4 sm:$0xff]  }
 0x1ec   : > { %1690 = vmatmul.mubr.bf16.gmra.mrb[32].mxu0 %v5548_v56  ;;  %2076 = vmatmul.mubr.bf16.gmra.mrb[32].mxu1 %v5548_v56 }
 0x1ed   : > { %1699 = vmatprep.mubr.bf16.mxu0 %v5935_v3  ;;  %2085 = vmatprep.mubr.bf16.mxu1 %v5935_v3 }
 0x1f4   : > { %1700 = vmatmul.mubr.bf16.gmra.mrb[36].mxu0 %v5549_v57  ;;  %2086 = vmatmul.mubr.bf16.gmra.mrb[36].mxu1 %v5549_v57 }
 0x1f5   : > { %1709 = vmatprep.mubr.bf16.mxu0 %v5935_v3  ;;  %2095 = vmatprep.mubr.bf16.mxu1 %v5935_v3 }
 0x1fc   : > { %1710 = vmatmul.mubr.bf16.gmra.mrb[40].mxu0 %v5550_v58  ;;  %2096 = vmatmul.mubr.bf16.gmra.mrb[40].mxu1 %v5550_v58 }
 0x1fd   : > { %1719 = vmatprep.mubr.bf16.mxu0 %v5935_v3  ;;  %2105 = vmatprep.mubr.bf16.mxu1 %v5935_v3 }
 0x204   : > { %1720 = vmatmul.mubr.bf16.gmra.mrb[44].mxu0 %v5551_v59  ;;  %2106 = vmatmul.mubr.bf16.gmra.mrb[44].mxu1 %v5551_v59 }
 0x205   : > { %1729 = vmatprep.mubr.bf16.mxu0 %v5935_v3  ;;  %2115 = vmatprep.mubr.bf16.mxu1 %v5935_v3 }
 0x20c   : > { %1730 = vmatmul.mubr.bf16.gmra.mrb[48].mxu0 %v5554_v62  ;;  %2116 = vmatmul.mubr.bf16.gmra.mrb[48].mxu1 %v5554_v62 }
 0x20d   : > { %1739 = vmatprep.mubr.bf16.mxu0 %v5935_v3  ;;  %2125 = vmatprep.mubr.bf16.mxu1 %v5935_v3 }
 0x214   : > { %1740 = vmatmul.mubr.bf16.gmra.mrb[52].mxu0 %v5558_v0  ;;  %2126 = vmatmul.mubr.bf16.gmra.mrb[52].mxu1 %v5558_v0  ;;  %v5629_v0 = vld [vmem:[%s6214_s18 + $0x1a0] ss:$12 sps:$4 sm:$0xff]  }
 0x215   : > { %1749 = vmatprep.mubr.bf16.mxu0 %v5935_v3  ;;  %2135 = vmatprep.mubr.bf16.mxu1 %v5935_v3 }
 0x21c   : > { %1750 = vmatmul.mubr.bf16.gmra.mrb[56].mxu0 %v5564_v2  ;;  %2136 = vmatmul.mubr.bf16.gmra.mrb[56].mxu1 %v5564_v2 }
 0x21d   : > { %1759 = vmatprep.mubr.bf16.mxu0 %v5935_v3  ;;  %2145 = vmatprep.mubr.bf16.mxu1 %v5935_v3  ;;  %v6513_v3 = vrot.slane %v626_v9, %v638_v8 }
 0x224   : > { %1760 = vmatmul.mubr.bf16.gmra.mrb[60].mxu0 %v5568_v4  ;;  %2146 = vmatmul.mubr.bf16.gmra.mrb[60].mxu1 %v5568_v4 }
 0x27f   : > { %v1611_v15 = vpop.f32.mrb[0].mxu0  ;;  %v1997_v16 = vpop.f32.mrb[0].mxu1 }
 0x280   : > { %v4922_v17 = vadd.f32 %v1611_v15, %v6509_v12  ;;  %v4986_v18 = vadd.f32 %v1997_v16, %v6513_v3  ;;  %v1613_v19 = vpop.f32.mrb[1].mxu0  ;;  %v1999_v20 = vpop.f32.mrb[1].mxu1 }
 0x281   : > { %v4923_v21 = vadd.f32 %v1613_v19, %v6517_v13  ;;  %v4987_v22 = vadd.f32 %v1999_v20, %v6519_v14  ;;  %v1615_v23 = vpop.f32.mrb[2].mxu0  ;;  %v2001_v24 = vpop.f32.mrb[2].mxu1 }
 0x282   : > { %v4924_v25 = vadd.f32 %v1615_v23, %v6509_v12  ;;  %v4988_v26 = vadd.f32 %v2001_v24, %v6513_v3  ;;  %v1617_v27 = vpop.f32.mrb[3].mxu0  ;;  %v2003_v28 = vpop.f32.mrb[3].mxu1  ;;  %v2156_v31 = vmax.f32 %v4922_v17, 0.0  ;;  %v2158_v32 = vmax.f32 %v4986_v18, 0.0 }
 0x283   : > { %v4925_v29 = vadd.f32 %v1617_v27, %v6517_v13  ;;  %v4989_v30 = vadd.f32 %v2003_v28, %v6519_v14  ;;  %v2157_v35 = vmax.f32 %v4923_v21, 0.0  ;;  %v2159_v36 = vmax.f32 %v4987_v22, 0.0 }
 0x284   : > { %v2160_v33 = vmax.f32 %v4924_v25, 0.0  ;;  %v2162_v34 = vmax.f32 %v4988_v26, 0.0  ;;  %v5630_v25 = vld [vmem:[%s6214_s18 + $0x1b0] ss:$12 sps:$4 sm:$0xff]   ;;  %v5637_v26 = vld [vmem:[%s6214_s18 + $0x1b8] ss:$12 sps:$4 sm:$0xff]  }
 0x285   : > { %v2161_v37 = vmax.f32 %v4925_v29, 0.0  ;;  %v2163_v38 = vmax.f32 %v4989_v30, 0.0 }
 0x286   : > { %v2380_v39 = vpack.c.bf16 %v2160_v33, %v2156_v31  ;;  %v6529_v40 = vpack.c.bf16 %v2162_v34, %v2158_v32  ;;  %v5635_v31 = vld [vmem:[%s6214_s18 + $0x1cc] ss:$12 sps:$4 sm:$0xff]   ;;  %v5644_v32 = vld [vmem:[%s6214_s18 + $0x290] ss:$12 sps:$4 sm:$0xff]  }
 0x287   : > { %v2381_v41 = vpack.c.bf16 %v2161_v37, %v2157_v35  ;;  %v6531_v42 = vpack.c.bf16 %v2163_v38, %v2159_v36  ;;  %v1621_v43 = vpop.f32.mrb[4].mxu0  ;;  %v2007_v44 = vpop.f32.mrb[4].mxu1 }
 0x288   : > { %v4926_v47 = vadd.f32 %v1621_v43, %v6509_v12  ;;  %v4990_v48 = vadd.f32 %v2007_v44, %v6513_v3  ;;  %v1623_v49 = vpop.f32.mrb[5].mxu0  ;;  %v2009_v50 = vpop.f32.mrb[5].mxu1 }
 0x289   : > { %v4927_v53 = vadd.f32 %v1623_v49, %v6517_v13  ;;  %v4991_v54 = vadd.f32 %v2009_v50, %v6519_v14  ;;  %v1625_v55 = vpop.f32.mrb[6].mxu0  ;;  %v2011_v56 = vpop.f32.mrb[6].mxu1  ;;  %3116 = vmatprep.mubr.bf16.mxu0 %v2381_v41  ;;  %3502 = vmatprep.mubr.bf16.mxu1 %v2381_v41 }
 0x28a   : > { %v4928_v57 = vadd.f32 %v1625_v55, %v6509_v12  ;;  %v4992_v58 = vadd.f32 %v2011_v56, %v6513_v3  ;;  %v1627_v59 = vpop.f32.mrb[7].mxu0  ;;  %v2013_v60 = vpop.f32.mrb[7].mxu1  ;;  %3117 = vmatmul.mubr.bf16.vlgmr.msra.gmra.mrb[64].mxu0 %v2380_v39  ;;  %3503 = vmatmul.mubr.bf16.vlgmr.msra.gmra.mrb[64].mxu1 %v2380_v39  ;;  %v2164_v2 = vmax.f32 %v4926_v47, 0.0  ;;  %v2166_v4 = vmax.f32 %v4990_v48, 0.0  ;;  %v5645_v47 = vld [vmem:[%s6214_s18 + $0x1d0] ss:$12 sps:$4 sm:$0xff]  }
 0x28b   : > { %v4929_v61 = vadd.f32 %v1627_v59, %v6517_v13  ;;  %v4993_v62 = vadd.f32 %v2013_v60, %v6519_v14  ;;  %4811 = vmatpush3.bf16.msra.mxu1 %v5621_v45  ;;  %3278 = vmatpush1.bf16.msra.mxu0 %v5622_v46  ;;  %v2165_v15 = vmax.f32 %v4927_v53, 0.0  ;;  %v2167_v16 = vmax.f32 %v4991_v54, 0.0  ;;  %v5633_v45 = vld [vmem:[%s6214_s18 + $0x1c8] ss:$12 sps:$4 sm:$0xff]   ;;  %v5640_v46 = vld [vmem:[%s6214_s18 + $0x1e4] ss:$12 sps:$4 sm:$0xff]  }
 0x28c   : > { %v2168_v5 = vmax.f32 %v4928_v57, 0.0  ;;  %v2170_v9 = vmax.f32 %v4992_v58, 0.0  ;;  %3279 = vmatprep.subr.bf16.mxu0 %v5627_v51  ;;  %4812 = vmatprep.subr.bf16.mxu1 %v5628_v52  ;;  %v5652_v52 = vld [vmem:[%s6214_s18 + $0x2a8] ss:$12 sps:$4 sm:$0xff]  }
 0x28d   : > { %v2169_v17 = vmax.f32 %v4929_v61, 0.0  ;;  %v2171_v18 = vmax.f32 %v4993_v62, 0.0 }
 0x28e   : > { %v2384_v19 = vpack.c.bf16 %v2168_v5, %v2164_v2  ;;  %v6549_v20 = vpack.c.bf16 %v2170_v9, %v2166_v4  ;;  %v5643_v9 = vld [vmem:[%s6214_s18 + $0x1fc] ss:$12 sps:$4 sm:$0xff]  }
 0x28f   : > { %v2385_v21 = vpack.c.bf16 %v2169_v17, %v2165_v15  ;;  %v6551_v22 = vpack.c.bf16 %v2171_v18, %v2167_v16  ;;  %v1631_v23 = vpop.f32.mrb[8].mxu0  ;;  %v2017_v24 = vpop.f32.mrb[8].mxu1  ;;  %3280 = vmatpush1.bf16.msra.mxu0 %v5625_v63  ;;  %4813 = vmatpush3.bf16.msra.mxu1 %v5629_v0  ;;  %v5638_v63 = vld [vmem:[%s6214_s18 + $0x1e0] ss:$12 sps:$4 sm:$0xff]   ;;  %v5653_v0 = vld [vmem:[%s6214_s18 + $0x1e8] ss:$12 sps:$4 sm:$0xff]  }
 0x290   : > { %v4930_v27 = vadd.f32 %v1631_v23, %v6509_v12  ;;  %v4994_v28 = vadd.f32 %v2017_v24, %v6513_v3  ;;  %v1633_v29 = vpop.f32.mrb[9].mxu0  ;;  %v2019_v30 = vpop.f32.mrb[9].mxu1  ;;  %3281 = vmatprep.subr.bf16.mxu0 %v5632_v1  ;;  %4814 = vmatprep.subr.bf16.mxu1 %v5636_v11  ;;  %v5660_v11 = vld [vmem:[%s6214_s18 + $0x2c0] ss:$12 sps:$4 sm:$0xff]  }
 0x291   : > { %v4931_v33 = vadd.f32 %v1633_v29, %v6517_v13  ;;  %v4995_v34 = vadd.f32 %v2019_v30, %v6519_v14  ;;  %v1635_v35 = vpop.f32.mrb[10].mxu0  ;;  %v2021_v36 = vpop.f32.mrb[10].mxu1  ;;  %3126 = vmatprep.mubr.bf16.mxu0 %v2385_v21  ;;  %3510 = vmatprep.mubr.bf16.mxu1 %v2385_v21  ;;  %v5661_v29 = vld [vmem:[%s6214_s18 + $0x200] ss:$12 sps:$4 sm:$0xff]  }
 0x292   : > { %v4932_v37 = vadd.f32 %v1635_v35, %v6509_v12  ;;  %v4996_v38 = vadd.f32 %v2021_v36, %v6513_v3  ;;  %v1637_v39 = vpop.f32.mrb[11].mxu0  ;;  %v2023_v41 = vpop.f32.mrb[11].mxu1  ;;  %3127 = vmatmul.mubr.bf16.gmra.mrb[68].mxu0 %v2384_v19  ;;  %3511 = vmatmul.mubr.bf16.gmra.mrb[68].mxu1 %v2384_v19  ;;  %v2172_v48 = vmax.f32 %v4930_v27, 0.0  ;;  %v2174_v49 = vmax.f32 %v4994_v28, 0.0  ;;  %v5641_v27 = vld [vmem:[%s6214_s18 + $0x1f8] ss:$12 sps:$4 sm:$0xff]  }
 0x293   : > { %v4933_v43 = vadd.f32 %v1637_v39, %v6517_v13  ;;  %v4997_v44 = vadd.f32 %v2023_v41, %v6519_v14  ;;  %3282 = vmatpush1.bf16.msra.mxu0 %v5630_v25  ;;  %4815 = vmatpush3.bf16.msra.mxu1 %v5637_v26  ;;  %v2173_v53 = vmax.f32 %v4931_v33, 0.0  ;;  %v2175_v54 = vmax.f32 %v4995_v34, 0.0  ;;  %v5648_v28 = vld [vmem:[%s6214_s18 + $0x214] ss:$12 sps:$4 sm:$0xff]   ;;  %v5668_v34 = vld [vmem:[%s6214_s18 + $0x2d8] ss:$12 sps:$4 sm:$0xff]  }
 0x294   : > { %v2176_v50 = vmax.f32 %v4932_v37, 0.0  ;;  %v2178_v51 = vmax.f32 %v4996_v38, 0.0  ;;  %3283 = vmatprep.subr.bf16.mxu0 %v5635_v31  ;;  %4816 = vmatprep.subr.bf16.mxu1 %v5644_v32 }
 0x295   : > { %v2177_v55 = vmax.f32 %v4933_v43, 0.0  ;;  %v2179_v56 = vmax.f32 %v4997_v44, 0.0 }
 0x296   : > { %v2388_v57 = vpack.c.bf16 %v2176_v50, %v2172_v48  ;;  %v6569_v58 = vpack.c.bf16 %v2178_v51, %v2174_v49  ;;  %v5669_v48 = vld [vmem:[%s6214_s18 + $0x218] ss:$12 sps:$4 sm:$0xff]  }
 0x297   : > { %v2389_v59 = vpack.c.bf16 %v2177_v55, %v2173_v53  ;;  %v6571_v60 = vpack.c.bf16 %v2179_v56, %v2175_v54  ;;  %v1641_v61 = vpop.f32.mrb[12].mxu0  ;;  %v2027_v62 = vpop.f32.mrb[12].mxu1  ;;  %3284 = vmatpush1.bf16.msra.mxu0 %v5633_v45  ;;  %4817 = vmatpush3.bf16.msra.mxu1 %v5645_v47  ;;  %v5646_v47 = vld [vmem:[%s6214_s18 + $0x210] ss:$12 sps:$4 sm:$0xff]   ;;  %v5651_v53 = vld [vmem:[%s6214_s18 + $0x22c] ss:$12 sps:$4 sm:$0xff]  }
 0x298   : > { %v4934_v1 = vadd.f32 %v1641_v61, %v6509_v12  ;;  %v4998_v2 = vadd.f32 %v2027_v62, %v6513_v3  ;;  %v1643_v4 = vpop.f32.mrb[13].mxu0  ;;  %v2029_v5 = vpop.f32.mrb[13].mxu1  ;;  %3285 = vmatprep.subr.bf16.mxu0 %v5640_v46  ;;  %4818 = vmatprep.subr.bf16.mxu1 %v5652_v52  ;;  %v5676_v54 = vld [vmem:[%s6214_s18 + $0x2f0] ss:$12 sps:$4 sm:$0xff]  }
 0x299   : > { %v4935_v15 = vadd.f32 %v1643_v4, %v6517_v13  ;;  %v4999_v16 = vadd.f32 %v2029_v5, %v6519_v14  ;;  %v1645_v17 = vpop.f32.mrb[14].mxu0  ;;  %v2031_v18 = vpop.f32.mrb[14].mxu1  ;;  %3136 = vmatprep.mubr.bf16.mxu0 %v2389_v59  ;;  %3518 = vmatprep.mubr.bf16.mxu1 %v2389_v59  ;;  %v5649_v4 = vld [vmem:[%s6214_s18 + $0x228] ss:$12 sps:$4 sm:$0xff]   ;;  %v5677_v5 = vld [vmem:[%s6214_s18 + $0x230] ss:$12 sps:$4 sm:$0xff]  }
 0x29a   : > { %v4936_v19 = vadd.f32 %v1645_v17, %v6509_v12  ;;  %v5000_v21 = vadd.f32 %v2031_v18, %v6513_v3  ;;  %v1647_v23 = vpop.f32.mrb[15].mxu0  ;;  %v2033_v24 = vpop.f32.mrb[15].mxu1  ;;  %3137 = vmatmul.mubr.bf16.gmra.mrb[72].mxu0 %v2388_v57  ;;  %3519 = vmatmul.mubr.bf16.gmra.mrb[72].mxu1 %v2388_v57  ;;  %v2180_v30 = vmax.f32 %v4934_v1, 0.0  ;;  %v2182_v31 = vmax.f32 %v4998_v2, 0.0  ;;  %v5656_v17 = vld [vmem:[%s6214_s18 + $0x244] ss:$12 sps:$4 sm:$0xff]  }
 0x29b   : > { %v4937_v25 = vadd.f32 %v1647_v23, %v6517_v13  ;;  %v5001_v26 = vadd.f32 %v2033_v24, %v6519_v14  ;;  %3286 = vmatpush1.bf16.msra.mxu0 %v5638_v63  ;;  %4819 = vmatpush3.bf16.msra.mxu1 %v5653_v0  ;;  %v2181_v35 = vmax.f32 %v4935_v15, 0.0  ;;  %v2183_v36 = vmax.f32 %v4999_v16, 0.0 }
 0x29c   : > { %v2184_v32 = vmax.f32 %v4936_v19, 0.0  ;;  %v2186_v33 = vmax.f32 %v5000_v21, 0.0  ;;  %3287 = vmatprep.subr.bf16.mxu0 %v5643_v9  ;;  %4820 = vmatprep.subr.bf16.mxu1 %v5660_v11 }
 0x29d   : > { %v2185_v37 = vmax.f32 %v4937_v25, 0.0  ;;  %v2187_v38 = vmax.f32 %v5001_v26, 0.0 }
 0x29e   : > { %v2392_v39 = vpack.c.bf16 %v2184_v32, %v2180_v30  ;;  %v6589_v41 = vpack.c.bf16 %v2186_v33, %v2182_v31  ;;  %v5654_v30 = vld [vmem:[%s6214_s18 + $0x240] ss:$12 sps:$4 sm:$0xff]  }
 0x29f   : > { %v2393_v43 = vpack.c.bf16 %v2185_v37, %v2181_v35  ;;  %v6591_v44 = vpack.c.bf16 %v2187_v38, %v2183_v36  ;;  %v1651_v45 = vpop.f32.mrb[16].mxu0  ;;  %v2037_v46 = vpop.f32.mrb[16].mxu1  ;;  %3288 = vmatpush1.bf16.msra.mxu0 %v5641_v27  ;;  %4821 = vmatpush3.bf16.msra.mxu1 %v5661_v29  ;;  %v5659_v35 = vld [vmem:[%s6214_s18 + $0x25c] ss:$12 sps:$4 sm:$0xff]  }
 0x2a0   : > { %v4938_v49 = vadd.f32 %v1651_v45, %v6509_v12  ;;  %v5002_v50 = vadd.f32 %v2037_v46, %v6513_v3  ;;  %v1653_v51 = vpop.f32.mrb[17].mxu0  ;;  %v2039_v52 = vpop.f32.mrb[17].mxu1  ;;  %3289 = vmatprep.subr.bf16.mxu0 %v5648_v28  ;;  %4822 = vmatprep.subr.bf16.mxu1 %v5668_v34 }
 0x2a1   : > { %v4939_v55 = vadd.f32 %v1653_v51, %v6517_v13  ;;  %v5003_v56 = vadd.f32 %v2039_v52, %v6519_v14  ;;  %v1655_v57 = vpop.f32.mrb[18].mxu0  ;;  %v2041_v59 = vpop.f32.mrb[18].mxu1  ;;  %3146 = vmatprep.mubr.bf16.mxu0 %v2393_v43  ;;  %3526 = vmatprep.mubr.bf16.mxu1 %v2393_v43 }
 0x2a2   : > { %v4940_v61 = vadd.f32 %v1655_v57, %v6509_v12  ;;  %v5004_v62 = vadd.f32 %v2041_v59, %v6513_v3  ;;  %v1657_v63 = vpop.f32.mrb[19].mxu0  ;;  %v2043_v0 = vpop.f32.mrb[19].mxu1  ;;  %3147 = vmatmul.mubr.bf16.gmra.mrb[76].mxu0 %v2392_v39  ;;  %3527 = vmatmul.mubr.bf16.gmra.mrb[76].mxu1 %v2392_v39  ;;  %v2188_v9 = vmax.f32 %v4938_v49, 0.0  ;;  %v2190_v11 = vmax.f32 %v5002_v50, 0.0  ;;  %v5657_v50 = vld [vmem:[%s6214_s18 + $0x258] ss:$12 sps:$4 sm:$0xff]  }
 0x2a3   : > { %v4941_v1 = vadd.f32 %v1657_v63, %v6517_v13  ;;  %v5005_v2 = vadd.f32 %v2043_v0, %v6519_v14  ;;  %3290 = vmatpush1.bf16.msra.mxu0 %v5646_v47  ;;  %4823 = vmatpush3.bf16.msra.mxu1 %v5669_v48  ;;  %v2189_v18 = vmax.f32 %v4939_v55, 0.0  ;;  %v2191_v19 = vmax.f32 %v5003_v56, 0.0  ;;  %v5664_v55 = vld [vmem:[%s6214_s18 + $0x274] ss:$12 sps:$4 sm:$0xff]  }
 0x2a4   : > { %v2192_v15 = vmax.f32 %v4940_v61, 0.0  ;;  %v2194_v16 = vmax.f32 %v5004_v62, 0.0  ;;  %3291 = vmatprep.subr.bf16.mxu0 %v5651_v53  ;;  %4824 = vmatprep.subr.bf16.mxu1 %v5676_v54 }
 0x2a5   : > { %v2193_v21 = vmax.f32 %v4941_v1, 0.0  ;;  %v2195_v23 = vmax.f32 %v5005_v2, 0.0 }
 0x2a6   : > { %v2396_v24 = vpack.c.bf16 %v2192_v15, %v2188_v9  ;;  %v6608_v25 = vpack.c.bf16 %v2194_v16, %v2190_v11 }
 0x2a7   : > { %v2397_v26 = vpack.c.bf16 %v2193_v21, %v2189_v18  ;;  %v6610_v27 = vpack.c.bf16 %v2195_v23, %v2191_v19  ;;  %v1661_v28 = vpop.f32.mrb[20].mxu0  ;;  %v2047_v29 = vpop.f32.mrb[20].mxu1  ;;  %3292 = vmatpush1.bf16.msra.mxu0 %v5649_v4  ;;  %4825 = vmatpush3.bf16.msra.mxu1 %v5677_v5  ;;  %v5662_v5 = vld [vmem:[%s6214_s18 + $0x270] ss:$12 sps:$4 sm:$0xff]  }
 0x2a8   : > { %v4942_v31 = vadd.f32 %v1661_v28, %v6509_v12  ;;  %v5006_v32 = vadd.f32 %v2047_v29, %v6513_v3  ;;  %v1663_v33 = vpop.f32.mrb[21].mxu0  ;;  %v2049_v34 = vpop.f32.mrb[21].mxu1  ;;  %3293 = vmatprep.subr.bf16.mxu0 %v5656_v17  ;;  %v5667_v17 = vld [vmem:[%s6214_s18 + $0x28c] ss:$12 sps:$4 sm:$0xff]  }
 0x2a9   : > { %v4943_v36 = vadd.f32 %v1663_v33, %v6517_v13  ;;  %v5007_v37 = vadd.f32 %v2049_v34, %v6519_v14  ;;  %v1665_v38 = vpop.f32.mrb[22].mxu0  ;;  %v2051_v39 = vpop.f32.mrb[22].mxu1  ;;  %3156 = vmatprep.mubr.bf16.mxu0 %v2397_v26  ;;  %3534 = vmatprep.mubr.bf16.mxu1 %v2397_v26 }
 0x2aa   : > { %v4944_v43 = vadd.f32 %v1665_v38, %v6509_v12  ;;  %v5008_v45 = vadd.f32 %v2051_v39, %v6513_v3  ;;  %v1667_v46 = vpop.f32.mrb[23].mxu0  ;;  %v2053_v47 = vpop.f32.mrb[23].mxu1  ;;  %3157 = vmatmul.mubr.bf16.gmra.mrb[80].mxu0 %v2396_v24  ;;  %3535 = vmatmul.mubr.bf16.gmra.mrb[80].mxu1 %v2396_v24  ;;  %v2196_v51 = vmax.f32 %v4942_v31, 0.0  ;;  %v2198_v52 = vmax.f32 %v5006_v32, 0.0  ;;  %v5665_v32 = vld [vmem:[%s6214_s18 + $0x288] ss:$12 sps:$4 sm:$0xff]  }
 0x2ab   : > { %v4945_v48 = vadd.f32 %v1667_v46, %v6517_v13  ;;  %v5009_v49 = vadd.f32 %v2053_v47, %v6519_v14  ;;  %3294 = vmatpush1.bf16.msra.mxu0 %v5654_v30  ;;  %v2197_v56 = vmax.f32 %v4943_v36, 0.0  ;;  %v2199_v57 = vmax.f32 %v5007_v37, 0.0  ;;  %v5672_v37 = vld [vmem:[%s6214_s18 + $0x2a4] ss:$12 sps:$4 sm:$0xff]  }
 0x2ac   : > { %v2200_v53 = vmax.f32 %v4944_v43, 0.0  ;;  %v2202_v54 = vmax.f32 %v5008_v45, 0.0  ;;  %3295 = vmatprep.subr.bf16.mxu0 %v5659_v35 }
 0x2ad   : > { %v2201_v59 = vmax.f32 %v4945_v48, 0.0  ;;  %v2203_v61 = vmax.f32 %v5009_v49, 0.0 }
 0x2ae   : > { %v2400_v62 = vpack.c.bf16 %v2200_v53, %v2196_v51  ;;  %v6624_v63 = vpack.c.bf16 %v2202_v54, %v2198_v52  ;;  %v5670_v52 = vld [vmem:[%s6214_s18 + $0x2a0] ss:$12 sps:$4 sm:$0xff]  }
 0x2af   : > { %v2401_v0 = vpack.c.bf16 %v2201_v59, %v2197_v56  ;;  %v6626_v1 = vpack.c.bf16 %v2203_v61, %v2199_v57  ;;  %v1671_v2 = vpop.f32.mrb[24].mxu0  ;;  %v2057_v4 = vpop.f32.mrb[24].mxu1  ;;  %3296 = vmatpush1.bf16.msra.mxu0 %v5657_v50  ;;  %v5675_v57 = vld [vmem:[%s6214_s18 + $0x2bc] ss:$12 sps:$4 sm:$0xff]  }
 0x2b0   : > { %v4946_v9 = vadd.f32 %v1671_v2, %v6509_v12  ;;  %v5010_v11 = vadd.f32 %v2057_v4, %v6513_v3  ;;  %v1673_v15 = vpop.f32.mrb[25].mxu0  ;;  %v2059_v16 = vpop.f32.mrb[25].mxu1  ;;  %3297 = vmatprep.subr.bf16.mxu0 %v5664_v55 }
 0x2b1   : > { %v4947_v18 = vadd.f32 %v1673_v15, %v6517_v13  ;;  %v5011_v19 = vadd.f32 %v2059_v16, %v6519_v14  ;;  %v1675_v21 = vpop.f32.mrb[26].mxu0  ;;  %v2061_v23 = vpop.f32.mrb[26].mxu1  ;;  %3166 = vmatprep.mubr.bf16.mxu0 %v2401_v0  ;;  %3542 = vmatprep.mubr.bf16.mxu1 %v2401_v0  ;;  %v5673_v16 = vld [vmem:[%s6214_s18 + $0x2b8] ss:$12 sps:$4 sm:$0xff]  }
 0x2b2   : > { %v4948_v24 = vadd.f32 %v1675_v21, %v6509_v12  ;;  %v5012_v26 = vadd.f32 %v2061_v23, %v6513_v3  ;;  %v1677_v28 = vpop.f32.mrb[27].mxu0  ;;  %v2063_v29 = vpop.f32.mrb[27].mxu1  ;;  %3167 = vmatmul.mubr.bf16.gmra.mrb[84].mxu0 %v2400_v62  ;;  %3543 = vmatmul.mubr.bf16.gmra.mrb[84].mxu1 %v2400_v62  ;;  %v2204_v33 = vmax.f32 %v4946_v9, 0.0  ;;  %v2206_v34 = vmax.f32 %v5010_v11, 0.0  ;;  %v5680_v23 = vld [vmem:[%s6214_s18 + $0x2d4] ss:$12 sps:$4 sm:$0xff]  }
 0x2b3   : > { %v4949_v30 = vadd.f32 %v1677_v28, %v6517_v13  ;;  %v5013_v31 = vadd.f32 %v2063_v29, %v6519_v14  ;;  %3298 = vmatpush1.bf16.msra.mxu0 %v5662_v5  ;;  %v2205_v38 = vmax.f32 %v4947_v18, 0.0  ;;  %v2207_v39 = vmax.f32 %v5011_v19, 0.0 }
 0x2b4   : > { %v2208_v35 = vmax.f32 %v4948_v24, 0.0  ;;  %v2210_v36 = vmax.f32 %v5012_v26, 0.0  ;;  %3299 = vmatprep.subr.bf16.mxu0 %v5667_v17 }
 0x2b5   : > { %v2209_v43 = vmax.f32 %v4949_v30, 0.0  ;;  %v2211_v45 = vmax.f32 %v5013_v31, 0.0 }
 0x2b6   : > { %v2404_v46 = vpack.c.bf16 %v2208_v35, %v2204_v33  ;;  %v6640_v47 = vpack.c.bf16 %v2210_v36, %v2206_v34  ;;  %v5678_v36 = vld [vmem:[%s6214_s18 + $0x2d0] ss:$12 sps:$4 sm:$0xff]  }
 0x2b7   : > { %v2405_v48 = vpack.c.bf16 %v2209_v43, %v2205_v38  ;;  %v6642_v49 = vpack.c.bf16 %v2211_v45, %v2207_v39  ;;  %v1681_v50 = vpop.f32.mrb[28].mxu0  ;;  %v2067_v51 = vpop.f32.mrb[28].mxu1  ;;  %3300 = vmatpush1.bf16.msra.mxu0 %v5665_v32  ;;  %v5683_v45 = vld [vmem:[%s6214_s18 + $0x2ec] ss:$12 sps:$4 sm:$0xff]  }
 0x2b8   : > { %v4950_v53 = vadd.f32 %v1681_v50, %v6509_v12  ;;  %v5014_v54 = vadd.f32 %v2067_v51, %v6513_v3  ;;  %v1683_v55 = vpop.f32.mrb[29].mxu0  ;;  %v2069_v56 = vpop.f32.mrb[29].mxu1  ;;  %3301 = vmatprep.subr.bf16.mxu0 %v5672_v37 }
 0x2b9   : > { %v4951_v59 = vadd.f32 %v1683_v55, %v6517_v13  ;;  %v5015_v61 = vadd.f32 %v2069_v56, %v6519_v14  ;;  %v1685_v62 = vpop.f32.mrb[30].mxu0  ;;  %v2071_v0 = vpop.f32.mrb[30].mxu1  ;;  %3176 = vmatprep.mubr.bf16.mxu0 %v2405_v48  ;;  %3550 = vmatprep.mubr.bf16.mxu1 %v2405_v48 }
 0x2ba   : > { %v4952_v2 = vadd.f32 %v1685_v62, %v6509_v12  ;;  %v5016_v4 = vadd.f32 %v2071_v0, %v6513_v3  ;;  %v1687_v5 = vpop.f32.mrb[31].mxu0  ;;  %v2073_v9 = vpop.f32.mrb[31].mxu1  ;;  %3177 = vmatmul.mubr.bf16.gmra.mrb[88].mxu0 %v2404_v46  ;;  %3551 = vmatmul.mubr.bf16.gmra.mrb[88].mxu1 %v2404_v46  ;;  %v2212_v17 = vmax.f32 %v4950_v53, 0.0  ;;  %v2214_v18 = vmax.f32 %v5014_v54, 0.0 }
 0x2bb   : > { %v4953_v11 = vadd.f32 %v1687_v5, %v6517_v13  ;;  %v5017_v15 = vadd.f32 %v2073_v9, %v6519_v14  ;;  %3302 = vmatpush1.bf16.msra.mxu0 %v5670_v52  ;;  %v2213_v24 = vmax.f32 %v4951_v59, 0.0  ;;  %v2215_v26 = vmax.f32 %v5015_v61, 0.0  ;;  %v5681_v59 = vld [vmem:[%s6214_s18 + $0x2e8] ss:$12 sps:$4 sm:$0xff]  }
 0x2bc   : > { %v2216_v19 = vmax.f32 %v4952_v2, 0.0  ;;  %v2218_v21 = vmax.f32 %v5016_v4, 0.0  ;;  %3303 = vmatprep.subr.bf16.mxu0 %v5675_v57 }
 0x2bd   : > { %v2217_v28 = vmax.f32 %v4953_v11, 0.0  ;;  %v2219_v29 = vmax.f32 %v5017_v15, 0.0 }
 0x2be   : > { %v2408_v30 = vpack.c.bf16 %v2216_v19, %v2212_v17  ;;  %v6656_v31 = vpack.c.bf16 %v2218_v21, %v2214_v18 }
 0x2bf   : > { %v2409_v32 = vpack.c.bf16 %v2217_v28, %v2213_v24  ;;  %v6658_v33 = vpack.c.bf16 %v2219_v29, %v2215_v26  ;;  %v1691_v34 = vpop.f32.mrb[32].mxu0  ;;  %v2077_v35 = vpop.f32.mrb[32].mxu1  ;;  %3304 = vmatpush1.bf16.msra.mxu0 %v5673_v16 }
 0x2c0   : > { %v4954_v37 = vadd.f32 %v1691_v34, %v6509_v12  ;;  %v5018_v38 = vadd.f32 %v2077_v35, %v6513_v3  ;;  %v1693_v39 = vpop.f32.mrb[33].mxu0  ;;  %v2079_v43 = vpop.f32.mrb[33].mxu1  ;;  %3305 = vmatprep.subr.bf16.mxu0 %v5680_v23 }
 0x2c1   : > { %v4955_v46 = vadd.f32 %v1693_v39, %v6517_v13  ;;  %v5019_v48 = vadd.f32 %v2079_v43, %v6519_v14  ;;  %v1695_v50 = vpop.f32.mrb[34].mxu0  ;;  %v2081_v51 = vpop.f32.mrb[34].mxu1  ;;  %3186 = vmatprep.mubr.bf16.mxu0 %v2409_v32  ;;  %3558 = vmatprep.mubr.bf16.mxu1 %v2409_v32 }
 0x2c2   : > { %v4956_v52 = vadd.f32 %v1695_v50, %v6509_v12  ;;  %v5020_v53 = vadd.f32 %v2081_v51, %v6513_v3  ;;  %v1697_v54 = vpop.f32.mrb[35].mxu0  ;;  %v2083_v55 = vpop.f32.mrb[35].mxu1  ;;  %3187 = vmatmul.mubr.bf16.gmra.mrb[92].mxu0 %v2408_v30  ;;  %3559 = vmatmul.mubr.bf16.gmra.mrb[92].mxu1 %v2408_v30  ;;  %v2220_v61 = vmax.f32 %v4954_v37, 0.0  ;;  %v2222_v62 = vmax.f32 %v5018_v38, 0.0 }
 0x2c3   : > { %v4957_v56 = vadd.f32 %v1697_v54, %v6517_v13  ;;  %v5021_v57 = vadd.f32 %v2083_v55, %v6519_v14  ;;  %3306 = vmatpush1.bf16.msra.mxu0 %v5678_v36  ;;  %v2221_v4 = vmax.f32 %v4955_v46, 0.0  ;;  %v2223_v5 = vmax.f32 %v5019_v48, 0.0 }
 0x2c4   : > { %v2224_v0 = vmax.f32 %v4956_v52, 0.0  ;;  %v2226_v2 = vmax.f32 %v5020_v53, 0.0  ;;  %3307 = vmatprep.subr.bf16.mxu0 %v5683_v45 }
 0x2c5   : > { %v2225_v9 = vmax.f32 %v4957_v56, 0.0  ;;  %v2227_v11 = vmax.f32 %v5021_v57, 0.0 }
 0x2c6   : > { %v2412_v15 = vpack.c.bf16 %v2224_v0, %v2220_v61  ;;  %v6671_v16 = vpack.c.bf16 %v2226_v2, %v2222_v62 }
 0x2c7   : > { %v2413_v17 = vpack.c.bf16 %v2225_v9, %v2221_v4  ;;  %v6673_v18 = vpack.c.bf16 %v2227_v11, %v2223_v5  ;;  %v1701_v19 = vpop.f32.mrb[36].mxu0  ;;  %v2087_v21 = vpop.f32.mrb[36].mxu1  ;;  %3308 = vmatpush1.bf16.msra.mxu0 %v5681_v59 }
 0x2c8   : > { %v4958_v23 = vadd.f32 %v1701_v19, %v6509_v12  ;;  %v5022_v24 = vadd.f32 %v2087_v21, %v6513_v3  ;;  %v1703_v26 = vpop.f32.mrb[37].mxu0  ;;  %v2089_v28 = vpop.f32.mrb[37].mxu1 }
 0x2c9   : > { %v4959_v29 = vadd.f32 %v1703_v26, %v6517_v13  ;;  %v5023_v30 = vadd.f32 %v2089_v28, %v6519_v14  ;;  %v1705_v32 = vpop.f32.mrb[38].mxu0  ;;  %v2091_v34 = vpop.f32.mrb[38].mxu1  ;;  %3196 = vmatprep.mubr.bf16.mxu0 %v2413_v17  ;;  %3566 = vmatprep.mubr.bf16.mxu1 %v2413_v17 }
 0x2ca   : > { %v4960_v35 = vadd.f32 %v1705_v32, %v6509_v12  ;;  %v5024_v36 = vadd.f32 %v2091_v34, %v6513_v3  ;;  %v1707_v37 = vpop.f32.mrb[39].mxu0  ;;  %v2093_v38 = vpop.f32.mrb[39].mxu1  ;;  %3197 = vmatmul.mubr.bf16.gmra.mrb[96].mxu0 %v2412_v15  ;;  %3567 = vmatmul.mubr.bf16.gmra.mrb[96].mxu1 %v2412_v15  ;;  %v2228_v45 = vmax.f32 %v4958_v23, 0.0  ;;  %v2230_v46 = vmax.f32 %v5022_v24, 0.0 }
 0x2cb   : > { %v4961_v39 = vadd.f32 %v1707_v37, %v6517_v13  ;;  %v5025_v43 = vadd.f32 %v2093_v38, %v6519_v14  ;;  %v2229_v51 = vmax.f32 %v4959_v29, 0.0  ;;  %v2231_v52 = vmax.f32 %v5023_v30, 0.0 }
 0x2cc   : > { %v2232_v48 = vmax.f32 %v4960_v35, 0.0  ;;  %v2234_v50 = vmax.f32 %v5024_v36, 0.0 }
 0x2cd   : > { %v2233_v53 = vmax.f32 %v4961_v39, 0.0  ;;  %v2235_v54 = vmax.f32 %v5025_v43, 0.0 }
 0x2ce   : > { %v2416_v55 = vpack.c.bf16 %v2232_v48, %v2228_v45  ;;  %v6683_v56 = vpack.c.bf16 %v2234_v50, %v2230_v46 }
 0x2cf   : > { %v2417_v57 = vpack.c.bf16 %v2233_v53, %v2229_v51  ;;  %v6685_v59 = vpack.c.bf16 %v2235_v54, %v2231_v52  ;;  %v1711_v61 = vpop.f32.mrb[40].mxu0  ;;  %v2097_v62 = vpop.f32.mrb[40].mxu1 }
 0x2d0   : > { %v4962_v0 = vadd.f32 %v1711_v61, %v6509_v12  ;;  %v5026_v2 = vadd.f32 %v2097_v62, %v6513_v3  ;;  %v1713_v4 = vpop.f32.mrb[41].mxu0  ;;  %v2099_v5 = vpop.f32.mrb[41].mxu1 }
 0x2d1   : > { %v4963_v9 = vadd.f32 %v1713_v4, %v6517_v13  ;;  %v5027_v11 = vadd.f32 %v2099_v5, %v6519_v14  ;;  %v1715_v15 = vpop.f32.mrb[42].mxu0  ;;  %v2101_v17 = vpop.f32.mrb[42].mxu1  ;;  %3206 = vmatprep.mubr.bf16.mxu0 %v2417_v57  ;;  %3574 = vmatprep.mubr.bf16.mxu1 %v2417_v57 }
 0x2d2   : > { %v4964_v19 = vadd.f32 %v1715_v15, %v6509_v12  ;;  %v5028_v21 = vadd.f32 %v2101_v17, %v6513_v3  ;;  %v1717_v23 = vpop.f32.mrb[43].mxu0  ;;  %v2103_v24 = vpop.f32.mrb[43].mxu1  ;;  %3207 = vmatmul.mubr.bf16.gmra.mrb[100].mxu0 %v2416_v55  ;;  %3575 = vmatmul.mubr.bf16.gmra.mrb[100].mxu1 %v2416_v55  ;;  %v2236_v29 = vmax.f32 %v4962_v0, 0.0  ;;  %v2238_v30 = vmax.f32 %v5026_v2, 0.0 }
 0x2d3   : > { %v4965_v26 = vadd.f32 %v1717_v23, %v6517_v13  ;;  %v5029_v28 = vadd.f32 %v2103_v24, %v6519_v14  ;;  %v2237_v35 = vmax.f32 %v4963_v9, 0.0  ;;  %v2239_v36 = vmax.f32 %v5027_v11, 0.0 }
 0x2d4   : > { %v2240_v32 = vmax.f32 %v4964_v19, 0.0  ;;  %v2242_v34 = vmax.f32 %v5028_v21, 0.0 }
 0x2d5   : > { %v2241_v37 = vmax.f32 %v4965_v26, 0.0  ;;  %v2243_v38 = vmax.f32 %v5029_v28, 0.0 }
 0x2d6   : > { %v2420_v39 = vpack.c.bf16 %v2240_v32, %v2236_v29  ;;  %v6695_v43 = vpack.c.bf16 %v2242_v34, %v2238_v30 }
 0x2d7   : > { %v2421_v45 = vpack.c.bf16 %v2241_v37, %v2237_v35  ;;  %v6697_v46 = vpack.c.bf16 %v2243_v38, %v2239_v36  ;;  %v1721_v48 = vpop.f32.mrb[44].mxu0  ;;  %v2107_v50 = vpop.f32.mrb[44].mxu1 }
 0x2d8   : > { %v4966_v51 = vadd.f32 %v1721_v48, %v6509_v12  ;;  %v5030_v52 = vadd.f32 %v2107_v50, %v6513_v3  ;;  %v1723_v53 = vpop.f32.mrb[45].mxu0  ;;  %v2109_v54 = vpop.f32.mrb[45].mxu1 }
 0x2d9   : > { %v4967_v55 = vadd.f32 %v1723_v53, %v6517_v13  ;;  %v5031_v57 = vadd.f32 %v2109_v54, %v6519_v14  ;;  %v1725_v61 = vpop.f32.mrb[46].mxu0  ;;  %v2111_v62 = vpop.f32.mrb[46].mxu1  ;;  %3216 = vmatprep.mubr.bf16.mxu0 %v2421_v45  ;;  %3582 = vmatprep.mubr.bf16.mxu1 %v2421_v45 }
 0x2da   : > { %v4968_v0 = vadd.f32 %v1725_v61, %v6509_v12  ;;  %v5032_v2 = vadd.f32 %v2111_v62, %v6513_v3  ;;  %v1727_v4 = vpop.f32.mrb[47].mxu0  ;;  %v2113_v5 = vpop.f32.mrb[47].mxu1  ;;  %3217 = vmatmul.mubr.bf16.gmra.mrb[104].mxu0 %v2420_v39  ;;  %3583 = vmatmul.mubr.bf16.gmra.mrb[104].mxu1 %v2420_v39  ;;  %v2244_v15 = vmax.f32 %v4966_v51, 0.0  ;;  %v2246_v17 = vmax.f32 %v5030_v52, 0.0 }
 0x2db   : > { %v4969_v9 = vadd.f32 %v1727_v4, %v6517_v13  ;;  %v5033_v11 = vadd.f32 %v2113_v5, %v6519_v14  ;;  %v2245_v23 = vmax.f32 %v4967_v55, 0.0  ;;  %v2247_v24 = vmax.f32 %v5031_v57, 0.0 }
 0x2dc   : > { %v2248_v19 = vmax.f32 %v4968_v0, 0.0  ;;  %v2250_v21 = vmax.f32 %v5032_v2, 0.0 }
 0x2dd   : > { %v2249_v26 = vmax.f32 %v4969_v9, 0.0  ;;  %v2251_v28 = vmax.f32 %v5033_v11, 0.0 }
 0x2de   : > { %v2424_v29 = vpack.c.bf16 %v2248_v19, %v2244_v15  ;;  %v6707_v30 = vpack.c.bf16 %v2250_v21, %v2246_v17 }
 0x2df   : > { %v2425_v32 = vpack.c.bf16 %v2249_v26, %v2245_v23  ;;  %v6709_v34 = vpack.c.bf16 %v2251_v28, %v2247_v24  ;;  %v1731_v35 = vpop.f32.mrb[48].mxu0  ;;  %v2117_v36 = vpop.f32.mrb[48].mxu1 }
 0x2e0   : > { %v4970_v37 = vadd.f32 %v1731_v35, %v6509_v12  ;;  %v5034_v38 = vadd.f32 %v2117_v36, %v6513_v3  ;;  %v1733_v39 = vpop.f32.mrb[49].mxu0  ;;  %v2119_v45 = vpop.f32.mrb[49].mxu1 }
 0x2e1   : > { %v4971_v48 = vadd.f32 %v1733_v39, %v6517_v13  ;;  %v5035_v50 = vadd.f32 %v2119_v45, %v6519_v14  ;;  %v1735_v51 = vpop.f32.mrb[50].mxu0  ;;  %v2121_v52 = vpop.f32.mrb[50].mxu1  ;;  %3226 = vmatprep.mubr.bf16.mxu0 %v2425_v32  ;;  %3590 = vmatprep.mubr.bf16.mxu1 %v2425_v32 }
 0x2e2   : > { %v4972_v53 = vadd.f32 %v1735_v51, %v6509_v12  ;;  %v5036_v54 = vadd.f32 %v2121_v52, %v6513_v3  ;;  %v1737_v55 = vpop.f32.mrb[51].mxu0  ;;  %v2123_v57 = vpop.f32.mrb[51].mxu1  ;;  %3227 = vmatmul.mubr.bf16.gmra.mrb[108].mxu0 %v2424_v29  ;;  %3591 = vmatmul.mubr.bf16.gmra.mrb[108].mxu1 %v2424_v29  ;;  %v2252_v0 = vmax.f32 %v4970_v37, 0.0  ;;  %v2254_v2 = vmax.f32 %v5034_v38, 0.0 }
 0x2e3   : > { %v4973_v61 = vadd.f32 %v1737_v55, %v6517_v13  ;;  %v5037_v62 = vadd.f32 %v2123_v57, %v6519_v14  ;;  %v2253_v9 = vmax.f32 %v4971_v48, 0.0  ;;  %v2255_v11 = vmax.f32 %v5035_v50, 0.0 }
 0x2e4   : > { %v2256_v4 = vmax.f32 %v4972_v53, 0.0  ;;  %v2258_v5 = vmax.f32 %v5036_v54, 0.0 }
 0x2e5   : > { %v2257_v15 = vmax.f32 %v4973_v61, 0.0  ;;  %v2259_v17 = vmax.f32 %v5037_v62, 0.0 }
 0x2e6   : > { %v2428_v19 = vpack.c.bf16 %v2256_v4, %v2252_v0  ;;  %v6719_v21 = vpack.c.bf16 %v2258_v5, %v2254_v2 }
 0x2e7   : > { %v2429_v23 = vpack.c.bf16 %v2257_v15, %v2253_v9  ;;  %v6721_v24 = vpack.c.bf16 %v2259_v17, %v2255_v11  ;;  %v1741_v26 = vpop.f32.mrb[52].mxu0  ;;  %v2127_v28 = vpop.f32.mrb[52].mxu1 }
 0x2e8   : > { %v4974_v29 = vadd.f32 %v1741_v26, %v6509_v12  ;;  %v5038_v32 = vadd.f32 %v2127_v28, %v6513_v3  ;;  %v1743_v35 = vpop.f32.mrb[53].mxu0  ;;  %v2129_v36 = vpop.f32.mrb[53].mxu1 }
 0x2e9   : > { %v4975_v37 = vadd.f32 %v1743_v35, %v6517_v13  ;;  %v5039_v38 = vadd.f32 %v2129_v36, %v6519_v14  ;;  %v1745_v39 = vpop.f32.mrb[54].mxu0  ;;  %v2131_v45 = vpop.f32.mrb[54].mxu1  ;;  %3236 = vmatprep.mubr.bf16.mxu0 %v2429_v23  ;;  %3598 = vmatprep.mubr.bf16.mxu1 %v2429_v23 }
 0x2ea   : > { %v4976_v48 = vadd.f32 %v1745_v39, %v6509_v12  ;;  %v5040_v50 = vadd.f32 %v2131_v45, %v6513_v3  ;;  %v1747_v51 = vpop.f32.mrb[55].mxu0  ;;  %v2133_v52 = vpop.f32.mrb[55].mxu1  ;;  %3237 = vmatmul.mubr.bf16.gmra.mrb[112].mxu0 %v2428_v19  ;;  %3599 = vmatmul.mubr.bf16.gmra.mrb[112].mxu1 %v2428_v19  ;;  %v2260_v55 = vmax.f32 %v4974_v29, 0.0  ;;  %v2262_v57 = vmax.f32 %v5038_v32, 0.0 }
 0x2eb   : > { %v4977_v53 = vadd.f32 %v1747_v51, %v6517_v13  ;;  %v5041_v54 = vadd.f32 %v2133_v52, %v6519_v14  ;;  %v2261_v0 = vmax.f32 %v4975_v37, 0.0  ;;  %v2263_v2 = vmax.f32 %v5039_v38, 0.0 }
 0x2ec   : > { %v2264_v61 = vmax.f32 %v4976_v48, 0.0  ;;  %v2266_v62 = vmax.f32 %v5040_v50, 0.0 }
 0x2ed   : > { %v2265_v4 = vmax.f32 %v4977_v53, 0.0  ;;  %v2267_v5 = vmax.f32 %v5041_v54, 0.0 }
 0x2ee   : > { %v2432_v9 = vpack.c.bf16 %v2264_v61, %v2260_v55  ;;  %v6731_v11 = vpack.c.bf16 %v2266_v62, %v2262_v57 }
 0x2ef   : > { %v2433_v15 = vpack.c.bf16 %v2265_v4, %v2261_v0  ;;  %v6733_v17 = vpack.c.bf16 %v2267_v5, %v2263_v2  ;;  %v1751_v23 = vpop.f32.mrb[56].mxu0  ;;  %v2137_v19 = vpop.f32.mrb[56].mxu1 }
 0x2f0   : > { %v4978_v26 = vadd.f32 %v1751_v23, %v6509_v12  ;;  %v5042_v28 = vadd.f32 %v2137_v19, %v6513_v3  ;;  %v1753_v29 = vpop.f32.mrb[57].mxu0  ;;  %v2139_v32 = vpop.f32.mrb[57].mxu1 }
 0x2f1   : > { %v4979_v35 = vadd.f32 %v1753_v29, %v6517_v13  ;;  %v5043_v36 = vadd.f32 %v2139_v32, %v6519_v14  ;;  %v1755_v37 = vpop.f32.mrb[58].mxu0  ;;  %v2141_v38 = vpop.f32.mrb[58].mxu1  ;;  %3246 = vmatprep.mubr.bf16.mxu0 %v2433_v15  ;;  %3606 = vmatprep.mubr.bf16.mxu1 %v2433_v15 }
 0x2f2   : > { %v4980_v39 = vadd.f32 %v1755_v37, %v6509_v12  ;;  %v5044_v45 = vadd.f32 %v2141_v38, %v6513_v3  ;;  %v1757_v48 = vpop.f32.mrb[59].mxu0  ;;  %v2143_v50 = vpop.f32.mrb[59].mxu1  ;;  %3247 = vmatmul.mubr.bf16.gmra.mrb[116].mxu0 %v2432_v9  ;;  %3607 = vmatmul.mubr.bf16.gmra.mrb[116].mxu1 %v2432_v9  ;;  %v2268_v53 = vmax.f32 %v4978_v26, 0.0  ;;  %v2270_v54 = vmax.f32 %v5042_v28, 0.0 }
 0x2f3   : > { %v4981_v51 = vadd.f32 %v1757_v48, %v6517_v13  ;;  %v5045_v52 = vadd.f32 %v2143_v50, %v6519_v14  ;;  %v2269_v61 = vmax.f32 %v4979_v35, 0.0  ;;  %v2271_v62 = vmax.f32 %v5043_v36, 0.0 }
 0x2f4   : > { %v2272_v55 = vmax.f32 %v4980_v39, 0.0  ;;  %v2274_v57 = vmax.f32 %v5044_v45, 0.0 }
 0x2f5   : > { %v2273_v0 = vmax.f32 %v4981_v51, 0.0  ;;  %v2275_v2 = vmax.f32 %v5045_v52, 0.0 }
 0x2f6   : > { %v2436_v4 = vpack.c.bf16 %v2272_v55, %v2268_v53  ;;  %v6743_v5 = vpack.c.bf16 %v2274_v57, %v2270_v54 }
 0x2f7   : > { %v2437_v15 = vpack.c.bf16 %v2273_v0, %v2269_v61  ;;  %v6745_v23 = vpack.c.bf16 %v2275_v2, %v2271_v62  ;;  %v1761_v19 = vpop.f32.mrb[60].mxu0  ;;  %v2147_v9 = vpop.f32.mrb[60].mxu1 }
 0x2f8   : > { %v4982_v29 = vadd.f32 %v1761_v19, %v6509_v12  ;;  %v5046_v32 = vadd.f32 %v2147_v9, %v6513_v3  ;;  %v1763_v26 = vpop.f32.mrb[61].mxu0  ;;  %v2149_v28 = vpop.f32.mrb[61].mxu1 }
 0x2f9   : > { %v4983_v37 = vadd.f32 %v1763_v26, %v6517_v13  ;;  %v5047_v35 = vadd.f32 %v2149_v28, %v6519_v14  ;;  %v1765_v36 = vpop.f32.mrb[62].mxu0  ;;  %v2151_v38 = vpop.f32.mrb[62].mxu1  ;;  %3256 = vmatprep.mubr.bf16.mxu0 %v2437_v15  ;;  %3614 = vmatprep.mubr.bf16.mxu1 %v2437_v15 }
 0x2fa   : > { %v4984_v39 = vadd.f32 %v1765_v36, %v6509_v12  ;;  %v5048_v45 = vadd.f32 %v2151_v38, %v6513_v3  ;;  %v1767_v48 = vpop.f32.mrb[63].mxu0  ;;  %v2153_v50 = vpop.f32.mrb[63].mxu1  ;;  %3257 = vmatmul.mubr.bf16.gmra.mrb[120].mxu0 %v2436_v4  ;;  %3615 = vmatmul.mubr.bf16.gmra.mrb[120].mxu1 %v2436_v4  ;;  %v2276_v53 = vmax.f32 %v4982_v29, 0.0  ;;  %v2278_v54 = vmax.f32 %v5046_v32, 0.0 }
 0x2fb   : > { %v4985_v51 = vadd.f32 %v1767_v48, %v6517_v13  ;;  %v5049_v52 = vadd.f32 %v2153_v50, %v6519_v14  ;;  %v2277_v61 = vmax.f32 %v4983_v37, 0.0  ;;  %v2279_v62 = vmax.f32 %v5047_v35, 0.0 }
 0x2fc   : > { %v2280_v55 = vmax.f32 %v4984_v39, 0.0  ;;  %v2282_v57 = vmax.f32 %v5048_v45, 0.0 }
 0x2fd   : > { %v2281_v0 = vmax.f32 %v4985_v51, 0.0  ;;  %v2283_v2 = vmax.f32 %v5049_v52, 0.0 }
 0x2fe   : > { %v2440_v15 = vpack.c.bf16 %v2280_v55, %v2276_v53  ;;  %v6755_v12 = vpack.c.bf16 %v2282_v57, %v2278_v54 }
 0x2ff   : > { %v2441_v3 = vpack.c.bf16 %v2281_v0, %v2277_v61  ;;  %v6757_v19 = vpack.c.bf16 %v2283_v2, %v2279_v62 }
 0x301   : > { %3266 = vmatprep.mubr.bf16.mxu0 %v2441_v3  ;;  %3622 = vmatprep.mubr.bf16.mxu1 %v2441_v3 }
 0x302   : > { %3267 = vmatmul.mubr.bf16.gmra.mrb[124].mxu0 %v2440_v15  ;;  %3623 = vmatmul.mubr.bf16.gmra.mrb[124].mxu1 %v2440_v15 }
 0x303   : > { %3309 = vmatprep.mubr.bf16.mxu0 %v6531_v42  ;;  %3663 = vmatprep.mubr.bf16.mxu1 %v6531_v42 }
 0x30a   : > { %3310 = vmatmul.mubr.bf16.vlgmr.msra.gmra.mrb[64].mxu0 %v6529_v40  ;;  %3664 = vmatmul.mubr.bf16.vlgmr.msra.gmra.mrb[128].mxu1 %v6529_v40 }
 0x30b   : > { %3319 = vmatprep.mubr.bf16.mxu0 %v6551_v22  ;;  %3671 = vmatprep.mubr.bf16.mxu1 %v6551_v22 }
 0x312   : > { %3320 = vmatmul.mubr.bf16.gmra.mrb[68].mxu0 %v6549_v20  ;;  %3672 = vmatmul.mubr.bf16.gmra.mrb[132].mxu1 %v6549_v20 }
 0x313   : > { %3329 = vmatprep.mubr.bf16.mxu0 %v6571_v60  ;;  %3679 = vmatprep.mubr.bf16.mxu1 %v6571_v60 }
 0x31a   : > { %3330 = vmatmul.mubr.bf16.gmra.mrb[72].mxu0 %v6569_v58  ;;  %3680 = vmatmul.mubr.bf16.gmra.mrb[136].mxu1 %v6569_v58 }
 0x31b   : > { %3339 = vmatprep.mubr.bf16.mxu0 %v6591_v44  ;;  %3687 = vmatprep.mubr.bf16.mxu1 %v6591_v44 }
 0x322   : > { %3340 = vmatmul.mubr.bf16.gmra.mrb[76].mxu0 %v6589_v41  ;;  %3688 = vmatmul.mubr.bf16.gmra.mrb[140].mxu1 %v6589_v41 }
 0x323   : > { %3349 = vmatprep.mubr.bf16.mxu0 %v6610_v27  ;;  %3695 = vmatprep.mubr.bf16.mxu1 %v6610_v27 }
 0x32a   : > { %3350 = vmatmul.mubr.bf16.gmra.mrb[80].mxu0 %v6608_v25  ;;  %3696 = vmatmul.mubr.bf16.gmra.mrb[144].mxu1 %v6608_v25 }
 0x32b   : > { %3359 = vmatprep.mubr.bf16.mxu0 %v6626_v1  ;;  %3703 = vmatprep.mubr.bf16.mxu1 %v6626_v1 }
 0x332   : > { %3360 = vmatmul.mubr.bf16.gmra.mrb[84].mxu0 %v6624_v63  ;;  %3704 = vmatmul.mubr.bf16.gmra.mrb[148].mxu1 %v6624_v63 }
 0x333   : > { %3369 = vmatprep.mubr.bf16.mxu0 %v6642_v49  ;;  %3711 = vmatprep.mubr.bf16.mxu1 %v6642_v49 }
 0x33a   : > { %3370 = vmatmul.mubr.bf16.gmra.mrb[88].mxu0 %v6640_v47  ;;  %3712 = vmatmul.mubr.bf16.gmra.mrb[152].mxu1 %v6640_v47 }
 0x33b   : > { %3379 = vmatprep.mubr.bf16.mxu0 %v6658_v33  ;;  %3719 = vmatprep.mubr.bf16.mxu1 %v6658_v33 }
 0x342   : > { %3380 = vmatmul.mubr.bf16.gmra.mrb[92].mxu0 %v6656_v31  ;;  %3720 = vmatmul.mubr.bf16.gmra.mrb[156].mxu1 %v6656_v31 }
 0x343   : > { %3389 = vmatprep.mubr.bf16.mxu0 %v6673_v18  ;;  %3727 = vmatprep.mubr.bf16.mxu1 %v6673_v18 }
 0x34a   : > { %3390 = vmatmul.mubr.bf16.gmra.mrb[96].mxu0 %v6671_v16  ;;  %3728 = vmatmul.mubr.bf16.gmra.mrb[160].mxu1 %v6671_v16 }
 0x34b   : > { %3399 = vmatprep.mubr.bf16.mxu0 %v6685_v59  ;;  %3735 = vmatprep.mubr.bf16.mxu1 %v6685_v59 }
 0x352   : > { %3400 = vmatmul.mubr.bf16.gmra.mrb[100].mxu0 %v6683_v56  ;;  %3736 = vmatmul.mubr.bf16.gmra.mrb[164].mxu1 %v6683_v56 }
 0x353   : > { %3409 = vmatprep.mubr.bf16.mxu0 %v6697_v46  ;;  %3743 = vmatprep.mubr.bf16.mxu1 %v6697_v46 }
 0x35a   : > { %3410 = vmatmul.mubr.bf16.gmra.mrb[104].mxu0 %v6695_v43  ;;  %3744 = vmatmul.mubr.bf16.gmra.mrb[168].mxu1 %v6695_v43 }
 0x35b   : > { %3419 = vmatprep.mubr.bf16.mxu0 %v6709_v34  ;;  %3751 = vmatprep.mubr.bf16.mxu1 %v6709_v34 }
 0x35d   : > { %v4714_v13 = vpop.f32.mrb[64].mxu1 }
 0x35e   : > { %v4715_v14 = vpop.f32.mrb[65].mxu1 }
 0x35f   : > { %v6805_v40 = vadd.f32 %v4715_v14, %v4714_v13  ;;  %v4717_v42 = vpop.f32.mrb[66].mxu1 }
 0x360   : > { %v4718_v20 = vpop.f32.mrb[67].mxu1 }
 0x361   : > { %v6807_v22 = vadd.f32 %v4718_v20, %v4717_v42 }
 0x362   : > { %3420 = vmatmul.mubr.bf16.gmra.mrb[108].mxu0 %v6707_v30  ;;  %3752 = vmatmul.mubr.bf16.gmra.mrb[172].mxu1 %v6707_v30 }
 0x363   : > { %3429 = vmatprep.mubr.bf16.mxu0 %v6721_v24  ;;  %3759 = vmatprep.mubr.bf16.mxu1 %v6721_v24 }
 0x365   : > { %v4720_v58 = vpop.f32.mrb[68].mxu1 }
 0x366   : > { %v4721_v60 = vpop.f32.mrb[69].mxu1 }
 0x367   : > { %v6813_v41 = vadd.f32 %v4721_v60, %v4720_v58  ;;  %v4723_v44 = vpop.f32.mrb[70].mxu1 }
 0x368   : > { %v4724_v25 = vpop.f32.mrb[71].mxu1 }
 0x369   : > { %v6815_v27 = vadd.f32 %v4724_v25, %v4723_v44 }
 0x36a   : > { %3430 = vmatmul.mubr.bf16.gmra.mrb[112].mxu0 %v6719_v21  ;;  %3760 = vmatmul.mubr.bf16.gmra.mrb[176].mxu1 %v6719_v21 }
 0x36b   : > { %3439 = vmatprep.mubr.bf16.mxu0 %v6733_v17  ;;  %3767 = vmatprep.mubr.bf16.mxu1 %v6733_v17 }
 0x36d   : > { %v4726_v63 = vpop.f32.mrb[72].mxu1 }
 0x36e   : > { %v4727_v1 = vpop.f32.mrb[73].mxu1 }
 0x36f   : > { %v6821_v47 = vadd.f32 %v4727_v1, %v4726_v63  ;;  %v4729_v49 = vpop.f32.mrb[74].mxu1 }
 0x370   : > { %v4730_v31 = vpop.f32.mrb[75].mxu1 }
 0x371   : > { %v6823_v33 = vadd.f32 %v4730_v31, %v4729_v49 }
 0x372   : > { %3440 = vmatmul.mubr.bf16.gmra.mrb[116].mxu0 %v6731_v11  ;;  %3768 = vmatmul.mubr.bf16.gmra.mrb[180].mxu1 %v6731_v11 }
 0x373   : > { %3449 = vmatprep.mubr.bf16.mxu0 %v6745_v23  ;;  %3775 = vmatprep.mubr.bf16.mxu1 %v6745_v23 }
 0x375   : > { %v4732_v16 = vpop.f32.mrb[76].mxu1 }
 0x376   : > { %v4733_v18 = vpop.f32.mrb[77].mxu1 }
 0x377   : > { %v6829_v56 = vadd.f32 %v4733_v18, %v4732_v16  ;;  %v4735_v59 = vpop.f32.mrb[78].mxu1 }
 0x378   : > { %v4736_v43 = vpop.f32.mrb[79].mxu1 }
 0x379   : > { %v6831_v46 = vadd.f32 %v4736_v43, %v4735_v59 }
 0x37a   : > { %3450 = vmatmul.mubr.bf16.gmra.mrb[120].mxu0 %v6743_v5  ;;  %3776 = vmatmul.mubr.bf16.gmra.mrb[184].mxu1 %v6743_v5 }
 0x37b   : > { %3459 = vmatprep.mubr.bf16.mxu0 %v6757_v19  ;;  %3783 = vmatprep.mubr.bf16.mxu1 %v6757_v19 }
 0x37d   : > { %v4738_v30 = vpop.f32.mrb[80].mxu1 }
 0x37e   : > { %v4739_v34 = vpop.f32.mrb[81].mxu1 }
 0x37f   : > { %v6837_v21 = vadd.f32 %v4739_v34, %v4738_v30  ;;  %v4741_v24 = vpop.f32.mrb[82].mxu1 }
 0x380   : > { %v4742_v11 = vpop.f32.mrb[83].mxu1 }
 0x381   : > { %v6839_v17 = vadd.f32 %v4742_v11, %v4741_v24 }
 0x382   : > { %3460 = vmatmul.mubr.bf16.gmra.mrb[124].mxu0 %v6755_v12  ;;  %3784 = vmatmul.mubr.bf16.gmra.mrb[188].mxu1 %v6755_v12 }
 0x385   : > { %v4744_v4 = vpop.f32.mrb[84].mxu1 }
 0x386   : > { %v4745_v23 = vpop.f32.mrb[85].mxu1 }
 0x387   : > { %v6843_v9 = vadd.f32 %v4745_v23, %v4744_v4  ;;  %v4747_v5 = vpop.f32.mrb[86].mxu1 }
 0x388   : > { %v4748_v29 = vpop.f32.mrb[87].mxu1 }
 0x389   : > { %v6845_v32 = vadd.f32 %v4748_v29, %v4747_v5 }
 0x38d   : > { %v4750_v26 = vpop.f32.mrb[88].mxu1 }
 0x38e   : > { %v4751_v28 = vpop.f32.mrb[89].mxu1 }
 0x38f   : > { %v6847_v37 = vadd.f32 %v4751_v28, %v4750_v26  ;;  %v4753_v35 = vpop.f32.mrb[90].mxu1 }
 0x390   : > { %v4754_v36 = vpop.f32.mrb[91].mxu1 }
 0x391   : > { %v6849_v38 = vadd.f32 %v4754_v36, %v4753_v35 }
 0x395   : > { %v4756_v39 = vpop.f32.mrb[92].mxu1 }
 0x396   : > { %v4757_v45 = vpop.f32.mrb[93].mxu1 }
 0x397   : > { %v6851_v48 = vadd.f32 %v4757_v45, %v4756_v39  ;;  %v4759_v50 = vpop.f32.mrb[94].mxu1 }
 0x398   : > { %v4760_v51 = vpop.f32.mrb[95].mxu1 }
 0x399   : > { %v6853_v52 = vadd.f32 %v4760_v51, %v4759_v50 }
 0x39d   : > { %v4762_v53 = vpop.f32.mrb[96].mxu1 }
 0x39e   : > { %v4763_v54 = vpop.f32.mrb[97].mxu1 }
 0x39f   : > { %v6855_v55 = vadd.f32 %v4763_v54, %v4762_v53  ;;  %v4765_v57 = vpop.f32.mrb[98].mxu1 }
 0x3a0   : > { %v4766_v61 = vpop.f32.mrb[99].mxu1 }
 0x3a1   : > { %v6857_v62 = vadd.f32 %v4766_v61, %v4765_v57 }
 0x3a5   : > { %v4768_v0 = vpop.f32.mrb[100].mxu1 }
 0x3a6   : > { %v4769_v2 = vpop.f32.mrb[101].mxu1 }
 0x3a7   : > { %v6859_v15 = vadd.f32 %v4769_v2, %v4768_v0  ;;  %v4771_v12 = vpop.f32.mrb[102].mxu1  ;;  %v2284_v0 = vld [vmem:[#allocation2] sm:$0xff]  ;;  %v2285_v2 = vld [vmem:[#allocation2 + $0x8] sm:$0xff] }
 0x3a8   : > { %v4772_v3 = vpop.f32.mrb[103].mxu1 }
 0x3a9   : > { %v6861_v19 = vadd.f32 %v4772_v3, %v4771_v12 }
 0x3ad   : > { %v4774_v13 = vpop.f32.mrb[104].mxu1 }
 0x3ae   : > { %v4775_v14 = vpop.f32.mrb[105].mxu1 }
 0x3af   : > { %v6863_v42 = vadd.f32 %v4775_v14, %v4774_v13  ;;  %v4777_v20 = vpop.f32.mrb[106].mxu1  ;;  %v2287_v13 = vld [vmem:[#allocation2 + $0x18] sm:$0xff] }
 0x3b0   : > { %v4778_v58 = vpop.f32.mrb[107].mxu1 }
 0x3b1   : > { %v6865_v60 = vadd.f32 %v4778_v58, %v4777_v20 }
 0x3b5   : > { %v4780_v44 = vpop.f32.mrb[108].mxu1 }
 0x3b6   : > { %v4781_v25 = vpop.f32.mrb[109].mxu1 }
 0x3b7   : > { %v6867_v63 = vadd.f32 %v4781_v25, %v4780_v44  ;;  %v4783_v1 = vpop.f32.mrb[110].mxu1  ;;  %v2288_v44 = vld [vmem:[#allocation2 + $0x20] sm:$0xff] }
 0x3b8   : > { %v4784_v49 = vpop.f32.mrb[111].mxu1 }
 0x3b9   : > { %v6869_v31 = vadd.f32 %v4784_v49, %v4783_v1 }
 0x3bd   : > { %v4786_v16 = vpop.f32.mrb[112].mxu1 }
 0x3be   : > { %v4787_v18 = vpop.f32.mrb[113].mxu1 }
 0x3bf   : > { %v6871_v59 = vadd.f32 %v4787_v18, %v4786_v16  ;;  %v4789_v43 = vpop.f32.mrb[114].mxu1  ;;  %v2286_v18 = vld [vmem:[#allocation2 + $0x10] sm:$0xff] }
 0x3c0   : > { %v4790_v30 = vpop.f32.mrb[115].mxu1 }
 0x3c1   : > { %v6873_v34 = vadd.f32 %v4790_v30, %v4789_v43 }
 0x3c5   : > { %v4792_v24 = vpop.f32.mrb[116].mxu1 }
 0x3c6   : > { %v4793_v11 = vpop.f32.mrb[117].mxu1 }
 0x3c7   : > { %v6875_v4 = vadd.f32 %v4793_v11, %v4792_v24  ;;  %v4795_v23 = vpop.f32.mrb[118].mxu1 }
 0x3c8   : > { %v4796_v5 = vpop.f32.mrb[119].mxu1 }
 0x3c9   : > { %v6877_v29 = vadd.f32 %v4796_v5, %v4795_v23 }
 0x3cd   : > { %v4798_v26 = vpop.f32.mrb[120].mxu1 }
 0x3ce   : > { %v4799_v28 = vpop.f32.mrb[121].mxu1 }
 0x3cf   : > { %v6879_v35 = vadd.f32 %v4799_v28, %v4798_v26  ;;  %v4801_v36 = vpop.f32.mrb[122].mxu1  ;;  %v2289_v26 = vld [vmem:[#allocation2 + $0x28] sm:$0xff] }
 0x3d0   : > { %v4802_v39 = vpop.f32.mrb[123].mxu1 }
 0x3d1   : > { %v6881_v45 = vadd.f32 %v4802_v39, %v4801_v36  ;;  %v2290_v39 = vld [vmem:[#allocation2 + $0x30] sm:$0xff] }
 0x3d5   : > { %v4804_v50 = vpop.f32.mrb[124].mxu1 }
 0x3d6   : > { %v4805_v51 = vpop.f32.mrb[125].mxu1 }
 0x3d7   : > { %v6883_v53 = vadd.f32 %v4805_v51, %v4804_v50  ;;  %v4807_v54 = vpop.f32.mrb[126].mxu1  ;;  %v2291_v50 = vld [vmem:[#allocation2 + $0x38] sm:$0xff] }
 0x3d8   : > { %v4808_v57 = vpop.f32.mrb[127].mxu1 }
 0x3d9   : > { %v6885_v61 = vadd.f32 %v4808_v57, %v4807_v54 }
 0x3dd   : > { %v3311_v12 = vpop.f32.mrb[64].mxu0  ;;  %v4826_v3 = vpop.f32.mrb[128].mxu1 }
 0x3de   : > { %v3792_v14 = vadd.f32 %v3311_v12, %v2284_v0  ;;  %v3313_v20 = vpop.f32.mrb[65].mxu0  ;;  %v4827_v58 = vpop.f32.mrb[129].mxu1  ;;  %v2293_v0 = vld [vmem:[#allocation2 + $0x48] sm:$0xff] }
 0x3df   : > { %v3793_v25 = vadd.f32 %v3313_v20, %v2285_v2  ;;  %v4828_v1 = vadd.f32 %v4827_v58, %v4826_v3  ;;  %v3315_v49 = vpop.f32.mrb[66].mxu0  ;;  %v4829_v16 = vpop.f32.mrb[130].mxu1 }
 0x3e0   : > { %3888 = vst [vmem:[#allocation2] sm:$0xff] %v3792_v14  ;;  %v3795_v43 = vadd.f32 %v3315_v49, %v2287_v13  ;;  %v3317_v30 = vpop.f32.mrb[67].mxu0  ;;  %v4830_v24 = vpop.f32.mrb[131].mxu1  ;;  %v2294_v13 = vld [vmem:[#allocation2 + $0x50] sm:$0xff] }
 0x3e1   : > { %3889 = vst [vmem:[#allocation2 + $0x8] sm:$0xff] %v3793_v25  ;;  %v3666_v11 = vadd.f32 %v4828_v1, %v6805_v40  ;;  %v3796_v23 = vadd.f32 %v3317_v30, %v2288_v44  ;;  %v4831_v5 = vadd.f32 %v4830_v24, %v4829_v16  ;;  %v2292_v44 = vld [vmem:[#allocation2 + $0x40] sm:$0xff] }
 0x3e2   : > { %3891 = vst [vmem:[#allocation2 + $0x18] sm:$0xff] %v3795_v43  ;;  %v2295_v43 = vld [vmem:[#allocation2 + $0x58] sm:$0xff] }
 0x3e3   : > { %v3794_v28 = vadd.f32 %v3666_v11, %v2286_v18  ;;  %3892 = vst [vmem:[#allocation2 + $0x20] sm:$0xff] %v3796_v23  ;;  %v3669_v36 = vadd.f32 %v4831_v5, %v6807_v22  ;;  %v2296_v11 = vld [vmem:[#allocation2 + $0x60] sm:$0xff]  ;;  %v2297_v23 = vld [vmem:[#allocation2 + $0x68] sm:$0xff] }
 0x3e5   : > { %3890 = vst [vmem:[#allocation2 + $0x10] sm:$0xff] %v3794_v28  ;;  %v3797_v51 = vadd.f32 %v3669_v36, %v2289_v26  ;;  %v3321_v54 = vpop.f32.mrb[68].mxu0  ;;  %v4832_v57 = vpop.f32.mrb[132].mxu1  ;;  %v2299_v36 = vld [vmem:[#allocation2 + $0x78] sm:$0xff] }
 0x3e6   : > { %v3798_v2 = vadd.f32 %v3321_v54, %v2290_v39  ;;  %v3323_v12 = vpop.f32.mrb[69].mxu0  ;;  %v4833_v3 = vpop.f32.mrb[133].mxu1  ;;  %v2300_v54 = vld [vmem:[#allocation2 + $0x80] sm:$0xff] }
 0x3e7   : > { %3893 = vst [vmem:[#allocation2 + $0x28] sm:$0xff] %v3797_v51  ;;  %v3799_v40 = vadd.f32 %v3323_v12, %v2291_v50  ;;  %v4834_v14 = vadd.f32 %v4833_v3, %v4832_v57  ;;  %v3325_v20 = vpop.f32.mrb[70].mxu0  ;;  %v4835_v58 = vpop.f32.mrb[134].mxu1  ;;  %v2298_v12 = vld [vmem:[#allocation2 + $0x70] sm:$0xff] }
 0x3e8   : > { %3894 = vst [vmem:[#allocation2 + $0x30] sm:$0xff] %v3798_v2  ;;  %v3801_v25 = vadd.f32 %v3325_v20, %v2293_v0  ;;  %v3327_v22 = vpop.f32.mrb[71].mxu0  ;;  %v4836_v1 = vpop.f32.mrb[135].mxu1 }
 0x3e9   : > { %3895 = vst [vmem:[#allocation2 + $0x38] sm:$0xff] %v3799_v40  ;;  %v3674_v49 = vadd.f32 %v4834_v14, %v6813_v41  ;;  %v3802_v16 = vadd.f32 %v3327_v22, %v2294_v13  ;;  %v4837_v18 = vadd.f32 %v4836_v1, %v4835_v58  ;;  %v2301_v58 = vld [vmem:[#allocation2 + $0x88] sm:$0xff]  ;;  %v2302_v22 = vld [vmem:[#allocation2 + $0x90] sm:$0xff]  ;;  %v2303_v1 = vld [vmem:[#allocation2 + $0x98] sm:$0xff] }
 0x3ea   : > { %3897 = vst [vmem:[#allocation2 + $0x48] sm:$0xff] %v3801_v25 }
 0x3eb   : > { %v3800_v30 = vadd.f32 %v3674_v49, %v2292_v44  ;;  %3898 = vst [vmem:[#allocation2 + $0x50] sm:$0xff] %v3802_v16  ;;  %v3677_v24 = vadd.f32 %v4837_v18, %v6815_v27 }
 0x3ed   : > { %3896 = vst [vmem:[#allocation2 + $0x40] sm:$0xff] %v3800_v30  ;;  %v3803_v5 = vadd.f32 %v3677_v24, %v2295_v43  ;;  %v3331_v26 = vpop.f32.mrb[72].mxu0  ;;  %v4838_v28 = vpop.f32.mrb[136].mxu1  ;;  %v2305_v43 = vld [vmem:[#allocation2 + $0xa8] sm:$0xff] }
 0x3ee   : > { %v3804_v39 = vadd.f32 %v3331_v26, %v2296_v11  ;;  %v3333_v50 = vpop.f32.mrb[73].mxu0  ;;  %v4839_v51 = vpop.f32.mrb[137].mxu1 }
 0x3ef   : > { %3899 = vst [vmem:[#allocation2 + $0x58] sm:$0xff] %v3803_v5  ;;  %v3805_v41 = vadd.f32 %v3333_v50, %v2297_v23  ;;  %v4840_v57 = vadd.f32 %v4839_v51, %v4838_v28  ;;  %v3335_v0 = vpop.f32.mrb[74].mxu0  ;;  %v4841_v2 = vpop.f32.mrb[138].mxu1  ;;  %v2306_v23 = vld [vmem:[#allocation2 + $0xb0] sm:$0xff] }
 0x3f0   : > { %3900 = vst [vmem:[#allocation2 + $0x60] sm:$0xff] %v3804_v39  ;;  %v3807_v3 = vadd.f32 %v3335_v0, %v2299_v36  ;;  %v3337_v27 = vpop.f32.mrb[75].mxu0  ;;  %v4842_v13 = vpop.f32.mrb[139].mxu1  ;;  %v2304_v36 = vld [vmem:[#allocation2 + $0xa0] sm:$0xff] }
 0x3f1   : > { %3901 = vst [vmem:[#allocation2 + $0x68] sm:$0xff] %v3805_v41  ;;  %v3682_v40 = vadd.f32 %v4840_v57, %v6821_v47  ;;  %v3808_v14 = vadd.f32 %v3337_v27, %v2300_v54  ;;  %v4843_v20 = vadd.f32 %v4842_v13, %v4841_v2  ;;  %v2307_v57 = vld [vmem:[#allocation2 + $0xb8] sm:$0xff] }
 0x3f2   : > { %3903 = vst [vmem:[#allocation2 + $0x78] sm:$0xff] %v3807_v3  ;;  %v2309_v3 = vld [vmem:[#allocation2 + $0xc8] sm:$0xff] }
 0x3f3   : > { %v3806_v44 = vadd.f32 %v3682_v40, %v2298_v12  ;;  %3904 = vst [vmem:[#allocation2 + $0x80] sm:$0xff] %v3808_v14  ;;  %v3685_v25 = vadd.f32 %v4843_v20, %v6823_v33  ;;  %v2308_v12 = vld [vmem:[#allocation2 + $0xc0] sm:$0xff]  ;;  %v2311_v14 = vld [vmem:[#allocation2 + $0xd8] sm:$0xff] }
 0x3f5   : > { %3902 = vst [vmem:[#allocation2 + $0x70] sm:$0xff] %v3806_v44  ;;  %v3809_v49 = vadd.f32 %v3685_v25, %v2301_v58  ;;  %v3341_v16 = vpop.f32.mrb[76].mxu0  ;;  %v4844_v18 = vpop.f32.mrb[140].mxu1  ;;  %v2312_v25 = vld [vmem:[#allocation2 + $0xe0] sm:$0xff] }
 0x3f6   : > { %v3810_v30 = vadd.f32 %v3341_v16, %v2302_v22  ;;  %v3343_v24 = vpop.f32.mrb[77].mxu0  ;;  %v4845_v11 = vpop.f32.mrb[141].mxu1  ;;  %v2310_v16 = vld [vmem:[#allocation2 + $0xd0] sm:$0xff] }
 0x3f7   : > { %3905 = vst [vmem:[#allocation2 + $0x88] sm:$0xff] %v3809_v49  ;;  %v3811_v47 = vadd.f32 %v3343_v24, %v2303_v1  ;;  %v4846_v5 = vadd.f32 %v4845_v11, %v4844_v18  ;;  %v3345_v26 = vpop.f32.mrb[78].mxu0  ;;  %v4847_v28 = vpop.f32.mrb[142].mxu1 }
 0x3f8   : > { %3906 = vst [vmem:[#allocation2 + $0x90] sm:$0xff] %v3810_v30  ;;  %v3813_v39 = vadd.f32 %v3345_v26, %v2305_v43  ;;  %v3347_v33 = vpop.f32.mrb[79].mxu0  ;;  %v4848_v50 = vpop.f32.mrb[143].mxu1  ;;  %v2314_v26 = vld [vmem:[#allocation2 + $0xf0] sm:$0xff] }
 0x3f9   : > { %3907 = vst [vmem:[#allocation2 + $0x98] sm:$0xff] %v3811_v47  ;;  %v3690_v51 = vadd.f32 %v4846_v5, %v6829_v56  ;;  %v3814_v54 = vadd.f32 %v3347_v33, %v2306_v23  ;;  %v4849_v41 = vadd.f32 %v4848_v50, %v4847_v28  ;;  %v2313_v23 = vld [vmem:[#allocation2 + $0xe8] sm:$0xff]  ;;  %v2315_v28 = vld [vmem:[#allocation2 + $0xf8] sm:$0xff] }
 0x3fa   : > { %3909 = vst [vmem:[#allocation2 + $0xa8] sm:$0xff] %v3813_v39  ;;  %v2317_v50 = vld [vmem:[#allocation2 + $0x108] sm:$0xff] }
 0x3fb   : > { %v3812_v0 = vadd.f32 %v3690_v51, %v2304_v36  ;;  %3910 = vst [vmem:[#allocation2 + $0xb0] sm:$0xff] %v3814_v54  ;;  %v3693_v2 = vadd.f32 %v4849_v41, %v6831_v46 }
 0x3fd   : > { %3908 = vst [vmem:[#allocation2 + $0xa0] sm:$0xff] %v3812_v0  ;;  %v3815_v27 = vadd.f32 %v3693_v2, %v2307_v57  ;;  %v3351_v13 = vpop.f32.mrb[80].mxu0  ;;  %v4850_v40 = vpop.f32.mrb[144].mxu1  ;;  %v2318_v57 = vld [vmem:[#allocation2 + $0x110] sm:$0xff] }
 0x3fe   : > { %v3816_v20 = vadd.f32 %v3351_v13, %v2308_v12  ;;  %v3353_v58 = vpop.f32.mrb[81].mxu0  ;;  %v4851_v44 = vpop.f32.mrb[145].mxu1 }
 0x3ff   : > { %3911 = vst [vmem:[#allocation2 + $0xb8] sm:$0xff] %v3815_v27  ;;  %v3817_v56 = vadd.f32 %v3353_v58, %v2309_v3  ;;  %v4852_v22 = vadd.f32 %v4851_v44, %v4850_v40  ;;  %v3355_v1 = vpop.f32.mrb[82].mxu0  ;;  %v4853_v49 = vpop.f32.mrb[146].mxu1  ;;  %v2316_v3 = vld [vmem:[#allocation2 + $0x100] sm:$0xff]  ;;  %v2319_v58 = vld [vmem:[#allocation2 + $0x118] sm:$0xff] }
 0x400   : > { %3912 = vst [vmem:[#allocation2 + $0xc0] sm:$0xff] %v3816_v20  ;;  %v3819_v18 = vadd.f32 %v3355_v1, %v2311_v14  ;;  %v3357_v46 = vpop.f32.mrb[83].mxu0  ;;  %v4854_v43 = vpop.f32.mrb[147].mxu1 }
 0x401   : > { %3913 = vst [vmem:[#allocation2 + $0xc8] sm:$0xff] %v3817_v56  ;;  %v3698_v30 = vadd.f32 %v4852_v22, %v6837_v21  ;;  %v3820_v24 = vadd.f32 %v3357_v46, %v2312_v25  ;;  %v4855_v11 = vadd.f32 %v4854_v43, %v4853_v49  ;;  %v2320_v56 = vld [vmem:[#allocation2 + $0x120] sm:$0xff]  ;;  %v2321_v22 = vld [vmem:[#allocation2 + $0x128] sm:$0xff] }
 0x402   : > { %3915 = vst [vmem:[#allocation2 + $0xd8] sm:$0xff] %v3819_v18  ;;  %v2323_v18 = vld [vmem:[#allocation2 + $0x138] sm:$0xff] }
 0x403   : > { %v3818_v47 = vadd.f32 %v3698_v30, %v2310_v16  ;;  %3916 = vst [vmem:[#allocation2 + $0xe0] sm:$0xff] %v3820_v24  ;;  %v3701_v5 = vadd.f32 %v4855_v11, %v6839_v17  ;;  %v2324_v24 = vld [vmem:[#allocation2 + $0x140] sm:$0xff] }
 0x405   : > { %3914 = vst [vmem:[#allocation2 + $0xd0] sm:$0xff] %v3818_v47  ;;  %v3821_v36 = vadd.f32 %v3701_v5, %v2313_v23  ;;  %v3361_v39 = vpop.f32.mrb[84].mxu0  ;;  %v4856_v33 = vpop.f32.mrb[148].mxu1  ;;  %v2322_v5 = vld [vmem:[#allocation2 + $0x130] sm:$0xff] }
 0x406   : > { %v3822_v51 = vadd.f32 %v3361_v39, %v2314_v26  ;;  %v3363_v54 = vpop.f32.mrb[85].mxu0  ;;  %v4857_v41 = vpop.f32.mrb[149].mxu1 }
 0x407   : > { %3917 = vst [vmem:[#allocation2 + $0xe8] sm:$0xff] %v3821_v36  ;;  %v3823_v21 = vadd.f32 %v3363_v54, %v2315_v28  ;;  %v4858_v0 = vadd.f32 %v4857_v41, %v4856_v33  ;;  %v3365_v2 = vpop.f32.mrb[86].mxu0  ;;  %v4859_v12 = vpop.f32.mrb[150].mxu1  ;;  %v2326_v41 = vld [vmem:[#allocation2 + $0x150] sm:$0xff] }
 0x408   : > { %3918 = vst [vmem:[#allocation2 + $0xf0] sm:$0xff] %v3822_v51  ;;  %v3825_v27 = vadd.f32 %v3365_v2, %v2317_v50  ;;  %v3367_v17 = vpop.f32.mrb[87].mxu0  ;;  %v4860_v13 = vpop.f32.mrb[151].mxu1  ;;  %v2325_v50 = vld [vmem:[#allocation2 + $0x148] sm:$0xff] }
 0x409   : > { %3919 = vst [vmem:[#allocation2 + $0xf8] sm:$0xff] %v3823_v21  ;;  %v3706_v40 = vadd.f32 %v4858_v0, %v6843_v9  ;;  %v3826_v14 = vadd.f32 %v3367_v17, %v2318_v57  ;;  %v4861_v20 = vadd.f32 %v4860_v13, %v4859_v12  ;;  %v2327_v57 = vld [vmem:[#allocation2 + $0x158] sm:$0xff]  ;;  %v2329_v12 = vld [vmem:[#allocation2 + $0x168] sm:$0xff]  ;;  %v2330_v13 = vld [vmem:[#allocation2 + $0x170] sm:$0xff] }
 0x40a   : > { %3921 = vst [vmem:[#allocation2 + $0x108] sm:$0xff] %v3825_v27 }
 0x40b   : > { %v3824_v44 = vadd.f32 %v3706_v40, %v2316_v3  ;;  %3922 = vst [vmem:[#allocation2 + $0x110] sm:$0xff] %v3826_v14  ;;  %v3709_v25 = vadd.f32 %v4861_v20, %v6845_v32 }
 0x40d   : > { %3920 = vst [vmem:[#allocation2 + $0x100] sm:$0xff] %v3824_v44  ;;  %v3827_v1 = vadd.f32 %v3709_v25, %v2319_v58  ;;  %v3371_v49 = vpop.f32.mrb[88].mxu0  ;;  %v4862_v16 = vpop.f32.mrb[152].mxu1  ;;  %v2328_v58 = vld [vmem:[#allocation2 + $0x160] sm:$0xff] }
 0x40e   : > { %v3828_v46 = vadd.f32 %v3371_v49, %v2320_v56  ;;  %v3373_v43 = vpop.f32.mrb[89].mxu0  ;;  %v4863_v30 = vpop.f32.mrb[153].mxu1  ;;  %v2331_v49 = vld [vmem:[#allocation2 + $0x178] sm:$0xff] }
 0x40f   : > { %3923 = vst [vmem:[#allocation2 + $0x118] sm:$0xff] %v3827_v1  ;;  %v3829_v9 = vadd.f32 %v3373_v43, %v2321_v22  ;;  %v4864_v11 = vadd.f32 %v4863_v30, %v4862_v16  ;;  %v3375_v23 = vpop.f32.mrb[90].mxu0  ;;  %v4865_v47 = vpop.f32.mrb[154].mxu1  ;;  %v2333_v43 = vld [vmem:[#allocation2 + $0x188] sm:$0xff] }
 0x410   : > { %3924 = vst [vmem:[#allocation2 + $0x120] sm:$0xff] %v3828_v46  ;;  %v3831_v26 = vadd.f32 %v3375_v23, %v2323_v18  ;;  %v3377_v32 = vpop.f32.mrb[91].mxu0  ;;  %v4866_v28 = vpop.f32.mrb[155].mxu1  ;;  %v2332_v46 = vld [vmem:[#allocation2 + $0x180] sm:$0xff] }
 0x411   : > { %3925 = vst [vmem:[#allocation2 + $0x128] sm:$0xff] %v3829_v9  ;;  %v3714_v36 = vadd.f32 %v4864_v11, %v6847_v37  ;;  %v3832_v39 = vadd.f32 %v3377_v32, %v2324_v24  ;;  %v4867_v33 = vadd.f32 %v4866_v28, %v4865_v47  ;;  %v2335_v11 = vld [vmem:[#allocation2 + $0x198] sm:$0xff] }
 0x412   : > { %3927 = vst [vmem:[#allocation2 + $0x138] sm:$0xff] %v3831_v26  ;;  %v2336_v26 = vld [vmem:[#allocation2 + $0x1a0] sm:$0xff] }
 0x413   : > { %v3830_v51 = vadd.f32 %v3714_v36, %v2322_v5  ;;  %3928 = vst [vmem:[#allocation2 + $0x140] sm:$0xff] %v3832_v39  ;;  %v3717_v54 = vadd.f32 %v4867_v33, %v6849_v38  ;;  %v2334_v39 = vld [vmem:[#allocation2 + $0x190] sm:$0xff] }
 0x415   : > { %3926 = vst [vmem:[#allocation2 + $0x130] sm:$0xff] %v3830_v51  ;;  %v3833_v21 = vadd.f32 %v3717_v54, %v2325_v50  ;;  %v3381_v0 = vpop.f32.mrb[92].mxu0  ;;  %v4868_v2 = vpop.f32.mrb[156].mxu1 }
 0x416   : > { %v3834_v3 = vadd.f32 %v3381_v0, %v2326_v41  ;;  %v3383_v27 = vpop.f32.mrb[93].mxu0  ;;  %v4869_v17 = vpop.f32.mrb[157].mxu1 }
 0x417   : > { %3929 = vst [vmem:[#allocation2 + $0x148] sm:$0xff] %v3833_v21  ;;  %v3835_v37 = vadd.f32 %v3383_v27, %v2327_v57  ;;  %v4870_v40 = vadd.f32 %v4869_v17, %v4868_v2  ;;  %v3385_v14 = vpop.f32.mrb[94].mxu0  ;;  %v4871_v20 = vpop.f32.mrb[158].mxu1  ;;  %v2337_v57 = vld [vmem:[#allocation2 + $0x1a8] sm:$0xff]  ;;  %v2338_v2 = vld [vmem:[#allocation2 + $0x1b0] sm:$0xff] }
 0x418   : > { %3930 = vst [vmem:[#allocation2 + $0x150] sm:$0xff] %v3834_v3  ;;  %v3837_v44 = vadd.f32 %v3385_v14, %v2329_v12  ;;  %v3387_v38 = vpop.f32.mrb[95].mxu0  ;;  %v4872_v25 = vpop.f32.mrb[159].mxu1  ;;  %v2339_v12 = vld [vmem:[#allocation2 + $0x1b8] sm:$0xff] }
 0x419   : > { %3931 = vst [vmem:[#allocation2 + $0x158] sm:$0xff] %v3835_v37  ;;  %v3722_v56 = vadd.f32 %v4870_v40, %v6851_v48  ;;  %v3838_v22 = vadd.f32 %v3387_v38, %v2330_v13  ;;  %v4873_v1 = vadd.f32 %v4872_v25, %v4871_v20  ;;  %v2341_v13 = vld [vmem:[#allocation2 + $0x1c8] sm:$0xff]  ;;  %v2342_v20 = vld [vmem:[#allocation2 + $0x1d0] sm:$0xff]  ;;  %v2340_v25 = vld [vmem:[#allocation2 + $0x1c0] sm:$0xff] }
 0x41a   : > { %3933 = vst [vmem:[#allocation2 + $0x168] sm:$0xff] %v3837_v44 }
 0x41b   : > { %v3836_v16 = vadd.f32 %v3722_v56, %v2328_v58  ;;  %3934 = vst [vmem:[#allocation2 + $0x170] sm:$0xff] %v3838_v22  ;;  %v3725_v18 = vadd.f32 %v4873_v1, %v6853_v52 }
 0x41d   : > { %3932 = vst [vmem:[#allocation2 + $0x160] sm:$0xff] %v3836_v16  ;;  %v3839_v30 = vadd.f32 %v3725_v18, %v2331_v49  ;;  %v3391_v24 = vpop.f32.mrb[96].mxu0  ;;  %v4874_v9 = vpop.f32.mrb[160].mxu1  ;;  %v2343_v18 = vld [vmem:[#allocation2 + $0x1d8] sm:$0xff] }
 0x41e   : > { %v3840_v23 = vadd.f32 %v3391_v24, %v2332_v46  ;;  %v3393_v47 = vpop.f32.mrb[97].mxu0  ;;  %v4875_v5 = vpop.f32.mrb[161].mxu1  ;;  %v2345_v24 = vld [vmem:[#allocation2 + $0x1e8] sm:$0xff] }
 0x41f   : > { %3935 = vst [vmem:[#allocation2 + $0x178] sm:$0xff] %v3839_v30  ;;  %v3841_v48 = vadd.f32 %v3393_v47, %v2333_v43  ;;  %v4876_v32 = vadd.f32 %v4875_v5, %v4874_v9  ;;  %v3395_v28 = vpop.f32.mrb[98].mxu0  ;;  %v4877_v36 = vpop.f32.mrb[162].mxu1  ;;  %v2344_v30 = vld [vmem:[#allocation2 + $0x1e0] sm:$0xff]  ;;  %v2347_v47 = vld [vmem:[#allocation2 + $0x1f8] sm:$0xff] }
 0x420   : > { %3936 = vst [vmem:[#allocation2 + $0x180] sm:$0xff] %v3840_v23  ;;  %v3843_v33 = vadd.f32 %v3395_v28, %v2335_v11  ;;  %v3397_v52 = vpop.f32.mrb[99].mxu0  ;;  %v4878_v50 = vpop.f32.mrb[163].mxu1 }
 0x421   : > { %3937 = vst [vmem:[#allocation2 + $0x188] sm:$0xff] %v3841_v48  ;;  %v3730_v51 = vadd.f32 %v4876_v32, %v6855_v55  ;;  %v3844_v54 = vadd.f32 %v3397_v52, %v2336_v26  ;;  %v4879_v41 = vadd.f32 %v4878_v50, %v4877_v36  ;;  %v2348_v32 = vld [vmem:[#allocation2 + $0x200] sm:$0xff] }
 0x422   : > { %3939 = vst [vmem:[#allocation2 + $0x198] sm:$0xff] %v3843_v33  ;;  %v2346_v33 = vld [vmem:[#allocation2 + $0x1f0] sm:$0xff] }
 0x423   : > { %v3842_v21 = vadd.f32 %v3730_v51, %v2334_v39  ;;  %3940 = vst [vmem:[#allocation2 + $0x1a0] sm:$0xff] %v3844_v54  ;;  %v3733_v0 = vadd.f32 %v4879_v41, %v6857_v62 }
 0x425   : > { %3938 = vst [vmem:[#allocation2 + $0x190] sm:$0xff] %v3842_v21  ;;  %v3845_v3 = vadd.f32 %v3733_v0, %v2337_v57  ;;  %v3401_v27 = vpop.f32.mrb[100].mxu0  ;;  %v4880_v17 = vpop.f32.mrb[164].mxu1  ;;  %v2349_v57 = vld [vmem:[#allocation2 + $0x208] sm:$0xff] }
 0x426   : > { %v3846_v37 = vadd.f32 %v3401_v27, %v2338_v2  ;;  %v3403_v40 = vpop.f32.mrb[101].mxu0  ;;  %v4881_v14 = vpop.f32.mrb[165].mxu1  ;;  %v2350_v2 = vld [vmem:[#allocation2 + $0x210] sm:$0xff] }
 0x427   : > { %3941 = vst [vmem:[#allocation2 + $0x1a8] sm:$0xff] %v3845_v3  ;;  %v3847_v55 = vadd.f32 %v3403_v40, %v2339_v12  ;;  %v4882_v58 = vadd.f32 %v4881_v14, %v4880_v17  ;;  %v3405_v44 = vpop.f32.mrb[102].mxu0  ;;  %v4883_v38 = vpop.f32.mrb[166].mxu1  ;;  %v2351_v12 = vld [vmem:[#allocation2 + $0x218] sm:$0xff] }
 0x428   : > { %3942 = vst [vmem:[#allocation2 + $0x1b0] sm:$0xff] %v3846_v37  ;;  %v3849_v56 = vadd.f32 %v3405_v44, %v2341_v13  ;;  %v3407_v62 = vpop.f32.mrb[103].mxu0  ;;  %v4884_v22 = vpop.f32.mrb[167].mxu1  ;;  %v2353_v13 = vld [vmem:[#allocation2 + $0x228] sm:$0xff] }
 0x429   : > { %3943 = vst [vmem:[#allocation2 + $0x1b8] sm:$0xff] %v3847_v55  ;;  %v3738_v1 = vadd.f32 %v4882_v58, %v6859_v15  ;;  %v3850_v49 = vadd.f32 %v3407_v62, %v2342_v20  ;;  %v4885_v16 = vadd.f32 %v4884_v22, %v4883_v38  ;;  %v2354_v20 = vld [vmem:[#allocation2 + $0x230] sm:$0xff]  ;;  %v2352_v38 = vld [vmem:[#allocation2 + $0x220] sm:$0xff] }
 0x42a   : > { %3945 = vst [vmem:[#allocation2 + $0x1c8] sm:$0xff] %v3849_v56 }
 0x42b   : > { %v3848_v46 = vadd.f32 %v3738_v1, %v2340_v25  ;;  %3946 = vst [vmem:[#allocation2 + $0x1d0] sm:$0xff] %v3850_v49  ;;  %v3741_v43 = vadd.f32 %v4885_v16, %v6861_v19  ;;  %v2355_v49 = vld [vmem:[#allocation2 + $0x238] sm:$0xff] }
 0x42d   : > { %3944 = vst [vmem:[#allocation2 + $0x1c0] sm:$0xff] %v3848_v46  ;;  %v3851_v9 = vadd.f32 %v3741_v43, %v2343_v18  ;;  %v3411_v11 = vpop.f32.mrb[104].mxu0  ;;  %v4886_v23 = vpop.f32.mrb[168].mxu1  ;;  %v2356_v46 = vld [vmem:[#allocation2 + $0x240] sm:$0xff]  ;;  %v2357_v43 = vld [vmem:[#allocation2 + $0x248] sm:$0xff] }
 0x42e   : > { %v3852_v5 = vadd.f32 %v3411_v11, %v2344_v30  ;;  %v3413_v26 = vpop.f32.mrb[105].mxu0  ;;  %v4887_v48 = vpop.f32.mrb[169].mxu1  ;;  %v2359_v11 = vld [vmem:[#allocation2 + $0x258] sm:$0xff] }
 0x42f   : > { %3947 = vst [vmem:[#allocation2 + $0x1d8] sm:$0xff] %v3851_v9  ;;  %v3853_v15 = vadd.f32 %v3413_v26, %v2345_v24  ;;  %v4888_v28 = vadd.f32 %v4887_v48, %v4886_v23  ;;  %v3415_v36 = vpop.f32.mrb[106].mxu0  ;;  %v4889_v39 = vpop.f32.mrb[170].mxu1  ;;  %v2360_v26 = vld [vmem:[#allocation2 + $0x260] sm:$0xff] }
 0x430   : > { %3948 = vst [vmem:[#allocation2 + $0x1e0] sm:$0xff] %v3852_v5  ;;  %v3855_v52 = vadd.f32 %v3415_v36, %v2347_v47  ;;  %v3417_v19 = vpop.f32.mrb[107].mxu0  ;;  %v4890_v50 = vpop.f32.mrb[171].mxu1 }
 0x431   : > { %3949 = vst [vmem:[#allocation2 + $0x1e8] sm:$0xff] %v3853_v15  ;;  %v3746_v51 = vadd.f32 %v4888_v28, %v6863_v42  ;;  %v3856_v54 = vadd.f32 %v3417_v19, %v2348_v32  ;;  %v4891_v41 = vadd.f32 %v4890_v50, %v4889_v39  ;;  %v2358_v28 = vld [vmem:[#allocation2 + $0x250] sm:$0xff]  ;;  %v2361_v50 = vld [vmem:[#allocation2 + $0x268] sm:$0xff] }
 0x432   : > { %3951 = vst [vmem:[#allocation2 + $0x1f8] sm:$0xff] %v3855_v52 }
 0x433   : > { %v3854_v21 = vadd.f32 %v3746_v51, %v2346_v33  ;;  %3952 = vst [vmem:[#allocation2 + $0x200] sm:$0xff] %v3856_v54  ;;  %v3749_v0 = vadd.f32 %v4891_v41, %v6865_v60  ;;  %v2362_v41 = vld [vmem:[#allocation2 + $0x270] sm:$0xff] }
 0x435   : > { %3950 = vst [vmem:[#allocation2 + $0x1f0] sm:$0xff] %v3854_v21  ;;  %v3857_v3 = vadd.f32 %v3749_v0, %v2349_v57  ;;  %v3421_v27 = vpop.f32.mrb[108].mxu0  ;;  %v4892_v17 = vpop.f32.mrb[172].mxu1  ;;  %v2363_v57 = vld [vmem:[#allocation2 + $0x278] sm:$0xff] }
 0x436   : > { %v3858_v37 = vadd.f32 %v3421_v27, %v2350_v2  ;;  %v3423_v40 = vpop.f32.mrb[109].mxu0  ;;  %v4893_v14 = vpop.f32.mrb[173].mxu1 }
 0x437   : > { %3953 = vst [vmem:[#allocation2 + $0x208] sm:$0xff] %v3857_v3  ;;  %v3859_v42 = vadd.f32 %v3423_v40, %v2351_v12  ;;  %v4894_v55 = vadd.f32 %v4893_v14, %v4892_v17  ;;  %v3425_v58 = vpop.f32.mrb[110].mxu0  ;;  %v4895_v44 = vpop.f32.mrb[174].mxu1  ;;  %v2365_v12 = vld [vmem:[#allocation2 + $0x288] sm:$0xff] }
 0x438   : > { %3954 = vst [vmem:[#allocation2 + $0x210] sm:$0xff] %v3858_v37  ;;  %v3861_v25 = vadd.f32 %v3425_v58, %v2353_v13  ;;  %v3427_v60 = vpop.f32.mrb[111].mxu0  ;;  %v4896_v56 = vpop.f32.mrb[175].mxu1  ;;  %v2366_v13 = vld [vmem:[#allocation2 + $0x290] sm:$0xff] }
 0x439   : > { %3955 = vst [vmem:[#allocation2 + $0x218] sm:$0xff] %v3859_v42  ;;  %v3754_v62 = vadd.f32 %v4894_v55, %v6867_v63  ;;  %v3862_v22 = vadd.f32 %v3427_v60, %v2354_v20  ;;  %v4897_v1 = vadd.f32 %v4896_v56, %v4895_v44  ;;  %v2364_v20 = vld [vmem:[#allocation2 + $0x280] sm:$0xff] }
 0x43a   : > { %3957 = vst [vmem:[#allocation2 + $0x228] sm:$0xff] %v3861_v25  ;;  %v2367_v25 = vld [vmem:[#allocation2 + $0x298] sm:$0xff] }
 0x43b   : > { %v3860_v16 = vadd.f32 %v3754_v62, %v2352_v38  ;;  %3958 = vst [vmem:[#allocation2 + $0x230] sm:$0xff] %v3862_v22  ;;  %v3757_v18 = vadd.f32 %v4897_v1, %v6869_v31  ;;  %v2368_v62 = vld [vmem:[#allocation2 + $0x2a0] sm:$0xff]  ;;  %v2369_v22 = vld [vmem:[#allocation2 + $0x2a8] sm:$0xff] }
 0x43d   : > { %3956 = vst [vmem:[#allocation2 + $0x220] sm:$0xff] %v3860_v16  ;;  %v3863_v30 = vadd.f32 %v3757_v18, %v2355_v49  ;;  %v3431_v24 = vpop.f32.mrb[112].mxu0  ;;  %v4898_v9 = vpop.f32.mrb[176].mxu1  ;;  %v2371_v18 = vld [vmem:[#allocation2 + $0x2b8] sm:$0xff] }
 0x43e   : > { %v3864_v23 = vadd.f32 %v3431_v24, %v2356_v46  ;;  %v3433_v47 = vpop.f32.mrb[113].mxu0  ;;  %v4899_v5 = vpop.f32.mrb[177].mxu1  ;;  %v2372_v24 = vld [vmem:[#allocation2 + $0x2c0] sm:$0xff] }
 0x43f   : > { %3959 = vst [vmem:[#allocation2 + $0x238] sm:$0xff] %v3863_v30  ;;  %v3865_v63 = vadd.f32 %v3433_v47, %v2357_v43  ;;  %v4900_v48 = vadd.f32 %v4899_v5, %v4898_v9  ;;  %v3435_v32 = vpop.f32.mrb[114].mxu0  ;;  %v4901_v15 = vpop.f32.mrb[178].mxu1  ;;  %v2370_v47 = vld [vmem:[#allocation2 + $0x2b0] sm:$0xff] }
 0x440   : > { %3960 = vst [vmem:[#allocation2 + $0x240] sm:$0xff] %v3864_v23  ;;  %v3867_v36 = vadd.f32 %v3435_v32, %v2359_v11  ;;  %v3437_v31 = vpop.f32.mrb[115].mxu0  ;;  %v4902_v39 = vpop.f32.mrb[179].mxu1 }
 0x441   : > { %3961 = vst [vmem:[#allocation2 + $0x248] sm:$0xff] %v3865_v63  ;;  %v3762_v33 = vadd.f32 %v4900_v48, %v6871_v59  ;;  %v3868_v52 = vadd.f32 %v3437_v31, %v2360_v26  ;;  %v4903_v19 = vadd.f32 %v4902_v39, %v4901_v15  ;;  %v2373_v15 = vld [vmem:[#allocation2 + $0x2c8] sm:$0xff]  ;;  %v2374_v31 = vld [vmem:[#allocation2 + $0x2d0] sm:$0xff]  ;;  %v2375_v39 = vld [vmem:[#allocation2 + $0x2d8] sm:$0xff] }
 0x442   : > { %3963 = vst [vmem:[#allocation2 + $0x258] sm:$0xff] %v3867_v36 }
 0x443   : > { %v3866_v51 = vadd.f32 %v3762_v33, %v2358_v28  ;;  %3964 = vst [vmem:[#allocation2 + $0x260] sm:$0xff] %v3868_v52  ;;  %v3765_v54 = vadd.f32 %v4903_v19, %v6873_v34 }
 0x445   : > { %3962 = vst [vmem:[#allocation2 + $0x250] sm:$0xff] %v3866_v51  ;;  %v3869_v21 = vadd.f32 %v3765_v54, %v2361_v50  ;;  %v3441_v0 = vpop.f32.mrb[116].mxu0  ;;  %v4904_v2 = vpop.f32.mrb[180].mxu1  ;;  %v2377_v50 = vld [vmem:[#allocation2 + $0x2e8] sm:$0xff] }
 0x446   : > { %v3870_v3 = vadd.f32 %v3441_v0, %v2362_v41  ;;  %v3443_v27 = vpop.f32.mrb[117].mxu0  ;;  %v4905_v17 = vpop.f32.mrb[181].mxu1 }
 0x447   : > { %3965 = vst [vmem:[#allocation2 + $0x268] sm:$0xff] %v3869_v21  ;;  %v3871_v59 = vadd.f32 %v3443_v27, %v2363_v57  ;;  %v4906_v37 = vadd.f32 %v4905_v17, %v4904_v2  ;;  %v3445_v40 = vpop.f32.mrb[118].mxu0  ;;  %v4907_v14 = vpop.f32.mrb[182].mxu1  ;;  %v2378_v57 = vld [vmem:[#allocation2 + $0x2f0] sm:$0xff] }
 0x448   : > { %3966 = vst [vmem:[#allocation2 + $0x270] sm:$0xff] %v3870_v3  ;;  %v3873_v42 = vadd.f32 %v3445_v40, %v2365_v12  ;;  %v3447_v34 = vpop.f32.mrb[119].mxu0  ;;  %v4908_v55 = vpop.f32.mrb[183].mxu1  ;;  %v2376_v12 = vld [vmem:[#allocation2 + $0x2e0] sm:$0xff] }
 0x449   : > { %3967 = vst [vmem:[#allocation2 + $0x278] sm:$0xff] %v3871_v59  ;;  %v3770_v58 = vadd.f32 %v4906_v37, %v6875_v4  ;;  %v3874_v44 = vadd.f32 %v3447_v34, %v2366_v13  ;;  %v4909_v38 = vadd.f32 %v4908_v55, %v4907_v14  ;;  %v2379_v37 = vld [vmem:[#allocation2 + $0x2f8] sm:$0xff]  ;;  %v4084_v34 = vld [vmem:[#allocation11] sm:$0x7] (!%p4691_p12) }
 0x44a   : > { %3969 = vst [vmem:[#allocation2 + $0x288] sm:$0xff] %v3873_v42  ;;  %v3988_v42 = vld [vmem:[#allocation2] sm:$0xff] (!%p4691_p12)  ;;  %v3989_v55 = vld [vmem:[#allocation2 + $0x8] sm:$0xff] (!%p4691_p12) }
 0x44b   : > { %v3872_v60 = vadd.f32 %v3770_v58, %v2364_v20  ;;  %3970 = vst [vmem:[#allocation2 + $0x290] sm:$0xff] %v3874_v44  ;;  %v3773_v56 = vadd.f32 %v4909_v38, %v6877_v29  ;;  %v6926_v58 = vrot.slane (!%p4691_p12), %v4084_v34, %v634_v10  ;;  %v3990_v44 = vld [vmem:[#allocation2 + $0x10] sm:$0xff] (!%p4691_p12)  ;;  %v3991_v38 = vld [vmem:[#allocation2 + $0x18] sm:$0xff] (!%p4691_p12)  ;;  %v3996_v10 = vld [vmem:[#allocation2 + $0x40] sm:$0xff] (!%p4691_p12) }
 0x44d   : > { %3968 = vst [vmem:[#allocation2 + $0x280] sm:$0xff] %v3872_v60  ;;  %v3875_v1 = vadd.f32 %v3773_v56, %v2367_v25  ;;  %v3451_v49 = vpop.f32.mrb[120].mxu0  ;;  %v4910_v16 = vpop.f32.mrb[184].mxu1  ;;  %v3992_v25 = vld [vmem:[#allocation2 + $0x20] sm:$0xff] (!%p4691_p12)  ;;  %v3993_v60 = vld [vmem:[#allocation2 + $0x28] sm:$0xff] (!%p4691_p12)  ;;  %v3994_v56 = vld [vmem:[#allocation2 + $0x30] sm:$0xff] (!%p4691_p12) }
 0x44e   : > { %v3876_v46 = vadd.f32 %v3451_v49, %v2368_v62  ;;  %v3453_v43 = vpop.f32.mrb[121].mxu0  ;;  %v4911_v30 = vpop.f32.mrb[185].mxu1  ;;  %v3995_v62 = vld [vmem:[#allocation2 + $0x38] sm:$0xff] (!%p4691_p12)  ;;  %v4105_v6 = vadd.f32 (!%p4691_p12), %v6926_v58, %v3992_v25  ;;  %v4021_v25 = vld [vmem:[#allocation2 + $0x108] sm:$0xff] (!%p4691_p12) }
 0x44f   : > { %3971 = vst [vmem:[#allocation2 + $0x298] sm:$0xff] %v3875_v1  ;;  %v3877_v4 = vadd.f32 %v3453_v43, %v2369_v22  ;;  %v4912_v9 = vadd.f32 %v4911_v30, %v4910_v16  ;;  %v3455_v11 = vpop.f32.mrb[122].mxu0  ;;  %v4913_v23 = vpop.f32.mrb[186].mxu1  ;;  %v4102_v1 = vadd.f32 (!%p4691_p12), %v6926_v58, %v3989_v55  ;;  %v3997_v16 = vld [vmem:[#allocation2 + $0x48] sm:$0xff] (!%p4691_p12)  ;;  %v4108_v43 = vadd.f32 (!%p4691_p12), %v6926_v58, %v3995_v62  ;;  %v3999_v30 = vld [vmem:[#allocation2 + $0x58] sm:$0xff] (!%p4691_p12) }
 0x450   : > { %3972 = vst [vmem:[#allocation2 + $0x2a0] sm:$0xff] %v3876_v46  ;;  %v3879_v5 = vadd.f32 %v3455_v11, %v2371_v18  ;;  %v3457_v29 = vpop.f32.mrb[123].mxu0  ;;  %v4914_v26 = vpop.f32.mrb[187].mxu1  ;;  %v3998_v18 = vld [vmem:[#allocation2 + $0x50] sm:$0xff] (!%p4691_p12)  ;;  %4201 = vst [vmem:[#allocation12 + $0x20] sm:$0xff] (!%p4691_p12), %v4105_v6 }
 0x451   : > { %3973 = vst [vmem:[#allocation2 + $0x2a8] sm:$0xff] %v3877_v4  ;;  %v3778_v63 = vadd.f32 %v4912_v9, %v6879_v35  ;;  %v3880_v48 = vadd.f32 %v3457_v29, %v2372_v24  ;;  %v4915_v32 = vadd.f32 %v4914_v26, %v4913_v23  ;;  %v4000_v24 = vld [vmem:[#allocation2 + $0x60] sm:$0xff] (!%p4691_p12)  ;;  %v4001_v4 = vld [vmem:[#allocation2 + $0x68] sm:$0xff] (!%p4691_p12)  ;;  %4198 = vst [vmem:[#allocation12 + $0x8] sm:$0xff] (!%p4691_p12), %v4102_v1 }
 0x452   : > { %3975 = vst [vmem:[#allocation2 + $0x2b8] sm:$0xff] %v3879_v5  ;;  %v4111_v23 = vadd.f32 (!%p4691_p12), %v6926_v58, %v3998_v18  ;;  %v4002_v5 = vld [vmem:[#allocation2 + $0x70] sm:$0xff] (!%p4691_p12)  ;;  %v4003_v29 = vld [vmem:[#allocation2 + $0x78] sm:$0xff] (!%p4691_p12)  ;;  %v4004_v26 = vld [vmem:[#allocation2 + $0x80] sm:$0xff] (!%p4691_p12) }
 0x453   : > { %v3878_v28 = vadd.f32 %v3778_v63, %v2370_v47  ;;  %3976 = vst [vmem:[#allocation2 + $0x2c0] sm:$0xff] %v3880_v48  ;;  %v3781_v36 = vadd.f32 %v4915_v32, %v6881_v45  ;;  %4204 = vst [vmem:[#allocation12 + $0x38] sm:$0xff] (!%p4691_p12), %v4108_v43  ;;  %v4114_v48 = vadd.f32 (!%p4691_p12), %v6926_v58, %v4001_v4  ;;  %v4023_v1 = vld [vmem:[#allocation2 + $0x118] sm:$0xff] (!%p4691_p12)  ;;  %v4026_v6 = vld [vmem:[#allocation2 + $0x130] sm:$0xff] (!%p4691_p12) }
 0x454   : > { %4207 = vst [vmem:[#allocation12 + $0x50] sm:$0xff] (!%p4691_p12), %v4111_v23  ;;  %v4029_v4 = vld [vmem:[#allocation2 + $0x148] sm:$0xff] (!%p4691_p12) }
 0x455   : > { %3974 = vst [vmem:[#allocation2 + $0x2b0] sm:$0xff] %v3878_v28  ;;  %v3881_v33 = vadd.f32 %v3781_v36, %v2373_v15  ;;  %v3461_v52 = vpop.f32.mrb[124].mxu0  ;;  %v4916_v19 = vpop.f32.mrb[188].mxu1  ;;  %v4005_v28 = vld [vmem:[#allocation2 + $0x88] sm:$0xff] (!%p4691_p12)  ;;  %v4006_v36 = vld [vmem:[#allocation2 + $0x90] sm:$0xff] (!%p4691_p12)  ;;  %4210 = vst [vmem:[#allocation12 + $0x68] sm:$0xff] (!%p4691_p12), %v4114_v48 }
 0x456   : > { %v3882_v51 = vadd.f32 %v3461_v52, %v2374_v31  ;;  %v3463_v54 = vpop.f32.mrb[125].mxu0  ;;  %v4917_v41 = vpop.f32.mrb[189].mxu1  ;;  %v4007_v31 = vld [vmem:[#allocation2 + $0x98] sm:$0xff] (!%p4691_p12) }
 0x457   : > { %3977 = vst [vmem:[#allocation2 + $0x2c8] sm:$0xff] %v3881_v33  ;;  %v3883_v35 = vadd.f32 %v3463_v54, %v2375_v39  ;;  %v4918_v21 = vadd.f32 %v4917_v41, %v4916_v19  ;;  %v3465_v0 = vpop.f32.mrb[126].mxu0  ;;  %v4919_v2 = vpop.f32.mrb[190].mxu1  ;;  %v4117_v39 = vadd.f32 (!%p4691_p12), %v6926_v58, %v4004_v26  ;;  %v4120_v19 = vadd.f32 (!%p4691_p12), %v6926_v58, %v4007_v31  ;;  %v4010_v54 = vld [vmem:[#allocation2 + $0xb0] sm:$0xff] (!%p4691_p12)  ;;  %v4033_v26 = vld [vmem:[#allocation2 + $0x168] sm:$0xff] (!%p4691_p12) }
 0x458   : > { %3978 = vst [vmem:[#allocation2 + $0x2d0] sm:$0xff] %v3882_v51  ;;  %v3885_v3 = vadd.f32 %v3465_v0, %v2377_v50  ;;  %v3467_v45 = vpop.f32.mrb[127].mxu0  ;;  %v4920_v27 = vpop.f32.mrb[191].mxu1  ;;  %v4008_v50 = vld [vmem:[#allocation2 + $0xa0] sm:$0xff] (!%p4691_p12)  ;;  %v4009_v51 = vld [vmem:[#allocation2 + $0xa8] sm:$0xff] (!%p4691_p12) }
 0x459   : > { %3979 = vst [vmem:[#allocation2 + $0x2d8] sm:$0xff] %v3883_v35  ;;  %v3786_v17 = vadd.f32 %v4918_v21, %v6883_v53  ;;  %v3886_v13 = vadd.f32 %v3467_v45, %v2378_v57  ;;  %v4921_v59 = vadd.f32 %v4920_v27, %v4919_v2  ;;  %3987 = sbr.rel (%p4691_p12) target bundleno = 1163 (0x48b), region = 68  ;;  %v6922_v53 = vrot.slane (!%p4691_p12), %v4084_v34, %v630_v7  ;;  %v4011_v21 = vld [vmem:[#allocation2 + $0xb8] sm:$0xff] (!%p4691_p12)  ;;  %v4012_v0 = vld [vmem:[#allocation2 + $0xc0] sm:$0xff] (!%p4691_p12)  ;;  %v4013_v2 = vld [vmem:[#allocation2 + $0xc8] sm:$0xff] (!%p4691_p12) }
 0x45a   : > { %3981 = vst [vmem:[#allocation2 + $0x2e8] sm:$0xff] %v3885_v3  ;;  %v4123_v35 = vadd.f32 (!%p4691_p12), %v6926_v58, %v4010_v54  ;;  %4213 = vst [vmem:[#allocation12 + $0x80] sm:$0xff] (!%p4691_p12), %v4117_v39  ;;  %v4126_v45 = vadd.f32 (!%p4691_p12), %v6926_v58, %v4013_v2  ;;  %v4014_v27 = vld [vmem:[#allocation2 + $0xd0] sm:$0xff] (!%p4691_p12)  ;;  %v4037_v31 = vld [vmem:[#allocation2 + $0x188] sm:$0xff] (!%p4691_p12) }
 0x45b   : > { %v3884_v40 = vadd.f32 %v3786_v17, %v2376_v12  ;;  %3982 = vst [vmem:[#allocation2 + $0x2f0] sm:$0xff] %v3886_v13  ;;  %v3789_v14 = vadd.f32 %v4921_v59, %v6885_v61  ;;  %v6930_v61 = vrot.slane (!%p4691_p12), %v4084_v34, %v638_v8  ;;  %v4101_v22 = vadd.f32 (!%p4691_p12), %v6922_v53, %v3988_v42  ;;  %v4015_v17 = vld [vmem:[#allocation2 + $0xd8] sm:$0xff] (!%p4691_p12)  ;;  %v4016_v13 = vld [vmem:[#allocation2 + $0xe0] sm:$0xff] (!%p4691_p12) }
 0x45c   : > { %v4104_v49 = vadd.f32 (!%p4691_p12), %v6922_v53, %v3991_v38  ;;  %v4107_v46 = vadd.f32 (!%p4691_p12), %v6922_v53, %v3994_v56  ;;  %v4110_v11 = vadd.f32 (!%p4691_p12), %v6922_v53, %v3997_v16  ;;  %v4113_v63 = vadd.f32 (!%p4691_p12), %v6922_v53, %v4000_v24  ;;  %4216 = vst [vmem:[#allocation12 + $0x98] sm:$0xff] (!%p4691_p12), %v4120_v19  ;;  %v4019_v42 = vld [vmem:[#allocation2 + $0xf8] sm:$0xff] (!%p4691_p12)  ;;  %v4020_v38 = vld [vmem:[#allocation2 + $0x100] sm:$0xff] (!%p4691_p12)  ;;  %v4038_v19 = vld [vmem:[#allocation2 + $0x190] sm:$0xff] (!%p4691_p12) }
 0x45d   : > { %3980 = vst [vmem:[#allocation2 + $0x2e0] sm:$0xff] %v3884_v40  ;;  %v3887_v20 = vadd.f32 %v3789_v14, %v2379_v37  ;;  %v4103_v7 = vadd.f32 (!%p4691_p12), %v6930_v61, %v3990_v44  ;;  %v4106_v8 = vadd.f32 (!%p4691_p12), %v6930_v61, %v3993_v60  ;;  %4197 = vst [vmem:[#allocation12] sm:$0xff] (!%p4691_p12), %v4101_v22  ;;  %v4017_v14 = vld [vmem:[#allocation2 + $0xe8] sm:$0xff] (!%p4691_p12)  ;;  %v4022_v60 = vld [vmem:[#allocation2 + $0x110] sm:$0xff] (!%p4691_p12) }
 0x45e   : > { %4200 = vst [vmem:[#allocation12 + $0x18] sm:$0xff] (!%p4691_p12), %v4104_v49  ;;  %v4109_v9 = vadd.f32 (!%p4691_p12), %v6930_v61, %v3996_v10  ;;  %v4112_v47 = vadd.f32 (!%p4691_p12), %v6930_v61, %v3999_v30  ;;  %4203 = vst [vmem:[#allocation12 + $0x30] sm:$0xff] (!%p4691_p12), %v4107_v46  ;;  %v4115_v32 = vadd.f32 (!%p4691_p12), %v6930_v61, %v4002_v5  ;;  %v4025_v49 = vld [vmem:[#allocation2 + $0x128] sm:$0xff] (!%p4691_p12)  ;;  %v4028_v46 = vld [vmem:[#allocation2 + $0x140] sm:$0xff] (!%p4691_p12) }
 0x45f   : > { %3983 = vst [vmem:[#allocation2 + $0x2f8] sm:$0xff] %v3887_v20  ;;  %4199 = vst [vmem:[#allocation12 + $0x10] sm:$0xff] (!%p4691_p12), %v4103_v7  ;;  %v4116_v15 = vadd.f32 (!%p4691_p12), %v6922_v53, %v4003_v29  ;;  %v4118_v33 = vadd.f32 (!%p4691_p12), %v6930_v61, %v4005_v28  ;;  %v4119_v52 = vadd.f32 (!%p4691_p12), %v6922_v53, %v4006_v36  ;;  %v4018_v20 = vld [vmem:[#allocation2 + $0xf0] sm:$0xff] (!%p4691_p12)  ;;  %v4024_v7 = vld [vmem:[#allocation2 + $0x120] sm:$0xff] (!%p4691_p12) }
 0x460   : > { %4202 = vst [vmem:[#allocation12 + $0x28] sm:$0xff] %v4106_v8  ;;  %4205 = vst [vmem:[#allocation12 + $0x40] sm:$0xff] %v4109_v9  ;;  %v4121_v41 = vadd.f32 %v6930_v61, %v4008_v50  ;;  %v4122_v57 = vadd.f32 %v6922_v53, %v4009_v51  ;;  %v4124_v12 = vadd.f32 %v6930_v61, %v4011_v21  ;;  %v4027_v8 = vld [vmem:[#allocation2 + $0x138] sm:$0xff]  ;;  %v4030_v9 = vld [vmem:[#allocation2 + $0x150] sm:$0xff] }
 0x461   : > { %4206 = vst [vmem:[#allocation12 + $0x48] sm:$0xff] %v4110_v11  ;;  %4208 = vst [vmem:[#allocation12 + $0x58] sm:$0xff] %v4112_v47  ;;  %v4125_v3 = vadd.f32 %v6922_v53, %v4012_v0  ;;  %v4127_v59 = vadd.f32 %v6930_v61, %v4014_v27  ;;  %v4128_v37 = vadd.f32 %v6922_v53, %v4015_v17  ;;  %v4031_v11 = vld [vmem:[#allocation2 + $0x158] sm:$0xff]  ;;  %v4032_v29 = vld [vmem:[#allocation2 + $0x160] sm:$0xff] }
 0x462   : > { %4209 = vst [vmem:[#allocation12 + $0x60] sm:$0xff] %v4113_v63  ;;  %4211 = vst [vmem:[#allocation12 + $0x70] sm:$0xff] %v4115_v32  ;;  %v4129_v40 = vadd.f32 %v6926_v58, %v4016_v13  ;;  %v4130_v34 = vadd.f32 %v6930_v61, %v4017_v14  ;;  %v4131_v55 = vadd.f32 %v6922_v53, %v4018_v20  ;;  %v4034_v63 = vld [vmem:[#allocation2 + $0x170] sm:$0xff]  ;;  %v4035_v28 = vld [vmem:[#allocation2 + $0x178] sm:$0xff] }
 0x463   : > { %4212 = vst [vmem:[#allocation12 + $0x78] sm:$0xff] %v4116_v15  ;;  %4214 = vst [vmem:[#allocation12 + $0x88] sm:$0xff] %v4118_v33  ;;  %v4132_v44 = vadd.f32 %v6926_v58, %v4019_v42  ;;  %v4133_v56 = vadd.f32 %v6930_v61, %v4020_v38  ;;  %v4134_v62 = vadd.f32 %v6922_v53, %v4021_v25  ;;  %v4036_v36 = vld [vmem:[#allocation2 + $0x180] sm:$0xff]  ;;  %v4039_v50 = vld [vmem:[#allocation2 + $0x198] sm:$0xff] }
 0x464   : > { %4215 = vst [vmem:[#allocation12 + $0x90] sm:$0xff] %v4119_v52  ;;  %4217 = vst [vmem:[#allocation12 + $0xa0] sm:$0xff] %v4121_v41  ;;  %v4135_v22 = vadd.f32 %v6926_v58, %v4022_v60  ;;  %v4136_v10 = vadd.f32 %v6930_v61, %v4023_v1  ;;  %v4137_v16 = vadd.f32 %v6922_v53, %v4024_v7  ;;  %v4040_v51 = vld [vmem:[#allocation2 + $0x1a0] sm:$0xff]  ;;  %v4042_v21 = vld [vmem:[#allocation2 + $0x1b0] sm:$0xff] }
 0x465   : > { %4218 = vst [vmem:[#allocation12 + $0xa8] sm:$0xff] %v4122_v57  ;;  %4219 = vst [vmem:[#allocation12 + $0xb0] sm:$0xff] %v4123_v35  ;;  %v4138_v18 = vadd.f32 %v6926_v58, %v4025_v49  ;;  %v4139_v43 = vadd.f32 %v6930_v61, %v4026_v6  ;;  %v4140_v30 = vadd.f32 %v6922_v53, %v4027_v8  ;;  %v4041_v35 = vld [vmem:[#allocation2 + $0x1a8] sm:$0xff]  ;;  %v4043_v0 = vld [vmem:[#allocation2 + $0x1b8] sm:$0xff] }
 0x466   : > { %4220 = vst [vmem:[#allocation12 + $0xb8] sm:$0xff] %v4124_v12  ;;  %4221 = vst [vmem:[#allocation12 + $0xc0] sm:$0xff] %v4125_v3  ;;  %v4141_v24 = vadd.f32 %v6926_v58, %v4028_v46  ;;  %v4142_v23 = vadd.f32 %v6930_v61, %v4029_v4  ;;  %v4143_v47 = vadd.f32 %v6922_v53, %v4030_v9  ;;  %v4045_v27 = vld [vmem:[#allocation2 + $0x1c8] sm:$0xff]  ;;  %v4046_v17 = vld [vmem:[#allocation2 + $0x1d0] sm:$0xff] }
 0x467   : > { %4222 = vst [vmem:[#allocation12 + $0xc8] sm:$0xff] %v4126_v45  ;;  %4223 = vst [vmem:[#allocation12 + $0xd0] sm:$0xff] %v4127_v59  ;;  %v4144_v5 = vadd.f32 %v6926_v58, %v4031_v11  ;;  %v4145_v48 = vadd.f32 %v6930_v61, %v4032_v29  ;;  %v4146_v32 = vadd.f32 %v6922_v53, %v4033_v26  ;;  %v4044_v45 = vld [vmem:[#allocation2 + $0x1c0] sm:$0xff]  ;;  %v4049_v20 = vld [vmem:[#allocation2 + $0x1e8] sm:$0xff] }
 0x468   : > { %4224 = vst [vmem:[#allocation12 + $0xd8] sm:$0xff] %v4128_v37  ;;  %4225 = vst [vmem:[#allocation12 + $0xe0] sm:$0xff] %v4129_v40  ;;  %v4147_v15 = vadd.f32 %v6926_v58, %v4034_v63  ;;  %v4148_v39 = vadd.f32 %v6930_v61, %v4035_v28  ;;  %v4149_v33 = vadd.f32 %v6922_v53, %v4036_v36  ;;  %v4047_v40 = vld [vmem:[#allocation2 + $0x1d8] sm:$0xff]  ;;  %v4048_v14 = vld [vmem:[#allocation2 + $0x1e0] sm:$0xff] }
 0x469   : > { %4226 = vst [vmem:[#allocation12 + $0xe8] sm:$0xff] %v4130_v34  ;;  %4227 = vst [vmem:[#allocation12 + $0xf0] sm:$0xff] %v4131_v55  ;;  %v4150_v52 = vadd.f32 %v6926_v58, %v4037_v31  ;;  %v4151_v54 = vadd.f32 %v6930_v61, %v4038_v19  ;;  %v4152_v41 = vadd.f32 %v6922_v53, %v4039_v50  ;;  %v4051_v38 = vld [vmem:[#allocation2 + $0x1f8] sm:$0xff]  ;;  %v4052_v25 = vld [vmem:[#allocation2 + $0x200] sm:$0xff] }
 0x46a   : > { %4228 = vst [vmem:[#allocation12 + $0xf8] sm:$0xff] %v4132_v44  ;;  %4229 = vst [vmem:[#allocation12 + $0x100] sm:$0xff] %v4133_v56  ;;  %v4153_v57 = vadd.f32 %v6926_v58, %v4040_v51  ;;  %v4154_v2 = vadd.f32 %v6930_v61, %v4041_v35  ;;  %v4155_v12 = vadd.f32 %v6922_v53, %v4042_v21  ;;  %v4050_v44 = vld [vmem:[#allocation2 + $0x1f0] sm:$0xff]  ;;  %v4055_v7 = vld [vmem:[#allocation2 + $0x218] sm:$0xff] }
 0x46b   : > { %4230 = vst [vmem:[#allocation12 + $0x108] sm:$0xff] %v4134_v62  ;;  %4231 = vst [vmem:[#allocation12 + $0x110] sm:$0xff] %v4135_v22  ;;  %v4156_v3 = vadd.f32 %v6926_v58, %v4043_v0  ;;  %v4157_v13 = vadd.f32 %v6930_v61, %v4044_v45  ;;  %v4158_v59 = vadd.f32 %v6922_v53, %v4045_v27  ;;  %v4053_v22 = vld [vmem:[#allocation2 + $0x208] sm:$0xff]  ;;  %v4054_v1 = vld [vmem:[#allocation2 + $0x210] sm:$0xff] }
 0x46c   : > { %4232 = vst [vmem:[#allocation12 + $0x118] sm:$0xff] %v4136_v10  ;;  %4233 = vst [vmem:[#allocation12 + $0x120] sm:$0xff] %v4137_v16  ;;  %v4159_v37 = vadd.f32 %v6926_v58, %v4046_v17  ;;  %v4160_v42 = vadd.f32 %v6930_v61, %v4047_v40  ;;  %v4161_v34 = vadd.f32 %v6922_v53, %v4048_v14  ;;  %v4057_v6 = vld [vmem:[#allocation2 + $0x228] sm:$0xff]  ;;  %v4058_v8 = vld [vmem:[#allocation2 + $0x230] sm:$0xff] }
 0x46d   : > { %4234 = vst [vmem:[#allocation12 + $0x128] sm:$0xff] %v4138_v18  ;;  %4235 = vst [vmem:[#allocation12 + $0x130] sm:$0xff] %v4139_v43  ;;  %v4162_v55 = vadd.f32 %v6926_v58, %v4049_v20  ;;  %v4163_v60 = vadd.f32 %v6930_v61, %v4050_v44  ;;  %v4164_v56 = vadd.f32 %v6922_v53, %v4051_v38  ;;  %v4056_v18 = vld [vmem:[#allocation2 + $0x220] sm:$0xff]  ;;  %v4061_v9 = vld [vmem:[#allocation2 + $0x248] sm:$0xff] }
 0x46e   : > { %4236 = vst [vmem:[#allocation12 + $0x138] sm:$0xff] %v4140_v30  ;;  %4237 = vst [vmem:[#allocation12 + $0x140] sm:$0xff] %v4141_v24  ;;  %v4165_v62 = vadd.f32 %v6926_v58, %v4052_v25  ;;  %v4166_v49 = vadd.f32 %v6930_v61, %v4053_v22  ;;  %v4167_v10 = vadd.f32 %v6922_v53, %v4054_v1  ;;  %v4059_v24 = vld [vmem:[#allocation2 + $0x238] sm:$0xff]  ;;  %v4060_v4 = vld [vmem:[#allocation2 + $0x240] sm:$0xff] }
 0x46f   : > { %4238 = vst [vmem:[#allocation12 + $0x148] sm:$0xff] %v4142_v23  ;;  %4239 = vst [vmem:[#allocation12 + $0x150] sm:$0xff] %v4143_v47  ;;  %v4168_v16 = vadd.f32 %v6926_v58, %v4055_v7  ;;  %v4169_v46 = vadd.f32 %v6930_v61, %v4056_v18  ;;  %v4170_v43 = vadd.f32 %v6922_v53, %v4057_v6  ;;  %v4063_v29 = vld [vmem:[#allocation2 + $0x258] sm:$0xff]  ;;  %v4064_v26 = vld [vmem:[#allocation2 + $0x260] sm:$0xff] }
 0x470   : > { %4240 = vst [vmem:[#allocation12 + $0x158] sm:$0xff] %v4144_v5  ;;  %4241 = vst [vmem:[#allocation12 + $0x160] sm:$0xff] %v4145_v48  ;;  %v4171_v30 = vadd.f32 %v6926_v58, %v4058_v8  ;;  %v4172_v11 = vadd.f32 %v6930_v61, %v4059_v24  ;;  %v4173_v23 = vadd.f32 %v6922_v53, %v4060_v4  ;;  %v4062_v5 = vld [vmem:[#allocation2 + $0x250] sm:$0xff]  ;;  %v4067_v36 = vld [vmem:[#allocation2 + $0x278] sm:$0xff] }
 0x471   : > { %4242 = vst [vmem:[#allocation12 + $0x168] sm:$0xff] %v4146_v32  ;;  %4243 = vst [vmem:[#allocation12 + $0x170] sm:$0xff] %v4147_v15  ;;  %v4174_v47 = vadd.f32 %v6926_v58, %v4061_v9  ;;  %v4175_v63 = vadd.f32 %v6930_v61, %v4062_v5  ;;  %v4176_v48 = vadd.f32 %v6922_v53, %v4063_v29  ;;  %v4065_v15 = vld [vmem:[#allocation2 + $0x268] sm:$0xff]  ;;  %v4066_v28 = vld [vmem:[#allocation2 + $0x270] sm:$0xff] }
 0x472   : > { %4244 = vst [vmem:[#allocation12 + $0x178] sm:$0xff] %v4148_v39  ;;  %4245 = vst [vmem:[#allocation12 + $0x180] sm:$0xff] %v4149_v33  ;;  %v4177_v32 = vadd.f32 %v6926_v58, %v4064_v26  ;;  %v4178_v31 = vadd.f32 %v6930_v61, %v4065_v15  ;;  %v4179_v39 = vadd.f32 %v6922_v53, %v4066_v28  ;;  %v4069_v19 = vld [vmem:[#allocation2 + $0x288] sm:$0xff]  ;;  %v4070_v50 = vld [vmem:[#allocation2 + $0x290] sm:$0xff] }
 0x473   : > { %4246 = vst [vmem:[#allocation12 + $0x188] sm:$0xff] %v4150_v52  ;;  %4247 = vst [vmem:[#allocation12 + $0x190] sm:$0xff] %v4151_v54  ;;  %v4180_v33 = vadd.f32 %v6926_v58, %v4067_v36  ;;  %v4068_v52 = vld [vmem:[#allocation2 + $0x280] sm:$0xff]  ;;  %v4182_v54 = vadd.f32 %v6922_v53, %v4069_v19  ;;  %v4073_v21 = vld [vmem:[#allocation2 + $0x2a8] sm:$0xff] }
 0x474   : > { %4248 = vst [vmem:[#allocation12 + $0x198] sm:$0xff] %v4152_v41  ;;  %4249 = vst [vmem:[#allocation12 + $0x1a0] sm:$0xff] %v4153_v57  ;;  %v4181_v51 = vadd.f32 %v6930_v61, %v4068_v52  ;;  %v4183_v41 = vadd.f32 %v6926_v58, %v4070_v50  ;;  %v4071_v57 = vld [vmem:[#allocation2 + $0x298] sm:$0xff]  ;;  %v4072_v35 = vld [vmem:[#allocation2 + $0x2a0] sm:$0xff] }
 0x475   : > { %4250 = vst [vmem:[#allocation12 + $0x1a8] sm:$0xff] %v4154_v2  ;;  %4251 = vst [vmem:[#allocation12 + $0x1b0] sm:$0xff] %v4155_v12  ;;  %v4184_v0 = vadd.f32 %v6930_v61, %v4071_v57  ;;  %v4185_v2 = vadd.f32 %v6922_v53, %v4072_v35  ;;  %v4186_v12 = vadd.f32 %v6926_v58, %v4073_v21  ;;  %v4075_v45 = vld [vmem:[#allocation2 + $0x2b8] sm:$0xff]  ;;  %v4076_v27 = vld [vmem:[#allocation2 + $0x2c0] sm:$0xff] }
 0x476   : > { %4252 = vst [vmem:[#allocation12 + $0x1b8] sm:$0xff] %v4156_v3  ;;  %4253 = vst [vmem:[#allocation12 + $0x1c0] sm:$0xff] %v4157_v13  ;;  %v4074_v3 = vld [vmem:[#allocation2 + $0x2b0] sm:$0xff]  ;;  %v4188_v13 = vadd.f32 %v6922_v53, %v4075_v45  ;;  %v4079_v14 = vld [vmem:[#allocation2 + $0x2d8] sm:$0xff] }
 0x477   : > { %4254 = vst [vmem:[#allocation12 + $0x1c8] sm:$0xff] %v4158_v59  ;;  %4255 = vst [vmem:[#allocation12 + $0x1d0] sm:$0xff] %v4159_v37  ;;  %v4187_v17 = vadd.f32 %v6930_v61, %v4074_v3  ;;  %v4189_v59 = vadd.f32 %v6926_v58, %v4076_v27  ;;  %v4077_v37 = vld [vmem:[#allocation2 + $0x2c8] sm:$0xff]  ;;  %v4078_v40 = vld [vmem:[#allocation2 + $0x2d0] sm:$0xff] }
 0x478   : > { %4256 = vst [vmem:[#allocation12 + $0x1d8] sm:$0xff] %v4160_v42  ;;  %4257 = vst [vmem:[#allocation12 + $0x1e0] sm:$0xff] %v4161_v34  ;;  %v4190_v20 = vadd.f32 %v6930_v61, %v4077_v37  ;;  %v4191_v42 = vadd.f32 %v6922_v53, %v4078_v40  ;;  %v4192_v34 = vadd.f32 %v6926_v58, %v4079_v14  ;;  %v4081_v44 = vld [vmem:[#allocation2 + $0x2e8] sm:$0xff]  ;;  %v4082_v38 = vld [vmem:[#allocation2 + $0x2f0] sm:$0xff] }
 0x479   : > { %4258 = vst [vmem:[#allocation12 + $0x1e8] sm:$0xff] %v4162_v55  ;;  %4259 = vst [vmem:[#allocation12 + $0x1f0] sm:$0xff] %v4163_v60  ;;  %v4080_v55 = vld [vmem:[#allocation2 + $0x2e0] sm:$0xff]  ;;  %v4194_v60 = vadd.f32 %v6922_v53, %v4081_v44 }
 0x47a   : > { %4260 = vst [vmem:[#allocation12 + $0x1f8] sm:$0xff] %v4164_v56  ;;  %4261 = vst [vmem:[#allocation12 + $0x200] sm:$0xff] %v4165_v62  ;;  %v4193_v25 = vadd.f32 %v6930_v61, %v4080_v55  ;;  %v4195_v56 = vadd.f32 %v6926_v58, %v4082_v38  ;;  %v4083_v62 = vld [vmem:[#allocation2 + $0x2f8] sm:$0xff] }
 0x47b   : > { %4262 = vst [vmem:[#allocation12 + $0x208] sm:$0xff] %v4166_v49  ;;  %4263 = vst [vmem:[#allocation12 + $0x210] sm:$0xff] %v4167_v10  ;;  %v4196_v22 = vadd.f32 %v6930_v61, %v4083_v62 }
 0x47c   : > { %4264 = vst [vmem:[#allocation12 + $0x218] sm:$0xff] %v4168_v16  ;;  %4265 = vst [vmem:[#allocation12 + $0x220] sm:$0xff] %v4169_v46 }
 0x47d   : > { %4266 = vst [vmem:[#allocation12 + $0x228] sm:$0xff] %v4170_v43  ;;  %4267 = vst [vmem:[#allocation12 + $0x230] sm:$0xff] %v4171_v30 }
 0x47e   : > { %4268 = vst [vmem:[#allocation12 + $0x238] sm:$0xff] %v4172_v11  ;;  %4269 = vst [vmem:[#allocation12 + $0x240] sm:$0xff] %v4173_v23 }
 0x47f   : > { %4270 = vst [vmem:[#allocation12 + $0x248] sm:$0xff] %v4174_v47  ;;  %4271 = vst [vmem:[#allocation12 + $0x250] sm:$0xff] %v4175_v63 }
 0x480   : > { %4272 = vst [vmem:[#allocation12 + $0x258] sm:$0xff] %v4176_v48  ;;  %4273 = vst [vmem:[#allocation12 + $0x260] sm:$0xff] %v4177_v32 }
 0x481   : > { %4274 = vst [vmem:[#allocation12 + $0x268] sm:$0xff] %v4178_v31  ;;  %4275 = vst [vmem:[#allocation12 + $0x270] sm:$0xff] %v4179_v39 }
 0x482   : > { %4276 = vst [vmem:[#allocation12 + $0x278] sm:$0xff] %v4180_v33  ;;  %4277 = vst [vmem:[#allocation12 + $0x280] sm:$0xff] %v4181_v51 }
 0x483   : > { %4278 = vst [vmem:[#allocation12 + $0x288] sm:$0xff] %v4182_v54  ;;  %4279 = vst [vmem:[#allocation12 + $0x290] sm:$0xff] %v4183_v41 }
 0x484   : > { %4280 = vst [vmem:[#allocation12 + $0x298] sm:$0xff] %v4184_v0  ;;  %4281 = vst [vmem:[#allocation12 + $0x2a0] sm:$0xff] %v4185_v2 }
 0x485   : > { %4282 = vst [vmem:[#allocation12 + $0x2a8] sm:$0xff] %v4186_v12  ;;  %4283 = vst [vmem:[#allocation12 + $0x2b0] sm:$0xff] %v4187_v17 }
 0x486   : > { %4284 = vst [vmem:[#allocation12 + $0x2b8] sm:$0xff] %v4188_v13  ;;  %4285 = vst [vmem:[#allocation12 + $0x2c0] sm:$0xff] %v4189_v59 }
 0x487   : > { %4286 = vst [vmem:[#allocation12 + $0x2c8] sm:$0xff] %v4190_v20  ;;  %4287 = vst [vmem:[#allocation12 + $0x2d0] sm:$0xff] %v4191_v42 }
 0x488   : > { %4288 = vst [vmem:[#allocation12 + $0x2d8] sm:$0xff] %v4192_v34  ;;  %4289 = vst [vmem:[#allocation12 + $0x2e0] sm:$0xff] %v4193_v25 }
 0x489   : > { %4290 = vst [vmem:[#allocation12 + $0x2e8] sm:$0xff] %v4194_v60  ;;  %4291 = vst [vmem:[#allocation12 + $0x2f0] sm:$0xff] %v4195_v56 }
 0x48a   : > { %4292 = vst [vmem:[#allocation12 + $0x2f8] sm:$0xff] %v4196_v22 }
 0x48b PF: > { %p5286_p11 = scmp.eq.s32.totalorder %s5998_s24, 2  ;;  %s5936_s30 = smov [#allocation12]  }
 0x48c   : > { %s4303_s25 = sshll.u32 %s5936_s30, 4  ;;  %s4304_s25 = int_to_ptr.vmem [resolvable:$true] %s4303_s25 }
 0x48d   : > { %s5830_s8 = scalar_lea.vmem %s4304_s25, 12288  ;;  %p5837_p6 = scmp.lt.s32.totalorder %s4304_s25, %s4304_s25 }
 0x48e   : > { %p5831_p0 = scmp.ne.s32.totalorder %s4304_s25, %s5830_s8  ;;  %p5838_p8 = scmp.lt.s32.totalorder %s5830_s8, %s5830_s8 }
 0x490   : > { %p5832_p7 = pnand %p5831_p0, %p5286_p11  ;;  %p5839_p13 = por %p5838_p8, %p5837_p6 }
 0x492   : > { %p5833_p10 = pneg %p5832_p7 }
 0x494   : > { %p5840_p3 = pnand %p5839_p13, %p5833_p10 }
 0x496   : > { %5843 = shalt.err (!%p5840_p3)
}
 0x497   : > { %s7118_s16 = sld [smem:[#allocation23_spill]] }
 0x49d   : > { %s5844_s29 = scalar_lea.hbm %s7118_s16, 12288 }
 0x49e   : > { %p5845_p1 = scmp.ne.s32.totalorder %s7118_s16, %s5844_s29  ;;  %p5850_p5 = scmp.lt.u32.totalorder %s5844_s29, %s7118_s16 }
 0x4a0   : > { %p5846_p4 = pnand %p5845_p1, %p5286_p11 }
 0x4a2   : > { %p5847_p9 = pneg %p5846_p4 }
 0x4a4   : > { %p5852_p2 = pnand %p5850_p5, %p5847_p9 }
 0x4a6   : > { %5855 = shalt.err (!%p5852_p2)
}
 0x4a7   : > { %s5937_s13 = smov 384   ;;  %s5938_s7 = smov 24  }
 0x4a8   : > { %5261 = dma.vmem_to_hbm [thread:$0]  (%p5286_p11), %s4304_s25, 12288, %s7118_s16, [#allocation5], %s5937_s13, %s5937_s13, %s5938_s7  }
 0x4a9   : > { %5897 = dma.done.wait (%p5286_p11), [#allocation5], 12288  }
 0x4aa   : > { %5899 = vsyncadd (%p5286_p11), [#allocation5], 4294955008 }
 0x4ab PF: > { %s23_s23 = sadd.s32 1, %s5922_s23   ;;  %s7119_s6 = sld [smem:[#allocation20_spill]] }
 0x4ac   : > { %p20_p12 = scmp.ge.s32.totalorder %s23_s23, 5   ;;  %s7120_s14 = sld [smem:[#allocation19_spill]] }
 0x4ad   : > { %s7121_s18 = smov %s5906_s19  ;;  %s7122_s19 = smov %s5910_s20 }
 0x4ae   : > { %s7124_s21 = smov %s5918_s22  ;;  %22 = sbr.rel (!%p20_p12) target bundleno = 12 (0xc), region = 120 }
 0x4b1   : > { %s7123_s20 = smov %s7119_s6 }
 0x4b2   : > { %s7125_s22 = smov %s7120_s14 }
 0x4b5   :  { %4319 = vsyncpa [#allocation4], 1 }
 0x4b6   :  { %4321 = vsyncpa [#allocation4 + $0x1], 1 }
 0x4b7   :  { %4322 = vsyncpa [#allocation7], 1 }
 0x4b8   :  { %4324 = vsyncpa [#allocation7 + $0x1], 1 }
 0x4b9   :  { %4325 = vsyncpa [#allocation10], 1 }
 0x4ba   :  { %4327 = vsyncpa [#allocation10 + $0x1], 1 }
 0x4bb   :  { %4328 = vsyncpa [#allocation5], 1 }
 0x4bc   :  { %4330 = vsyncpa [#allocation5 + $0x1], 1 }

</bundles_post_ra>
